<compile_context>
chip_gen: v7x
topology: tpu7x:2x2x1
jax: 0.10.0
libtpu: 0.0.40
codegen_flags: <defaults>
</compile_context>

<pallas_src>
import math
import jax
import jax.numpy as jnp
import numpy as np
from jax.experimental import pallas as pl
from jax.experimental.pallas import tpu as pltpu


# ----------------------------------------------------------------------------
# Pallas attention kernel: one batch element (all heads) per grid step.
# ----------------------------------------------------------------------------
def _make_attn_kernel(num_heads, head_dim, scale):
    def kernel(q_ref, k_ref, v_ref, bias_ref, o_ref):
        # q_ref/k_ref/v_ref/o_ref: (Npad, C)   bias_ref: (nh, Npad, Npad)
        # TODO(synk): optionally cast q/k/attn to bf16 for the MXU (full-rate
        # on v5e/v6e/v7x); kept f32 here for tight parity with the reference.
        q = q_ref[...].astype(jnp.float32) * scale   # fold scale into q
        k = k_ref[...].astype(jnp.float32)
        v = v_ref[...].astype(jnp.float32)

        # All heads handled in one grid step; the Python loop unrolls at trace
        # time so the scheduler can interleave MXU / VPU / EUP work across
        # heads.  Every slice below is a static lane slice.
        for h in range(num_heads):
            lo = h * head_dim
            hi = lo + head_dim
            qh = q[:, lo:hi]                     # (Npad, hd)
            kh = k[:, lo:hi]
            vh = v[:, lo:hi]

            # scores = (q*scale) @ k^T + relative_position_bias[h]
            s = jnp.dot(qh, kh.T, preferred_element_type=jnp.float32)
            s = s + bias_ref[h].astype(jnp.float32)          # (Npad, Npad)

            # softmax over keys (padded key columns carry -1e30 bias -> 0 mass)
            m = jnp.max(s, axis=-1, keepdims=True)
            e = jnp.exp(s - m)
            denom = jnp.sum(e, axis=-1, keepdims=True)
            attn = e * pl.reciprocal(denom, approx=True)     # EUP, ~free

            out_h = jnp.dot(attn, vh, preferred_element_type=jnp.float32)
            # lane slice of the (Npad, C) output block; the HBM store is the
            # full lane-dense (Npad, 64) block.
            o_ref[:, lo:hi] = out_h.astype(o_ref.dtype)

    return kernel


def attention_share_local(q, k, v, rel_pos_bias, num_heads, H=None, W=None,
                          group_size=(7, 7)):
    """q, k, v: (B, N, C); rel_pos_bias: (num_heads, Gh*Gh, Gw*Gw).

    Reproduces AttentionShareLocal.forward. The H==7/W==7 branch (bias added
    only to attn[:, :, :49, :49]) is handled by zero-padding the bias to
    (num_heads, Npad, Npad) before the kernel; the `else` branch requires
    N == Gh*Gh == Gw*Gw anyway, which the same padding also covers.
    """
    B, N, C = q.shape
    hd = C // num_heads
    scale = hd ** (-0.5)

    # Pad the token axis to a multiple of 8 so the kernel sees clean sublane
    # shapes.  Padded key columns get -1e30 bias (zero softmax weight); padded
    # query rows are discarded on output.
    Npad = ((N + 7) // 8) * 8
    pad = Npad - N
    if pad:
        qp = jnp.pad(q, ((0, 0), (0, pad), (0, 0)))
        kp = jnp.pad(k, ((0, 0), (0, pad), (0, 0)))
        vp = jnp.pad(v, ((0, 0), (0, pad), (0, 0)))
    else:
        qp, kp, vp = q, k, v

    nb1, nb2 = rel_pos_bias.shape[1], rel_pos_bias.shape[2]
    bias_full = jnp.zeros((num_heads, Npad, Npad), jnp.float32)
    bias_full = bias_full.at[:, :nb1, :nb2].set(rel_pos_bias.astype(jnp.float32))
    if pad:
        bias_full = bias_full.at[:, :, N:].set(-1e30)   # mask padded keys

    qkv_spec = pl.BlockSpec((pl.Squeezed(), Npad, C), lambda b: (b, 0, 0))
    bias_spec = pl.BlockSpec((num_heads, Npad, Npad), lambda b: (0, 0, 0))
    out_spec = pl.BlockSpec((pl.Squeezed(), Npad, C), lambda b: (b, 0, 0))

    out = pl.pallas_call(
        _make_attn_kernel(num_heads, hd, scale),
        out_shape=jax.ShapeDtypeStruct((B, Npad, C), q.dtype),
        grid_spec=pltpu.PrefetchScalarGridSpec(
            num_scalar_prefetch=0,
            grid=(B,),
            in_specs=[qkv_spec, qkv_spec, qkv_spec, bias_spec],
            out_specs=out_spec,
        ),
        compiler_params=pltpu.CompilerParams(
            dimension_semantics=("parallel",)),
    )(qp, kp, vp, bias_full)

    # drop padded query rows; layout is already (B, N, C) — no transpose.
    return out[:, :N, :]


# ----------------------------------------------------------------------------
# dpb_pos: DynamicPosBias-style MLP (2 -> pos_dim -> pos_dim -> pos_dim -> nh)
# Passed as a forward argument in the PyTorch module; implemented here as a
# deterministic synthetic MLP (parameter setup / glue, plain JAX).
# ----------------------------------------------------------------------------
def init_dpb_params(key, dim, num_heads):
    pos_dim = dim // 4
    ks = jax.random.split(key, 4)

    def lin(k, fan_in, fan_out):
        w = jax.random.normal(k, (fan_in, fan_out), jnp.float32) / math.sqrt(fan_in)
        b = jnp.zeros((fan_out,), jnp.float32)
        return w, b

    return {
        "proj": lin(ks[0], 2, pos_dim),
        "l1": lin(ks[1], pos_dim, pos_dim),
        "l2": lin(ks[2], pos_dim, pos_dim),
        "l3": lin(ks[3], pos_dim, num_heads),
    }


def _layernorm(x):
    mu = jnp.mean(x, axis=-1, keepdims=True)
    var = jnp.var(x, axis=-1, keepdims=True)
    return (x - mu) / jnp.sqrt(var + 1e-5)


def dpb_forward(params, biases):
    # biases: ((2Gh-1)*(2Gw-1), 2) -> ((2Gh-1)*(2Gw-1), num_heads)
    w, b = params["proj"]
    x = biases @ w + b
    for name in ("l1", "l2", "l3"):
        w, b = params[name]
        x = jax.nn.relu(_layernorm(x)) @ w + b
    return x


def make_relative_position_bias(dpb_params, group_size, num_heads):
    Gh, Gw = group_size
    # biases grid over relative displacements (note: reference uses Gh for both axes)
    pbh = jnp.arange(1 - Gh, Gh)
    pbw = jnp.arange(1 - Gh, Gh)
    bh, bw = jnp.meshgrid(pbh, pbw, indexing="ij")
    biases = jnp.stack([bh, bw]).reshape(2, -1).T.astype(jnp.float32)  # ((2Gh-1)^2, 2)

    ch = jnp.arange(Gh)
    cw = jnp.arange(Gh)
    cgh, cgw = jnp.meshgrid(ch, cw, indexing="ij")
    coords = jnp.stack([cgh, cgw]).reshape(2, -1)                      # (2, Gh*Gh)
    rel = coords[:, :, None] - coords[:, None, :]                      # (2, G2, G2)
    rel = rel.transpose(1, 2, 0)
    rel = rel.at[:, :, 0].add(Gh - 1)
    rel = rel.at[:, :, 1].add(Gh - 1)
    rel = rel.at[:, :, 0].multiply(2 * Gh - 1)
    rel_idx = rel.sum(-1)                                              # (G2, G2)

    pos = dpb_forward(dpb_params, biases)                              # ((2Gh-1)^2, nh)
    rpb = pos[rel_idx.reshape(-1)].reshape(Gh * Gh, Gh * Gh, num_heads)
    if Gh != Gw:
        rpb = rpb[:, 0:Gw * Gw, :]
    return rpb.transpose(2, 0, 1)                                      # (nh, G2, G2)


# ----------------------------------------------------------------------------
# Plain-JAX reference of the full forward (for a correctness check).
# ----------------------------------------------------------------------------
def reference_forward(q, k, v, rel_pos_bias, num_heads, H, W):
    B, N, C = q.shape
    hd = C // num_heads
    scale = hd ** (-0.5)
    qh = q.reshape(B, N, num_heads, hd).transpose(0, 2, 1, 3)
    kh = k.reshape(B, N, num_heads, hd).transpose(0, 2, 1, 3)
    vh = v.reshape(B, N, num_heads, hd).transpose(0, 2, 1, 3)
    attn = jnp.einsum("bhnd,bhmd->bhnm", qh, kh) * scale
    if H == 7 and W == 7:
        attn = attn.at[:, :, 0:49, 0:49].add(rel_pos_bias[None])
    else:
        attn = attn + rel_pos_bias[None]
    attn = jax.nn.softmax(attn, axis=-1)
    out = jnp.einsum("bhnm,bhmd->bhnd", attn, vh)
    return out.transpose(0, 2, 1, 3).reshape(B, N, C)


if __name__ == "__main__":
    B = 2
    num_heads = 8
    dim = 64                    # C; head_dim = 8
    Gh, Gw = 7, 7
    H = W = 7
    N = Gh * Gw                 # 49 tokens (one 7x7 local group)

    key = jax.random.PRNGKey(0)
    kq, kk, kv, kp = jax.random.split(key, 4)
    q = jax.random.normal(kq, (B, N, dim), jnp.float32)
    k = jax.random.normal(kk, (B, N, dim), jnp.float32)
    v = jax.random.normal(kv, (B, N, dim), jnp.float32)

    dpb_params = init_dpb_params(kp, dim, num_heads)
    rel_pos_bias = make_relative_position_bias(dpb_params, (Gh, Gw), num_heads)

    out = attention_share_local(q, k, v, rel_pos_bias, num_heads,
                                H=H, W=W, group_size=(Gh, Gw))
    out = jax.block_until_ready(out)

    ref = reference_forward(q, k, v, rel_pos_bias, num_heads, H, W)
    # tolerance allows the approx (EUP) reciprocal in the softmax denominator
    np.testing.assert_allclose(np.asarray(out), np.asarray(ref),
                               rtol=2e-3, atol=2e-3)

    print("KERNEL_OK")
</pallas_src>

<mosaic_0001>
module attributes {stable_mosaic.version = 11 : i64} {
  func.func @kernel(%arg0: i32, %arg1: memref<1x56x64xf32, #tpu.memory_space<vmem>>, %arg2: memref<1x56x64xf32, #tpu.memory_space<vmem>>, %arg3: memref<1x56x64xf32, #tpu.memory_space<vmem>>, %arg4: memref<8x56x56xf32, #tpu.memory_space<vmem>>, %arg5: memref<1x56x64xf32, #tpu.memory_space<vmem>>) attributes {dimension_semantics = [#tpu.dimension_semantics<parallel>], iteration_bounds = array<i64: 2>, scalar_prefetch = 0 : i64, scratch_operands = 0 : i64, tpu.core_type = #tpu.core_type<tc>, window_params = [{transform_indices = @transform_0, window_bounds = array<i64: 1, 56, 64>}, {transform_indices = @transform_1, window_bounds = array<i64: 1, 56, 64>}, {transform_indices = @transform_2, window_bounds = array<i64: 1, 56, 64>}, {pipeline_mode = #tpu.pipeline_mode<synchronous>, transform_indices = @transform_3, window_bounds = array<i64: 8, 56, 56>}, {transform_indices = @transform_4, window_bounds = array<i64: 1, 56, 64>}]} {
    %c0 = arith.constant 0 : index
    %c0_0 = arith.constant 0 : index
    %c0_1 = arith.constant 0 : index
    %0 = vector.load %arg1[%c0, %c0_0, %c0_1] : memref<1x56x64xf32, #tpu.memory_space<vmem>>, vector<1x56x64xf32>
    %1 = vector.shape_cast %0 : vector<1x56x64xf32> to vector<56x64xf32>
    %cst = arith.constant 0.353553385 : f32
    %2 = vector.broadcast %cst : f32 to vector<56x64xf32>
    %3 = arith.mulf %1, %2 : vector<56x64xf32>
    %c0_2 = arith.constant 0 : index
    %c0_3 = arith.constant 0 : index
    %c0_4 = arith.constant 0 : index
    %4 = vector.load %arg2[%c0_2, %c0_3, %c0_4] : memref<1x56x64xf32, #tpu.memory_space<vmem>>, vector<1x56x64xf32>
    %5 = vector.shape_cast %4 : vector<1x56x64xf32> to vector<56x64xf32>
    %c0_5 = arith.constant 0 : index
    %c0_6 = arith.constant 0 : index
    %c0_7 = arith.constant 0 : index
    %6 = vector.load %arg3[%c0_5, %c0_6, %c0_7] : memref<1x56x64xf32, #tpu.memory_space<vmem>>, vector<1x56x64xf32>
    %7 = vector.shape_cast %6 : vector<1x56x64xf32> to vector<56x64xf32>
    %8 = vector.extract_strided_slice %3 {offsets = [0, 0], sizes = [56, 8], strides = [1, 1]} : vector<56x64xf32> to vector<56x8xf32>
    %9 = vector.extract_strided_slice %5 {offsets = [0, 0], sizes = [56, 8], strides = [1, 1]} : vector<56x64xf32> to vector<56x8xf32>
    %10 = vector.extract_strided_slice %7 {offsets = [0, 0], sizes = [56, 8], strides = [1, 1]} : vector<56x64xf32> to vector<56x8xf32>
    %11 = tpu.transpose %9, [1, 0] : vector<56x8xf32> -> vector<8x56xf32>
    %cst_8 = arith.constant dense<0.000000e+00> : vector<56x56xf32>
    %12 = tpu.matmul %8, %11, %cst_8 {dimension_numbers = #tpu.dot_dimension_numbers<[1], [0], [0], [1], [0, 0, 1, 1], [], []>} : vector<56x8xf32>, vector<8x56xf32>, vector<56x56xf32> -> vector<56x56xf32>
    %c0_9 = arith.constant 0 : index
    %c0_10 = arith.constant 0 : index
    %c0_11 = arith.constant 0 : index
    %13 = vector.load %arg4[%c0_9, %c0_10, %c0_11] : memref<8x56x56xf32, #tpu.memory_space<vmem>>, vector<1x56x56xf32>
    %14 = vector.shape_cast %13 : vector<1x56x56xf32> to vector<56x56xf32>
    %15 = arith.addf %12, %14 : vector<56x56xf32>
    %cst_12 = arith.constant dense<0xFF800000> : vector<56xf32>
    %16 = vector.multi_reduction <maximumf>, %15, %cst_12 [1] : vector<56x56xf32> to vector<56xf32>
    %17 = vector.shape_cast %16 : vector<56xf32> to vector<56x1xf32>
    %18 = vector.broadcast %17 : vector<56x1xf32> to vector<56x56xf32>
    %19 = arith.subf %15, %18 : vector<56x56xf32>
    %20 = math.exp %19 : vector<56x56xf32>
    %cst_13 = arith.constant dense<0.000000e+00> : vector<56xf32>
    %21 = vector.multi_reduction <add>, %20, %cst_13 [1] : vector<56x56xf32> to vector<56xf32>
    %22 = vector.shape_cast %21 : vector<56xf32> to vector<56x1xf32>
    %23 = tpu.reciprocal %22 {approx = true} : vector<56x1xf32> -> vector<56x1xf32>
    %24 = vector.broadcast %23 : vector<56x1xf32> to vector<56x56xf32>
    %25 = arith.mulf %20, %24 : vector<56x56xf32>
    %cst_14 = arith.constant dense<0.000000e+00> : vector<56x8xf32>
    %26 = tpu.matmul %25, %10, %cst_14 {dimension_numbers = #tpu.dot_dimension_numbers<[1], [0], [0], [1], [0, 0, 1, 1], [], []>} : vector<56x56xf32>, vector<56x8xf32>, vector<56x8xf32> -> vector<56x8xf32>
    %c0_15 = arith.constant 0 : index
    %c0_16 = arith.constant 0 : index
    %c0_17 = arith.constant 0 : index
    %27 = vector.load %arg5[%c0_15, %c0_16, %c0_17] : memref<1x56x64xf32, #tpu.memory_space<vmem>>, vector<1x56x8xf32>
    %28 = vector.shape_cast %27 : vector<1x56x8xf32> to vector<56x8xf32>
    %29 = vector.shape_cast %26 : vector<56x8xf32> to vector<1x56x8xf32>
    tpu.vector_store %arg5[%c0_15, %c0_16, %c0_17], %29 {strides = array<i32>} : memref<1x56x64xf32, #tpu.memory_space<vmem>>, vector<1x56x8xf32>,
    %30 = vector.extract_strided_slice %3 {offsets = [0, 8], sizes = [56, 8], strides = [1, 1]} : vector<56x64xf32> to vector<56x8xf32>
    %31 = vector.extract_strided_slice %5 {offsets = [0, 8], sizes = [56, 8], strides = [1, 1]} : vector<56x64xf32> to vector<56x8xf32>
    %32 = vector.extract_strided_slice %7 {offsets = [0, 8], sizes = [56, 8], strides = [1, 1]} : vector<56x64xf32> to vector<56x8xf32>
    %33 = tpu.transpose %31, [1, 0] : vector<56x8xf32> -> vector<8x56xf32>
    %cst_18 = arith.constant dense<0.000000e+00> : vector<56x56xf32>
    %34 = tpu.matmul %30, %33, %cst_18 {dimension_numbers = #tpu.dot_dimension_numbers<[1], [0], [0], [1], [0, 0, 1, 1], [], []>} : vector<56x8xf32>, vector<8x56xf32>, vector<56x56xf32> -> vector<56x56xf32>
    %c1 = arith.constant 1 : index
    %c0_19 = arith.constant 0 : index
    %c0_20 = arith.constant 0 : index
    %35 = vector.load %arg4[%c1, %c0_19, %c0_20] : memref<8x56x56xf32, #tpu.memory_space<vmem>>, vector<1x56x56xf32>
    %36 = vector.shape_cast %35 : vector<1x56x56xf32> to vector<56x56xf32>
    %37 = arith.addf %34, %36 : vector<56x56xf32>
    %cst_21 = arith.constant dense<0xFF800000> : vector<56xf32>
    %38 = vector.multi_reduction <maximumf>, %37, %cst_21 [1] : vector<56x56xf32> to vector<56xf32>
    %39 = vector.shape_cast %38 : vector<56xf32> to vector<56x1xf32>
    %40 = vector.broadcast %39 : vector<56x1xf32> to vector<56x56xf32>
    %41 = arith.subf %37, %40 : vector<56x56xf32>
    %42 = math.exp %41 : vector<56x56xf32>
    %cst_22 = arith.constant dense<0.000000e+00> : vector<56xf32>
    %43 = vector.multi_reduction <add>, %42, %cst_22 [1] : vector<56x56xf32> to vector<56xf32>
    %44 = vector.shape_cast %43 : vector<56xf32> to vector<56x1xf32>
    %45 = tpu.reciprocal %44 {approx = true} : vector<56x1xf32> -> vector<56x1xf32>
    %46 = vector.broadcast %45 : vector<56x1xf32> to vector<56x56xf32>
    %47 = arith.mulf %42, %46 : vector<56x56xf32>
    %cst_23 = arith.constant dense<0.000000e+00> : vector<56x8xf32>
    %48 = tpu.matmul %47, %32, %cst_23 {dimension_numbers = #tpu.dot_dimension_numbers<[1], [0], [0], [1], [0, 0, 1, 1], [], []>} : vector<56x56xf32>, vector<56x8xf32>, vector<56x8xf32> -> vector<56x8xf32>
    %c0_24 = arith.constant 0 : index
    %c0_25 = arith.constant 0 : index
    %c8 = arith.constant 8 : index
    %49 = vector.load %arg5[%c0_24, %c0_25, %c8] : memref<1x56x64xf32, #tpu.memory_space<vmem>>, vector<1x56x8xf32>
    %50 = vector.shape_cast %49 : vector<1x56x8xf32> to vector<56x8xf32>
    %51 = vector.shape_cast %48 : vector<56x8xf32> to vector<1x56x8xf32>
    tpu.vector_store %arg5[%c0_24, %c0_25, %c8], %51 {strides = array<i32>} : memref<1x56x64xf32, #tpu.memory_space<vmem>>, vector<1x56x8xf32>,
    %52 = vector.extract_strided_slice %3 {offsets = [0, 16], sizes = [56, 8], strides = [1, 1]} : vector<56x64xf32> to vector<56x8xf32>
    %53 = vector.extract_strided_slice %5 {offsets = [0, 16], sizes = [56, 8], strides = [1, 1]} : vector<56x64xf32> to vector<56x8xf32>
    %54 = vector.extract_strided_slice %7 {offsets = [0, 16], sizes = [56, 8], strides = [1, 1]} : vector<56x64xf32> to vector<56x8xf32>
    %55 = tpu.transpose %53, [1, 0] : vector<56x8xf32> -> vector<8x56xf32>
    %cst_26 = arith.constant dense<0.000000e+00> : vector<56x56xf32>
    %56 = tpu.matmul %52, %55, %cst_26 {dimension_numbers = #tpu.dot_dimension_numbers<[1], [0], [0], [1], [0, 0, 1, 1], [], []>} : vector<56x8xf32>, vector<8x56xf32>, vector<56x56xf32> -> vector<56x56xf32>
    %c2 = arith.constant 2 : index
    %c0_27 = arith.constant 0 : index
    %c0_28 = arith.constant 0 : index
    %57 = vector.load %arg4[%c2, %c0_27, %c0_28] : memref<8x56x56xf32, #tpu.memory_space<vmem>>, vector<1x56x56xf32>
    %58 = vector.shape_cast %57 : vector<1x56x56xf32> to vector<56x56xf32>
    %59 = arith.addf %56, %58 : vector<56x56xf32>
    %cst_29 = arith.constant dense<0xFF800000> : vector<56xf32>
    %60 = vector.multi_reduction <maximumf>, %59, %cst_29 [1] : vector<56x56xf32> to vector<56xf32>
    %61 = vector.shape_cast %60 : vector<56xf32> to vector<56x1xf32>
    %62 = vector.broadcast %61 : vector<56x1xf32> to vector<56x56xf32>
    %63 = arith.subf %59, %62 : vector<56x56xf32>
    %64 = math.exp %63 : vector<56x56xf32>
    %cst_30 = arith.constant dense<0.000000e+00> : vector<56xf32>
    %65 = vector.multi_reduction <add>, %64, %cst_30 [1] : vector<56x56xf32> to vector<56xf32>
    %66 = vector.shape_cast %65 : vector<56xf32> to vector<56x1xf32>
    %67 = tpu.reciprocal %66 {approx = true} : vector<56x1xf32> -> vector<56x1xf32>
    %68 = vector.broadcast %67 : vector<56x1xf32> to vector<56x56xf32>
    %69 = arith.mulf %64, %68 : vector<56x56xf32>
    %cst_31 = arith.constant dense<0.000000e+00> : vector<56x8xf32>
    %70 = tpu.matmul %69, %54, %cst_31 {dimension_numbers = #tpu.dot_dimension_numbers<[1], [0], [0], [1], [0, 0, 1, 1], [], []>} : vector<56x56xf32>, vector<56x8xf32>, vector<56x8xf32> -> vector<56x8xf32>
    %c0_32 = arith.constant 0 : index
    %c0_33 = arith.constant 0 : index
    %c16 = arith.constant 16 : index
    %71 = vector.load %arg5[%c0_32, %c0_33, %c16] : memref<1x56x64xf32, #tpu.memory_space<vmem>>, vector<1x56x8xf32>
    %72 = vector.shape_cast %71 : vector<1x56x8xf32> to vector<56x8xf32>
    %73 = vector.shape_cast %70 : vector<56x8xf32> to vector<1x56x8xf32>
    tpu.vector_store %arg5[%c0_32, %c0_33, %c16], %73 {strides = array<i32>} : memref<1x56x64xf32, #tpu.memory_space<vmem>>, vector<1x56x8xf32>,
    %74 = vector.extract_strided_slice %3 {offsets = [0, 24], sizes = [56, 8], strides = [1, 1]} : vector<56x64xf32> to vector<56x8xf32>
    %75 = vector.extract_strided_slice %5 {offsets = [0, 24], sizes = [56, 8], strides = [1, 1]} : vector<56x64xf32> to vector<56x8xf32>
    %76 = vector.extract_strided_slice %7 {offsets = [0, 24], sizes = [56, 8], strides = [1, 1]} : vector<56x64xf32> to vector<56x8xf32>
    %77 = tpu.transpose %75, [1, 0] : vector<56x8xf32> -> vector<8x56xf32>
    %cst_34 = arith.constant dense<0.000000e+00> : vector<56x56xf32>
    %78 = tpu.matmul %74, %77, %cst_34 {dimension_numbers = #tpu.dot_dimension_numbers<[1], [0], [0], [1], [0, 0, 1, 1], [], []>} : vector<56x8xf32>, vector<8x56xf32>, vector<56x56xf32> -> vector<56x56xf32>
    %c3 = arith.constant 3 : index
    %c0_35 = arith.constant 0 : index
    %c0_36 = arith.constant 0 : index
    %79 = vector.load %arg4[%c3, %c0_35, %c0_36] : memref<8x56x56xf32, #tpu.memory_space<vmem>>, vector<1x56x56xf32>
    %80 = vector.shape_cast %79 : vector<1x56x56xf32> to vector<56x56xf32>
    %81 = arith.addf %78, %80 : vector<56x56xf32>
    %cst_37 = arith.constant dense<0xFF800000> : vector<56xf32>
    %82 = vector.multi_reduction <maximumf>, %81, %cst_37 [1] : vector<56x56xf32> to vector<56xf32>
    %83 = vector.shape_cast %82 : vector<56xf32> to vector<56x1xf32>
    %84 = vector.broadcast %83 : vector<56x1xf32> to vector<56x56xf32>
    %85 = arith.subf %81, %84 : vector<56x56xf32>
    %86 = math.exp %85 : vector<56x56xf32>
    %cst_38 = arith.constant dense<0.000000e+00> : vector<56xf32>
    %87 = vector.multi_reduction <add>, %86, %cst_38 [1] : vector<56x56xf32> to vector<56xf32>
    %88 = vector.shape_cast %87 : vector<56xf32> to vector<56x1xf32>
    %89 = tpu.reciprocal %88 {approx = true} : vector<56x1xf32> -> vector<56x1xf32>
    %90 = vector.broadcast %89 : vector<56x1xf32> to vector<56x56xf32>
    %91 = arith.mulf %86, %90 : vector<56x56xf32>
    %cst_39 = arith.constant dense<0.000000e+00> : vector<56x8xf32>
    %92 = tpu.matmul %91, %76, %cst_39 {dimension_numbers = #tpu.dot_dimension_numbers<[1], [0], [0], [1], [0, 0, 1, 1], [], []>} : vector<56x56xf32>, vector<56x8xf32>, vector<56x8xf32> -> vector<56x8xf32>
    %c0_40 = arith.constant 0 : index
    %c0_41 = arith.constant 0 : index
    %c24 = arith.constant 24 : index
    %93 = vector.load %arg5[%c0_40, %c0_41, %c24] : memref<1x56x64xf32, #tpu.memory_space<vmem>>, vector<1x56x8xf32>
    %94 = vector.shape_cast %93 : vector<1x56x8xf32> to vector<56x8xf32>
    %95 = vector.shape_cast %92 : vector<56x8xf32> to vector<1x56x8xf32>
    tpu.vector_store %arg5[%c0_40, %c0_41, %c24], %95 {strides = array<i32>} : memref<1x56x64xf32, #tpu.memory_space<vmem>>, vector<1x56x8xf32>,
    %96 = vector.extract_strided_slice %3 {offsets = [0, 32], sizes = [56, 8], strides = [1, 1]} : vector<56x64xf32> to vector<56x8xf32>
    %97 = vector.extract_strided_slice %5 {offsets = [0, 32], sizes = [56, 8], strides = [1, 1]} : vector<56x64xf32> to vector<56x8xf32>
    %98 = vector.extract_strided_slice %7 {offsets = [0, 32], sizes = [56, 8], strides = [1, 1]} : vector<56x64xf32> to vector<56x8xf32>
    %99 = tpu.transpose %97, [1, 0] : vector<56x8xf32> -> vector<8x56xf32>
    %cst_42 = arith.constant dense<0.000000e+00> : vector<56x56xf32>
    %100 = tpu.matmul %96, %99, %cst_42 {dimension_numbers = #tpu.dot_dimension_numbers<[1], [0], [0], [1], [0, 0, 1, 1], [], []>} : vector<56x8xf32>, vector<8x56xf32>, vector<56x56xf32> -> vector<56x56xf32>
    %c4 = arith.constant 4 : index
    %c0_43 = arith.constant 0 : index
    %c0_44 = arith.constant 0 : index
    %101 = vector.load %arg4[%c4, %c0_43, %c0_44] : memref<8x56x56xf32, #tpu.memory_space<vmem>>, vector<1x56x56xf32>
    %102 = vector.shape_cast %101 : vector<1x56x56xf32> to vector<56x56xf32>
    %103 = arith.addf %100, %102 : vector<56x56xf32>
    %cst_45 = arith.constant dense<0xFF800000> : vector<56xf32>
    %104 = vector.multi_reduction <maximumf>, %103, %cst_45 [1] : vector<56x56xf32> to vector<56xf32>
    %105 = vector.shape_cast %104 : vector<56xf32> to vector<56x1xf32>
    %106 = vector.broadcast %105 : vector<56x1xf32> to vector<56x56xf32>
    %107 = arith.subf %103, %106 : vector<56x56xf32>
    %108 = math.exp %107 : vector<56x56xf32>
    %cst_46 = arith.constant dense<0.000000e+00> : vector<56xf32>
    %109 = vector.multi_reduction <add>, %108, %cst_46 [1] : vector<56x56xf32> to vector<56xf32>
    %110 = vector.shape_cast %109 : vector<56xf32> to vector<56x1xf32>
    %111 = tpu.reciprocal %110 {approx = true} : vector<56x1xf32> -> vector<56x1xf32>
    %112 = vector.broadcast %111 : vector<56x1xf32> to vector<56x56xf32>
    %113 = arith.mulf %108, %112 : vector<56x56xf32>
    %cst_47 = arith.constant dense<0.000000e+00> : vector<56x8xf32>
    %114 = tpu.matmul %113, %98, %cst_47 {dimension_numbers = #tpu.dot_dimension_numbers<[1], [0], [0], [1], [0, 0, 1, 1], [], []>} : vector<56x56xf32>, vector<56x8xf32>, vector<56x8xf32> -> vector<56x8xf32>
    %c0_48 = arith.constant 0 : index
    %c0_49 = arith.constant 0 : index
    %c32 = arith.constant 32 : index
    %115 = vector.load %arg5[%c0_48, %c0_49, %c32] : memref<1x56x64xf32, #tpu.memory_space<vmem>>, vector<1x56x8xf32>
    %116 = vector.shape_cast %115 : vector<1x56x8xf32> to vector<56x8xf32>
    %117 = vector.shape_cast %114 : vector<56x8xf32> to vector<1x56x8xf32>
    tpu.vector_store %arg5[%c0_48, %c0_49, %c32], %117 {strides = array<i32>} : memref<1x56x64xf32, #tpu.memory_space<vmem>>, vector<1x56x8xf32>,
    %118 = vector.extract_strided_slice %3 {offsets = [0, 40], sizes = [56, 8], strides = [1, 1]} : vector<56x64xf32> to vector<56x8xf32>
    %119 = vector.extract_strided_slice %5 {offsets = [0, 40], sizes = [56, 8], strides = [1, 1]} : vector<56x64xf32> to vector<56x8xf32>
    %120 = vector.extract_strided_slice %7 {offsets = [0, 40], sizes = [56, 8], strides = [1, 1]} : vector<56x64xf32> to vector<56x8xf32>
    %121 = tpu.transpose %119, [1, 0] : vector<56x8xf32> -> vector<8x56xf32>
    %cst_50 = arith.constant dense<0.000000e+00> : vector<56x56xf32>
    %122 = tpu.matmul %118, %121, %cst_50 {dimension_numbers = #tpu.dot_dimension_numbers<[1], [0], [0], [1], [0, 0, 1, 1], [], []>} : vector<56x8xf32>, vector<8x56xf32>, vector<56x56xf32> -> vector<56x56xf32>
    %c5 = arith.constant 5 : index
    %c0_51 = arith.constant 0 : index
    %c0_52 = arith.constant 0 : index
    %123 = vector.load %arg4[%c5, %c0_51, %c0_52] : memref<8x56x56xf32, #tpu.memory_space<vmem>>, vector<1x56x56xf32>
    %124 = vector.shape_cast %123 : vector<1x56x56xf32> to vector<56x56xf32>
    %125 = arith.addf %122, %124 : vector<56x56xf32>
    %cst_53 = arith.constant dense<0xFF800000> : vector<56xf32>
    %126 = vector.multi_reduction <maximumf>, %125, %cst_53 [1] : vector<56x56xf32> to vector<56xf32>
    %127 = vector.shape_cast %126 : vector<56xf32> to vector<56x1xf32>
    %128 = vector.broadcast %127 : vector<56x1xf32> to vector<56x56xf32>
    %129 = arith.subf %125, %128 : vector<56x56xf32>
    %130 = math.exp %129 : vector<56x56xf32>
    %cst_54 = arith.constant dense<0.000000e+00> : vector<56xf32>
    %131 = vector.multi_reduction <add>, %130, %cst_54 [1] : vector<56x56xf32> to vector<56xf32>
    %132 = vector.shape_cast %131 : vector<56xf32> to vector<56x1xf32>
    %133 = tpu.reciprocal %132 {approx = true} : vector<56x1xf32> -> vector<56x1xf32>
    %134 = vector.broadcast %133 : vector<56x1xf32> to vector<56x56xf32>
    %135 = arith.mulf %130, %134 : vector<56x56xf32>
    %cst_55 = arith.constant dense<0.000000e+00> : vector<56x8xf32>
    %136 = tpu.matmul %135, %120, %cst_55 {dimension_numbers = #tpu.dot_dimension_numbers<[1], [0], [0], [1], [0, 0, 1, 1], [], []>} : vector<56x56xf32>, vector<56x8xf32>, vector<56x8xf32> -> vector<56x8xf32>
    %c0_56 = arith.constant 0 : index
    %c0_57 = arith.constant 0 : index
    %c40 = arith.constant 40 : index
    %137 = vector.load %arg5[%c0_56, %c0_57, %c40] : memref<1x56x64xf32, #tpu.memory_space<vmem>>, vector<1x56x8xf32>
    %138 = vector.shape_cast %137 : vector<1x56x8xf32> to vector<56x8xf32>
    %139 = vector.shape_cast %136 : vector<56x8xf32> to vector<1x56x8xf32>
    tpu.vector_store %arg5[%c0_56, %c0_57, %c40], %139 {strides = array<i32>} : memref<1x56x64xf32, #tpu.memory_space<vmem>>, vector<1x56x8xf32>,
    %140 = vector.extract_strided_slice %3 {offsets = [0, 48], sizes = [56, 8], strides = [1, 1]} : vector<56x64xf32> to vector<56x8xf32>
    %141 = vector.extract_strided_slice %5 {offsets = [0, 48], sizes = [56, 8], strides = [1, 1]} : vector<56x64xf32> to vector<56x8xf32>
    %142 = vector.extract_strided_slice %7 {offsets = [0, 48], sizes = [56, 8], strides = [1, 1]} : vector<56x64xf32> to vector<56x8xf32>
    %143 = tpu.transpose %141, [1, 0] : vector<56x8xf32> -> vector<8x56xf32>
    %cst_58 = arith.constant dense<0.000000e+00> : vector<56x56xf32>
    %144 = tpu.matmul %140, %143, %cst_58 {dimension_numbers = #tpu.dot_dimension_numbers<[1], [0], [0], [1], [0, 0, 1, 1], [], []>} : vector<56x8xf32>, vector<8x56xf32>, vector<56x56xf32> -> vector<56x56xf32>
    %c6 = arith.constant 6 : index
    %c0_59 = arith.constant 0 : index
    %c0_60 = arith.constant 0 : index
    %145 = vector.load %arg4[%c6, %c0_59, %c0_60] : memref<8x56x56xf32, #tpu.memory_space<vmem>>, vector<1x56x56xf32>
    %146 = vector.shape_cast %145 : vector<1x56x56xf32> to vector<56x56xf32>
    %147 = arith.addf %144, %146 : vector<56x56xf32>
    %cst_61 = arith.constant dense<0xFF800000> : vector<56xf32>
    %148 = vector.multi_reduction <maximumf>, %147, %cst_61 [1] : vector<56x56xf32> to vector<56xf32>
    %149 = vector.shape_cast %148 : vector<56xf32> to vector<56x1xf32>
    %150 = vector.broadcast %149 : vector<56x1xf32> to vector<56x56xf32>
    %151 = arith.subf %147, %150 : vector<56x56xf32>
    %152 = math.exp %151 : vector<56x56xf32>
    %cst_62 = arith.constant dense<0.000000e+00> : vector<56xf32>
    %153 = vector.multi_reduction <add>, %152, %cst_62 [1] : vector<56x56xf32> to vector<56xf32>
    %154 = vector.shape_cast %153 : vector<56xf32> to vector<56x1xf32>
    %155 = tpu.reciprocal %154 {approx = true} : vector<56x1xf32> -> vector<56x1xf32>
    %156 = vector.broadcast %155 : vector<56x1xf32> to vector<56x56xf32>
    %157 = arith.mulf %152, %156 : vector<56x56xf32>
    %cst_63 = arith.constant dense<0.000000e+00> : vector<56x8xf32>
    %158 = tpu.matmul %157, %142, %cst_63 {dimension_numbers = #tpu.dot_dimension_numbers<[1], [0], [0], [1], [0, 0, 1, 1], [], []>} : vector<56x56xf32>, vector<56x8xf32>, vector<56x8xf32> -> vector<56x8xf32>
    %c0_64 = arith.constant 0 : index
    %c0_65 = arith.constant 0 : index
    %c48 = arith.constant 48 : index
    %159 = vector.load %arg5[%c0_64, %c0_65, %c48] : memref<1x56x64xf32, #tpu.memory_space<vmem>>, vector<1x56x8xf32>
    %160 = vector.shape_cast %159 : vector<1x56x8xf32> to vector<56x8xf32>
    %161 = vector.shape_cast %158 : vector<56x8xf32> to vector<1x56x8xf32>
    tpu.vector_store %arg5[%c0_64, %c0_65, %c48], %161 {strides = array<i32>} : memref<1x56x64xf32, #tpu.memory_space<vmem>>, vector<1x56x8xf32>,
    %162 = vector.extract_strided_slice %3 {offsets = [0, 56], sizes = [56, 8], strides = [1, 1]} : vector<56x64xf32> to vector<56x8xf32>
    %163 = vector.extract_strided_slice %5 {offsets = [0, 56], sizes = [56, 8], strides = [1, 1]} : vector<56x64xf32> to vector<56x8xf32>
    %164 = vector.extract_strided_slice %7 {offsets = [0, 56], sizes = [56, 8], strides = [1, 1]} : vector<56x64xf32> to vector<56x8xf32>
    %165 = tpu.transpose %163, [1, 0] : vector<56x8xf32> -> vector<8x56xf32>
    %cst_66 = arith.constant dense<0.000000e+00> : vector<56x56xf32>
    %166 = tpu.matmul %162, %165, %cst_66 {dimension_numbers = #tpu.dot_dimension_numbers<[1], [0], [0], [1], [0, 0, 1, 1], [], []>} : vector<56x8xf32>, vector<8x56xf32>, vector<56x56xf32> -> vector<56x56xf32>
    %c7 = arith.constant 7 : index
    %c0_67 = arith.constant 0 : index
    %c0_68 = arith.constant 0 : index
    %167 = vector.load %arg4[%c7, %c0_67, %c0_68] : memref<8x56x56xf32, #tpu.memory_space<vmem>>, vector<1x56x56xf32>
    %168 = vector.shape_cast %167 : vector<1x56x56xf32> to vector<56x56xf32>
    %169 = arith.addf %166, %168 : vector<56x56xf32>
    %cst_69 = arith.constant dense<0xFF800000> : vector<56xf32>
    %170 = vector.multi_reduction <maximumf>, %169, %cst_69 [1] : vector<56x56xf32> to vector<56xf32>
    %171 = vector.shape_cast %170 : vector<56xf32> to vector<56x1xf32>
    %172 = vector.broadcast %171 : vector<56x1xf32> to vector<56x56xf32>
    %173 = arith.subf %169, %172 : vector<56x56xf32>
    %174 = math.exp %173 : vector<56x56xf32>
    %cst_70 = arith.constant dense<0.000000e+00> : vector<56xf32>
    %175 = vector.multi_reduction <add>, %174, %cst_70 [1] : vector<56x56xf32> to vector<56xf32>
    %176 = vector.shape_cast %175 : vector<56xf32> to vector<56x1xf32>
    %177 = tpu.reciprocal %176 {approx = true} : vector<56x1xf32> -> vector<56x1xf32>
    %178 = vector.broadcast %177 : vector<56x1xf32> to vector<56x56xf32>
    %179 = arith.mulf %174, %178 : vector<56x56xf32>
    %cst_71 = arith.constant dense<0.000000e+00> : vector<56x8xf32>
    %180 = tpu.matmul %179, %164, %cst_71 {dimension_numbers = #tpu.dot_dimension_numbers<[1], [0], [0], [1], [0, 0, 1, 1], [], []>} : vector<56x56xf32>, vector<56x8xf32>, vector<56x8xf32> -> vector<56x8xf32>
    %c0_72 = arith.constant 0 : index
    %c0_73 = arith.constant 0 : index
    %c56 = arith.constant 56 : index
    %181 = vector.load %arg5[%c0_72, %c0_73, %c56] : memref<1x56x64xf32, #tpu.memory_space<vmem>>, vector<1x56x8xf32>
    %182 = vector.shape_cast %181 : vector<1x56x8xf32> to vector<56x8xf32>
    %183 = vector.shape_cast %180 : vector<56x8xf32> to vector<1x56x8xf32>
    tpu.vector_store %arg5[%c0_72, %c0_73, %c56], %183 {strides = array<i32>} : memref<1x56x64xf32, #tpu.memory_space<vmem>>, vector<1x56x8xf32>,
    return
  }
  func.func @transform_0(%arg0: i32) -> (i32, i32, i32) {
    %c0_i32 = arith.constant 0 : i32
    %c0_i32_0 = arith.constant 0 : i32
    %c0_i32_1 = arith.constant 0 : i32
    return %arg0, %c0_i32, %c0_i32_0 : i32, i32, i32
  }
  func.func @transform_1(%arg0: i32) -> (i32, i32, i32) {
    %c0_i32 = arith.constant 0 : i32
    %c0_i32_0 = arith.constant 0 : i32
    %c0_i32_1 = arith.constant 0 : i32
    return %arg0, %c0_i32, %c0_i32_0 : i32, i32, i32
  }
  func.func @transform_2(%arg0: i32) -> (i32, i32, i32) {
    %c0_i32 = arith.constant 0 : i32
    %c0_i32_0 = arith.constant 0 : i32
    %c0_i32_1 = arith.constant 0 : i32
    return %arg0, %c0_i32, %c0_i32_0 : i32, i32, i32
  }
  func.func @transform_3(%arg0: i32) -> (i32, i32, i32) {
    %c0_i32 = arith.constant 0 : i32
    %c0_i32_0 = arith.constant 0 : i32
    %c0_i32_1 = arith.constant 0 : i32
    %c0_i32_2 = arith.constant 0 : i32
    return %c0_i32, %c0_i32_0, %c0_i32_1 : i32, i32, i32
  }
  func.func @transform_4(%arg0: i32) -> (i32, i32, i32) {
    %c0_i32 = arith.constant 0 : i32
    %c0_i32_0 = arith.constant 0 : i32
    %c0_i32_1 = arith.constant 0 : i32
    return %arg0, %c0_i32, %c0_i32_0 : i32, i32, i32
  }
}

</mosaic_0001>

<bundles_post_ra>
// kernel: tpu_custom_call.1
= control target key start
LH: loop header
LB: loop body
LE: loop exit
PB: predicated region body
PF: predicated region fallthrough
CT: control target
= control target key end

     0   :  { %s7685_s0 = inlined_call_operand.hbm [shape: f32[2,56,64], index: 0, kind: input, shape index: {}]   ;;  %s7686_s1 = inlined_call_operand.hbm [shape: f32[2,56,64], index: 1, kind: input, shape index: {}]   ;;  %s7687_s2 = inlined_call_operand.hbm [shape: f32[2,56,64], index: 2, kind: input, shape index: {}]   ;;  %s7688_s3 = inlined_call_operand.hbm [shape: f32[8,56,56], index: 3, kind: input, shape index: {}]   ;;  %s7689_s4 = inlined_call_operand.hbm [shape: f32[2,56,64], index: 4, kind: output, shape index: {}]  }
   0x1   :  { %7729 = sst [smem:[#allocation40_spill]] %s7685_s0 }
   0x2   :  { %7730 = sst [smem:[#allocation41_spill]] %s7686_s1 }
   0x3   :  { %9 = vsyncpa [#allocation3], 0 }
   0x4   :  { %11 = vsyncpa [#allocation3 + $0x1], 0 }
   0x5   :  { %12 = vsyncpa [#allocation6], 0 }
   0x6   :  { %14 = vsyncpa [#allocation6 + $0x1], 0 }
   0x7   :  { %15 = vsyncpa [#allocation9], 0 }
   0x8   :  { %16 = vsyncpa [#allocation4], 0 }
   0x9   :  { %18 = vsyncpa [#allocation4 + $0x1], 0  ;;  %s5692_s15 = smov 0   ;;  %s5694_s16 = smov 0  }
   0xa   :  { %s5696_s17 = smov 0   ;;  %s5698_s18 = smov 0  }
   0xb LB: > { %7731 = sst [smem:[#allocation15_spill]] %s5636_s17  ;;  %s5713_s19 = sadd.s32 1, %s5640_s18   ;;  %s5640_s18 = sphi %s5698_s18, %s7804_s18   ;;  %s5636_s17 = sphi %s5696_s17, %s7806_s17   ;;  %s5632_s16 = sphi %s5694_s16, %s7808_s16   ;;  %s5628_s15 = sphi %s5692_s15, %s7807_s15  }
   0xc   : > { %7732 = sst [smem:[#allocation16_spill]] %s5640_s18  ;;  %s31_s20 = sadd.s32 1, %s5636_s17 }
   0xd   : > { %7733 = sst [smem:[#allocation17_spill]] %s5713_s19  ;;  %s28_s21 = ssub.s32 %s5640_s18, %s5713_s19 }
   0xe   : > { %p7690_p0 = scmp.ne.s32.totalorder %s5636_s17, %s5632_s16  ;;  %p29_p1 = scmp.eq.s32.totalorder %s28_s21, 0 }
   0xf   : > { %p39_p2 = scmp.eq.s32.totalorder %s5640_s18, 0  ;;  %p4951_p5 = scmp.lt.s32.totalorder %s5640_s18, 2 }
  0x10   : > { %s5722_s22 = scalar_select %p29_p1, %s5636_s17, %s31_s20  }
  0x11   : > { %p40_p3 = por %p39_p2, %p7690_p0  ;;  %s180_s23 = sand.u32 1, %s5636_s17  }
  0x12   : > { %7734 = sst [smem:[#allocation18_spill]] %s5722_s22  ;;  %s5732_s24 = smul.u32 56, %s180_s23 }
  0x13   : > { %s201_s25 = sand.u32 1, %s5640_s18   ;;  %s5736_s26 = smul.u32 896, %s5640_s18 }
  0x14   : > { %p5738_p6 = pnand %p4951_p5, %p40_p3  ;;  %s7736_s1 = sld [smem:[#allocation41_spill]] }
  0x15   : > { %s205_s5 = scalar_lea.vmem [#allocation5], %s5732_s24  ;;  %s5751_s7 = scalar_lea.sflag [#allocation6], %s201_s25 }
  0x16   : > { %s7735_s27 = scalar_select %p5738_p6, 1, 0 }
  0x17   : > { %s212_s6 = sshll.u32 %s205_s5, 4  ;;  %p5757_p8 = pneg %p5738_p6  ;;  %s5749_s6 = int_to_ptr.vmem [resolvable:$true] %s212_s6 }
  0x19   : > { %s7737_s9 = scalar_select %p5757_p8, 1, 0 }
  0x1a   : > { %s5746_s30 = scalar_lea.hbm %s7736_s1, %s5736_s26  ;;  %s5453_s12 = scalar_lea.hbm %s7736_s1, 1792 }
  0x1b   : > { %s5448_s8 = scalar_lea.hbm %s5746_s30, 896  ;;  %p5454_p11 = scmp.lt.u32.totalorder %s5746_s30, %s7736_s1 }
  0x1c   : > { %p5449_p7 = scmp.ne.s32.totalorder %s5746_s30, %s5448_s8  ;;  %p5455_p12 = scmp.lt.u32.totalorder %s5453_s12, %s5448_s8 }
  0x1d   : > { %p5457_p1 = scmp.lt.u32.totalorder %s5448_s8, %s5746_s30 }
  0x1e   : > { %p5451_p9 = pnand %p5757_p8, %p5449_p7  ;;  %p5456_p13 = por %p5455_p12, %p5454_p11 }
  0x20   : > { %p5452_p10 = pneg %p5451_p9  ;;  %p5458_p2 = por %p5457_p1, %p5456_p13 }
  0x22   : > { %p5459_p3 = pnand %p5458_p2, %p5452_p10 }
  0x24   : > { %5462 = shalt.err (!%p5459_p3)
}
  0x25   : > { %s5463_s20 = scalar_lea.vmem %s5749_s6, 896  ;;  %s5642_s21 = smov [#allocation5]  }
  0x26   : > { %p5464_p5 = scmp.ne.s32.totalorder %s5749_s6, %s5463_s20  ;;  %s5468_s25 = sshll.u32 %s5642_s21, 4  ;;  %s5469_s25 = int_to_ptr.vmem [resolvable:$false] %s5468_s25 }
  0x27   : > { %s5470_s28 = scalar_lea.vmem %s5469_s25, 1792  ;;  %p5471_p4 = scmp.lt.s32.totalorder %s5749_s6, %s5469_s25 }
  0x28   : > { %p5466_p7 = pnand %p5464_p5, %p5757_p8  ;;  %p5472_p0 = scmp.lt.s32.totalorder %s5470_s28, %s5463_s20 }
  0x2a   : > { %p5467_p9 = pneg %p5466_p7  ;;  %p5473_p11 = por %p5472_p0, %p5471_p4 }
  0x2c   : > { %p5474_p12 = pnand %p5473_p11, %p5467_p9 }
  0x2e   : > { %5477 = shalt.err (!%p5474_p12)
}
  0x2f   : > { %s7691_s29 = smov 128   ;;  %s7693_s5 = smov 8  }
  0x30   : > { %4942 = dma.hbm_to_vmem [thread:$0]  (!%p5738_p6), %s5746_s30, 896, %s5749_s6, %s5751_s7, %s7691_s29, %s7691_s29, %s7693_s5  }
  0x31   : > { %s5785_s8 = sadd.s32 4294967295, %s5640_s18   ;;  %s3772_s10 = sadd.s32 4294967294, %s5640_s18  }
  0x32   : > { %p44_p0 = scmp.ne.s32.totalorder %s5632_s16, %s5628_s15  ;;  %p7695_p4 = scmp.eq.s32.totalorder %s5785_s8, 0 }
  0x33   : > { %p141_p10 = scmp.eq.s32.totalorder %s5785_s8, 1  ;;  %p147_p13 = scmp.eq.s32.totalorder %s3772_s10, 1 }
  0x34   : > { %p5794_p1 = por %p7695_p4, %p44_p0  ;;  %p3773_p2 = scmp.ge.s32.totalorder %s5640_s18, 1 }
  0x35   : > { %p7739_p3 = scmp.ne.s32.totalorder %s5636_s17, %s5632_s16  ;;  %p5806_p7 = por %p147_p13, %p44_p0 }
  0x36   : > { %s7738_s11 = scalar_select %p5794_p1, 1, 0 }
  0x37   : > { %p5802_p5 = por %p141_p10, %p7739_p3  ;;  %p154_p9 = scmp.lt.s32.totalorder %s5640_s18, 3 }
  0x38   : > { %s7741_s6 = scalar_select %p5806_p7, 1, 0 }
  0x39   : > { %s7740_s30 = scalar_select %p5802_p5, 1, 0 }
  0x3a   : > { %7742 = sst [smem:[#allocation19_spill]] %s7741_s6  ;;  %p5811_p11 = pnand %p3773_p2, %p154_p9 }
  0x3b   : > { %s5645_s13 = smov [#allocation8]   ;;  %s7744_s0 = sld [smem:[#allocation40_spill]] }
  0x3c   : > { %s7743_s12 = scalar_select %p5811_p11, 1, 0 }
  0x3d   : > { %s166_s14 = sshll.u32 %s5645_s13, 4  ;;  %p4932_p12 = pneg %p5811_p11  ;;  %s5815_s14 = int_to_ptr.vmem [resolvable:$true] %s166_s14 }
  0x3e   : > { %s184_s28 = scalar_lea.vmem [#allocation2], %s5732_s24  ;;  %s5836_s13 = scalar_lea.sflag [#allocation3], %s180_s23 }
  0x3f   : > { %s191_s10 = sshll.u32 %s184_s28, 4  ;;  %p5828_p0 = pnand %p4932_p12, %p7695_p4  ;;  %s5832_s10 = int_to_ptr.vmem [resolvable:$true] %s191_s10 }
  0x41   : > { %s5823_s25 = scalar_lea.hbm %s7744_s0, %s5736_s26  ;;  %s5483_s1 = scalar_lea.hbm %s7744_s0, 1792 }
  0x42   : > { %s7745_s29 = scalar_select %p5828_p0, 1, 0 }
  0x43   : > { %s5478_s5 = scalar_lea.hbm %s5823_s25, 896  ;;  %p5484_p3 = scmp.lt.u32.totalorder %s5823_s25, %s7744_s0 }
  0x44   : > { %p5479_p10 = scmp.ne.s32.totalorder %s5823_s25, %s5478_s5  ;;  %p5485_p9 = scmp.lt.u32.totalorder %s5483_s1, %s5478_s5 }
  0x45   : > { %p5487_p4 = scmp.lt.u32.totalorder %s5478_s5, %s5823_s25 }
  0x46   : > { %p5481_p13 = pnand %p5479_p10, %p5757_p8  ;;  %p5486_p12 = por %p5485_p9, %p5484_p3 }
  0x48   : > { %p5482_p2 = pneg %p5481_p13  ;;  %p5488_p7 = por %p5487_p4, %p5486_p12 }
  0x4a   : > { %p5489_p5 = pnand %p5488_p7, %p5482_p2 }
  0x4c   : > { %5492 = shalt.err (!%p5489_p5)
}
  0x4d   : > { %s5493_s23 = scalar_lea.vmem %s5832_s10, 896  ;;  %s5646_s20 = smov [#allocation2]  }
  0x4e   : > { %p5494_p10 = scmp.ne.s32.totalorder %s5832_s10, %s5493_s23  ;;  %s5498_s21 = sshll.u32 %s5646_s20, 4  ;;  %s5499_s21 = int_to_ptr.vmem [resolvable:$false] %s5498_s21 }
  0x4f   : > { %s5500_s22 = scalar_lea.vmem %s5499_s21, 1792  ;;  %p5501_p11 = scmp.lt.s32.totalorder %s5832_s10, %s5499_s21 }
  0x50   : > { %p5496_p13 = pnand %p5494_p10, %p5757_p8  ;;  %p5502_p0 = scmp.lt.s32.totalorder %s5500_s22, %s5493_s23 }
  0x52   : > { %p5497_p1 = pneg %p5496_p13  ;;  %p5503_p3 = por %p5502_p0, %p5501_p11 }
  0x54   : > { %p5504_p9 = pnand %p5503_p3, %p5497_p1 }
  0x56   : > { %5507 = shalt.err (!%p5504_p9)
}
  0x57   : > { %s7746_s1 = smov 8   ;;  %s7747_s5 = smov 128  }
  0x58   : > { %4939 = dma.hbm_to_vmem [thread:$0]  (!%p5738_p6), %s5823_s25, 896, %s5832_s10, %s5836_s13, %s7747_s5, %s7747_s5, %s7746_s1  }
  0x59   : > { %s5867_s0 = scalar_lea.hbm %s7687_s2, %s5736_s26  ;;  %s5508_s22 = scalar_lea.hbm %s7688_s3, 7168 }
  0x5a   : > { %p5509_p4 = scmp.ne.s32.totalorder %s7688_s3, %s5508_s22  ;;  %p7748_p1 = scmp.ne.s32.totalorder %s7745_s29, 0 }
  0x5b   : > { %p5515_p0 = scmp.lt.u32.totalorder %s5508_s22, %s7688_s3 }
  0x5c   : > { %p5510_p5 = pneg %p7748_p1 }
  0x5e   : > { %p5511_p7 = pnand %p5510_p5, %p5509_p4 }
  0x60   : > { %p5512_p11 = pneg %p5511_p7 }
  0x62   : > { %p5517_p2 = pnand %p5515_p0, %p5512_p11 }
  0x64   : > { %5520 = shalt.err (!%p5517_p2)
}
  0x65   : > { %s5521_s26 = scalar_lea.vmem %s5815_s14, 7168  ;;  %p5529_p3 = scmp.lt.s32.totalorder %s5815_s14, %s5815_s14 }
  0x66   : > { %p5522_p12 = scmp.ne.s32.totalorder %s5815_s14, %s5521_s26  ;;  %p5530_p9 = scmp.lt.s32.totalorder %s5521_s26, %s5521_s26 }
  0x68   : > { %p5524_p10 = pnand %p5522_p12, %p5510_p5  ;;  %p5531_p6 = por %p5530_p9, %p5529_p3 }
  0x6a   : > { %p5525_p13 = pneg %p5524_p10 }
  0x6c   : > { %p5532_p8 = pnand %p5531_p6, %p5525_p13 }
  0x6e   : > { %5535 = shalt.err (!%p5532_p8)
}
  0x6f   : > { %4935 = dma.hbm_to_vmem [thread:$0]  (!%p7748_p1), %s7688_s3, 7168, %s5815_s14, [#allocation9], %s7747_s5, %s7747_s5, %s7746_s1  }
  0x70   : > { %s226_s19 = scalar_lea.vmem [#allocation7], %s5732_s24  ;;  %s5536_s25 = scalar_lea.hbm %s5867_s0, 896 }
  0x71   : > { %s233_s6 = sshll.u32 %s226_s19, 4  ;;  %p5537_p6 = scmp.ne.s32.totalorder %s5867_s0, %s5536_s25  ;;  %s5894_s6 = int_to_ptr.vmem [resolvable:$true] %s233_s6 }
  0x72   : > { %p7749_p8 = scmp.ne.s32.totalorder %s7737_s9, 0  ;;  %s5541_s13 = scalar_lea.hbm %s7687_s2, 1792 }
  0x73   : > { %p5542_p7 = scmp.lt.u32.totalorder %s5867_s0, %s7687_s2  ;;  %p5543_p11 = scmp.lt.u32.totalorder %s5541_s13, %s5536_s25 }
  0x74   : > { %p5539_p4 = pnand %p5537_p6, %p7749_p8  ;;  %p5545_p1 = scmp.lt.u32.totalorder %s5536_s25, %s5867_s0 }
  0x75   : > { %p5544_p0 = por %p5543_p11, %p5542_p7 }
  0x76   : > { %p5540_p5 = pneg %p5539_p4 }
  0x77   : > { %p5546_p2 = por %p5545_p1, %p5544_p0 }
  0x79   : > { %p5547_p12 = pnand %p5546_p2, %p5540_p5 }
  0x7b   : > { %5550 = shalt.err (!%p5547_p12)
}
  0x7c   : > { %s5551_s24 = scalar_lea.vmem %s5894_s6, 896  ;;  %s5647_s14 = smov [#allocation7]  }
  0x7d   : > { %p5552_p10 = scmp.ne.s32.totalorder %s5894_s6, %s5551_s24  ;;  %s5556_s23 = sshll.u32 %s5647_s14, 4  ;;  %s5557_s23 = int_to_ptr.vmem [resolvable:$false] %s5556_s23 }
  0x7e   : > { %s5558_s21 = scalar_lea.vmem %s5557_s23, 1792  ;;  %p5559_p9 = scmp.lt.s32.totalorder %s5894_s6, %s5557_s23 }
  0x7f   : > { %p5554_p13 = pnand %p5552_p10, %p7749_p8  ;;  %p5560_p6 = scmp.lt.s32.totalorder %s5558_s21, %s5551_s24 }
  0x81   : > { %p5555_p3 = pneg %p5554_p13  ;;  %p5561_p4 = por %p5560_p6, %p5559_p9 }
  0x83   : > { %p5562_p7 = pnand %p5561_p4, %p5555_p3 }
  0x85   : > { %5565 = shalt.err (!%p5562_p7)
}
  0x86   : > { %p7750_p5 = scmp.ne.s32.totalorder %s7735_s27, 0  ;;  %p7751_p8 = scmp.ne.s32.totalorder %s7743_s12, 0 }
  0x88   : > { %4945 = dma.hbm_to_vmem [thread:$0]  (!%p7750_p5), %s5867_s0, 896, %s5894_s6, %s5751_s7, %s7747_s5, %s7747_s5, %s7746_s1  }
  0x89   : > { %245 = sbr.rel (%p7751_p8) target bundleno = 1894 (0x766), region = 36 }
  0x90   : > { %s5924_s9 = sand.u32 1, %s5632_s16   ;;  %p7752_p11 = scmp.ne.s32.totalorder %s7738_s11, 0 }
  0x91   : > { %s5927_s22 = smul.u32 56, %s5924_s9  ;;  %s248_s27 = scalar_lea.sflag [#allocation3], %s5924_s9 }
  0x93   : > { %s5931_s26 = scalar_lea.vmem [#allocation2], %s5927_s22 }
  0x94   : > { %5611 = dma.done.wait (%p7752_p11), %s248_s27, 896  }
  0x95   : > { %5613 = vsyncadd (%p7752_p11), %s248_s27, 4294966400  ;;  %s256_s0 = sand.u32 1, %s5785_s8   ;;  %s5939_s12 = scalar_lea.vmem [#allocation5], %s5927_s22 }
  0x96   : > { %s257_s7 = scalar_lea.sflag [#allocation6], %s256_s0 }
  0x97   : > { %5615 = dma.done.wait (%p7752_p11), %s257_s7, 1792  }
  0x98   : > { %5617 = vsyncadd (%p7752_p11), %s257_s7, 4294965504  ;;  %s5946_s1 = scalar_lea.vmem [#allocation7], %s5927_s22  ;;  %p7753_p0 = scmp.eq.s32.totalorder %s5785_s8, 0 }
  0x9a   : > { %5619 = dma.done.wait (%p7753_p0), [#allocation9], 7168   ;;  %p7754_p1 = pmov %p7753_p0 }
  0x9b   : > { %v7708_v0 = vmov 0.0|0.0   ;;  %vm5649_vm0 = vmmov 0   ;;  %v7710_v1 = vmov 0.0   ;;  %vm343_vm1 = vcmask 64512   ;;  %v5959_v2 = vld [vmem:[%s5939_s12] sm:$0xff]  ;;  %v5962_v3 = vld [vmem:[%s5939_s12 + $0x8] sm:$0xff] }
  0x9c   : > { %5621 = vsyncadd (%p7754_p1), [#allocation9], 4294960128  ;;  %4736 = vmatprep.subr.bf16.mxu0 %v7708_v0  ;;  %4190 = vmatprep.mubr.msk.f32.mxu0 %vm5649_vm0, %v7710_v1  ;;  %v4737_v5 = vpack.c.bf16 %v5962_v3, %v5959_v2  ;;  %v5976_v6 = vld [vmem:[%s5939_s12 + $0x10] sm:$0xff]  ;;  %v5979_v7 = vld [vmem:[%s5939_s12 + $0x18] sm:$0xff]  ;;  %vm486_vm3 = vcmask 457728   ;;  %s5651_s11 = smov 120  }
  0x9d   : > { %4748 = vmatprep.subr.bf16.mxu1 %v7708_v0  ;;  %4225 = vmatprep.mubr.msk.f32.mxu1 %vm5649_vm0, %v7710_v1  ;;  %vm5966_vm2 = vmpackc.low %vm343_vm1, %vm343_vm1  ;;  %v4741_v8 = vpack.c.bf16 %v5979_v7, %v5976_v6  ;;  %v5987_v9 = vld [vmem:[%s5939_s12 + $0x20] sm:$0xff]  ;;  %v5990_v10 = vld [vmem:[%s5939_s12 + $0x28] sm:$0xff]  ;;  %s5652_s5 = smov 112   ;;  %s5653_s17 = smov 104   ;;  %vm1110_vm4 = vcmask 130112   ;;  %vm1529_vm5 = vcmask 195712  }
  0x9e   : > { %4739 = vmatpush3.bf16.xpose.msk.msra.mxu0 %vm5966_vm2, %v4737_v5  ;;  %v4745_v11 = vpack.c.bf16 %v5990_v10, %v5987_v9  ;;  %v308_v12 = vld [vmem:[%s5931_s26] sm:$0xff]  ;;  %v309_v15 = vld [vmem:[%s5931_s26 + $0x8] sm:$0xff]  ;;  %v310_v17 = vld [vmem:[%s5931_s26 + $0x10] sm:$0xff]  ;;  %s5654_s18 = smov 96   ;;  %s5655_s19 = smov 88   ;;  %vm1948_vm6 = vcmask 261312  }
  0x9f   : > { %4740 = vmatprep.subr.bf16.mxu0 %v7708_v0  ;;  %v5999_v13 = vld [vmem:[%s5939_s12 + $0x30] sm:$0xff]  ;;  %v6001_v14 = vmul.f32 0.35355338, %v308_v12  ;;  %v6009_v16 = vmul.f32 0.35355338, %v309_v15  ;;  %v311_v19 = vld [vmem:[%s5931_s26 + $0x18] sm:$0xff] }
  0xa0   : > { %v6016_v18 = vmul.f32 0.35355338, %v310_v17  ;;  %v6023_v20 = vmul.f32 0.35355338, %v311_v19  ;;  %v312_v21 = vld [vmem:[%s5931_s26 + $0x20] sm:$0xff]  ;;  %v313_v23 = vld [vmem:[%s5931_s26 + $0x28] sm:$0xff] }
  0xa1   : > { %v6030_v22 = vmul.f32 0.35355338, %v312_v21  ;;  %v6037_v24 = vmul.f32 0.35355338, %v313_v23  ;;  %v314_v25 = vld [vmem:[%s5931_s26 + $0x30] sm:$0xff]  ;;  %v337_v31 = vld [vmem:[#allocation8 + $0x8] sm:$0xff] }
  0xa2   : > { %v6044_v26 = vmul.f32 0.35355338, %v314_v25  ;;  %v336_v27 = vld [vmem:[#allocation8] sm:$0xff]  ;;  %v338_v36 = vld [vmem:[#allocation8 + $0x10] sm:$0xff]  ;;  %v339_v41 = vld [vmem:[#allocation8 + $0x18] sm:$0xff]  ;;  %s5656_s6 = smov 80  }
  0xa3   : > { %v340_v46 = vld [vmem:[#allocation8 + $0x20] sm:$0xff]  ;;  %v341_v51 = vld [vmem:[#allocation8 + $0x28] sm:$0xff]  ;;  %v342_v56 = vld [vmem:[#allocation8 + $0x30] sm:$0xff]  ;;  %s5657_s25 = smov 72   ;;  %s6674_s29 = scalar_lea.vmem [#allocation10], %s5927_s22  ;;  %vm2367_vm7 = vcmask 326912  }
  0xa4   : > { %s5658_s10 = smov 8   ;;  %s5659_s13 = smov 16   ;;  %vm2786_vm8 = vcmask 392512   ;;  %vm3205_vm9 = vcmask 458112   ;;  %vm3624_vm10 = vcmask 523712  }
  0xa5   : > { %s5660_s28 = smov 24   ;;  %s5661_s20 = smov 32  }
  0xa6   : > { %4743 = vmatpush3.bf16.xpose.msk.msra.mxu0 %vm5966_vm2, %v4741_v8  ;;  %s5662_s24 = smov 40   ;;  %s5663_s14 = smov 48  }
  0xa7   : > { %4744 = vmatprep.subr.bf16.mxu0 %v7708_v0  ;;  %s5664_s23 = smov 56   ;;  %s4919_s21 = smul.u32 896, %s5785_s8 }
  0xa8   : > { %s3646_s22 = sshll.u32 %s6674_s29, 4  ;;  %s3633_s8 = scalar_lea.sflag [#allocation4], %s5924_s9  ;;  %s7636_s22 = int_to_ptr.vmem [resolvable:$true] %s3646_s22 }
  0xa9   : > { %s7634_s0 = scalar_lea.hbm %s7689_s4, %s4919_s21  ;;  %s5566_s7 = scalar_lea.vmem %s7636_s22, 896 }
  0xaa   : > { %p5567_p2 = scmp.ne.s32.totalorder %s7636_s22, %s5566_s7  ;;  %p7799_p12 = scmp.ne.s32.totalorder %s7740_s30, 0 }
  0xab   : > { %s5665_s12 = smov [#allocation10]  }
  0xac   : > { %p5568_p10 = pnand %p5567_p2, %p7799_p12 }
  0xae   : > { %4747 = vmatpush3.bf16.xpose.msk.msra.mxu0 %vm5966_vm2, %v4745_v11  ;;  %p5569_p13 = pneg %p5568_p10 }
  0xaf   : > { %4188 = vmatprep.subr.mxu0 %v7710_v1 }
  0xb6   : > { %4189 = vmatpush3.xpose.msk.msra.mxu0 %vm343_vm1, %v5999_v13 }
  0xb7   : > { %4769 = vmatprep.subr.bf16.mxu0 %v7708_v0 }
  0xb9   : > { %4191 = vmatmul.mubr.msk.f32.vlgmr.msra.gmra.mrb[0].mxu0 %vm343_vm1, %v6001_v14 }
  0xba   : > { %4193 = vmatprep.mubr.msk.f32.mxu0 %vm5649_vm0, %v7710_v1 }
  0xbd   : > { %4194 = vmatmul.mubr.msk.f32.gmra.mrb[2].mxu0 %vm343_vm1, %v6009_v16 }
  0xbe   : > { %4196 = vmatprep.mubr.msk.f32.mxu0 %vm5649_vm0, %v7710_v1 }
  0xc1   : > { %4197 = vmatmul.mubr.msk.f32.gmra.mrb[4].mxu0 %vm343_vm1, %v6016_v18 }
  0xc2   : > { %4199 = vmatprep.mubr.msk.f32.mxu0 %vm5649_vm0, %v7710_v1 }
  0xc5   : > { %4200 = vmatmul.mubr.msk.f32.gmra.mrb[6].mxu0 %vm343_vm1, %v6023_v20 }
  0xc6   : > { %4202 = vmatprep.mubr.msk.f32.mxu0 %vm5649_vm0, %v7710_v1 }
  0xc9   : > { %4203 = vmatmul.mubr.msk.f32.gmra.mrb[8].mxu0 %vm343_vm1, %v6030_v22 }
  0xca   : > { %4205 = vmatprep.mubr.msk.f32.mxu0 %vm5649_vm0, %v7710_v1 }
  0xcd   : > { %4206 = vmatmul.mubr.msk.f32.gmra.mrb[10].mxu0 %vm343_vm1, %v6037_v24 }
  0xce   : > { %4208 = vmatprep.mubr.msk.f32.mxu0 %vm5649_vm0, %v7710_v1 }
  0xd1   : > { %4209 = vmatmul.mubr.msk.f32.gmra.mrb[12].mxu0 %vm343_vm1, %v6044_v26 }
  0xd2   : > { %4295 = vmatprep.mubr.msk.f32.mxu0 %vm5649_vm0, %v7710_v1 }
 0x18c   : > { %v452_v28 = vpop.f32.mrb[0].mxu0 }
 0x18d   : > { %v453_v29 = vadd.f32 %v452_v28, %v336_v27  ;;  %v4192_v30 = vpop.f32.mrb[1].mxu0 }
 0x18f   : > { %v487_v32 = vsel %vm486_vm3, %v453_v29, -inf }
 0x190   : > { %488 = vmax.xlane.f32.xlu0 %v487_v32  ;;  %v457_v33 = vpop.f32.mrb[2].mxu0 }
 0x191   : > { %v458_v34 = vadd.f32 %v457_v33, %v337_v31  ;;  %v4195_v35 = vpop.f32.mrb[3].mxu0 }
 0x193   : > { %v490_v37 = vsel %vm486_vm3, %v458_v34, -inf }
 0x194   : > { %491 = vmax.xlane.f32.xlu0 %v490_v37  ;;  %v462_v38 = vpop.f32.mrb[4].mxu0 }
 0x195   : > { %v463_v39 = vadd.f32 %v462_v38, %v338_v36  ;;  %v4198_v40 = vpop.f32.mrb[5].mxu0 }
 0x197   : > { %v493_v42 = vsel %vm486_vm3, %v463_v39, -inf }
 0x198   : > { %494 = vmax.xlane.f32.xlu1 %v493_v42  ;;  %v467_v43 = vpop.f32.mrb[6].mxu0  ;;  %v6082_v42 = vld [vmem:[%s5946_s1 + $0x8] sm:$0xff] }
 0x199   : > { %v468_v44 = vadd.f32 %v467_v43, %v339_v41  ;;  %v4201_v45 = vpop.f32.mrb[7].mxu0  ;;  %v6079_v41 = vld [vmem:[%s5946_s1] sm:$0xff] }
 0x19a   : > { %v4749_v43 = vpack.c.bf16 %v6082_v42, %v6079_v41 }
 0x19b   : > { %v496_v47 = vsel %vm486_vm3, %v468_v44, -inf }
 0x19c   : > { %497 = vmax.xlane.f32.xlu1 %v496_v47  ;;  %v472_v48 = vpop.f32.mrb[8].mxu0  ;;  %4750 = vmatpush3.bf16.msra.mxu1 %v4749_v43  ;;  %v6095_v47 = vld [vmem:[%s5946_s1 + $0x18] sm:$0xff] }
 0x19d   : > { %v473_v49 = vadd.f32 %v472_v48, %v340_v46  ;;  %v4204_v50 = vpop.f32.mrb[9].mxu0  ;;  %4751 = vmatprep.subr.bf16.mxu1 %v7708_v0  ;;  %v6092_v46 = vld [vmem:[%s5946_s1 + $0x10] sm:$0xff] }
 0x19e   : > { %v4752_v48 = vpack.c.bf16 %v6095_v47, %v6092_v46 }
 0x19f   : > { %v499_v52 = vsel %vm486_vm3, %v473_v49, -inf }
 0x1a0   : > { %500 = vmax.xlane.f32.xlu0 %v499_v52  ;;  %v477_v53 = vpop.f32.mrb[10].mxu0  ;;  %4753 = vmatpush3.bf16.msra.mxu1 %v4752_v48  ;;  %v6108_v52 = vld [vmem:[%s5946_s1 + $0x28] sm:$0xff] }
 0x1a1   : > { %v478_v54 = vadd.f32 %v477_v53, %v341_v51  ;;  %v4207_v55 = vpop.f32.mrb[11].mxu0  ;;  %4754 = vmatprep.subr.bf16.mxu1 %v7708_v0  ;;  %v6105_v51 = vld [vmem:[%s5946_s1 + $0x20] sm:$0xff] }
 0x1a2   : > { %v4755_v53 = vpack.c.bf16 %v6108_v52, %v6105_v51  ;;  %v6120_v55 = vpack.i.bf16 %v5979_v7, %v5976_v6 }
 0x1a3   : > { %v502_v57 = vsel %vm486_vm3, %v478_v54, -inf }
 0x1a4   : > { %503 = vmax.xlane.f32.xlu1 %v502_v57  ;;  %v482_v58 = vpop.f32.mrb[12].mxu0  ;;  %4756 = vmatpush3.bf16.msra.mxu1 %v4755_v53  ;;  %v6132_v57 = vpack.i.bf16 %v5962_v3, %v5959_v2 }
 0x1a5   : > { %v6058_v59 = vadd.f32 %v482_v58, %v342_v56  ;;  %v4210_v60 = vpop.f32.mrb[13].mxu0  ;;  %4223 = vmatprep.subr.mxu1 %v7710_v1  ;;  %v6126_v56 = vpack.i.bf16 %v5990_v10, %v5987_v9 }
 0x1a7   : > { %v505_v61 = vsel %vm486_vm3, %v6058_v59, -inf }
 0x1a8   : > { %506 = vmax.xlane.f32.xlu0 %v505_v61 }
 0x21d   : > { %v489_v62 = vpop.xlane.xlu0 %488 }
 0x21e   : > { %v508_v63 = vsub.f32 %v453_v29, %v489_v62 }
 0x220   : > { %v515_v5 = vmul.f32 1.442695, %v508_v63 }
 0x221   : > { %v492_v8 = vpop.xlane.xlu0 %491 }
 0x222   : > { %5217 = vpow2.f32 %v515_v5  ;;  %v509_v11 = vsub.f32 %v458_v34, %v492_v8 }
 0x224   : > { %v517_v12 = vmul.f32 1.442695, %v509_v11 }
 0x225   : > { %v495_v15 = vpop.xlane.xlu1 %494 }
 0x226   : > { %5219 = vpow2.f32 %v517_v12  ;;  %v510_v17 = vsub.f32 %v463_v39, %v495_v15 }
 0x228   : > { %v519_v19 = vmul.f32 1.442695, %v510_v17 }
 0x229   : > { %v498_v21 = vpop.xlane.xlu1 %497 }
 0x22a   : > { %5221 = vpow2.f32 %v519_v19  ;;  %v511_v23 = vsub.f32 %v468_v44, %v498_v21 }
 0x22c   : > { %v6062_v25 = vpop.eup %5217  ;;  %v521_v27 = vmul.f32 1.442695, %v511_v23 }
 0x22d   : > { %v501_v28 = vpop.xlane.xlu0 %500  ;;  %v529_v30 = vsel %vm486_vm3, %v6062_v25, 0.0 }
 0x22e   : > { %5223 = vpow2.f32 %v521_v27  ;;  %v512_v29 = vsub.f32 %v473_v49, %v501_v28  ;;  %530 = vadd.xlane.f32.xlu1 %v529_v30 }
 0x230   : > { %v6066_v31 = vpop.eup %5219  ;;  %v523_v32 = vmul.f32 1.442695, %v512_v29 }
 0x231   : > { %v504_v33 = vpop.xlane.xlu1 %503  ;;  %v532_v34 = vsel %vm486_vm3, %v6066_v31, 0.0 }
 0x232   : > { %5225 = vpow2.f32 %v523_v32  ;;  %v513_v35 = vsub.f32 %v478_v54, %v504_v33  ;;  %533 = vadd.xlane.f32.xlu0 %v532_v34  ;;  %v6114_v54 = vld [vmem:[%s5946_s1 + $0x30] sm:$0xff] }
 0x233   : > { %4224 = vmatpush3.msra.mxu1 %v6114_v54 }
 0x234   : > { %v6070_v36 = vpop.eup %5221  ;;  %v525_v37 = vmul.f32 1.442695, %v513_v35  ;;  %4757 = vmatprep.subr.bf16.mxu1 %v7708_v0 }
 0x235   : > { %v535_v38 = vsel %vm486_vm3, %v6070_v36, 0.0  ;;  %v507_v6 = vpop.xlane.xlu0 %506 }
 0x236   : > { %5227 = vpow2.f32 %v525_v37  ;;  %536 = vadd.xlane.f32.xlu1 %v535_v38  ;;  %v514_v2 = vsub.f32 %v6058_v59, %v507_v6 }
 0x238   : > { %v6074_v39 = vpop.eup %5223  ;;  %v527_v3 = vmul.f32 1.442695, %v514_v2 }
 0x239   : > { %v538_v40 = vsel %vm486_vm3, %v6074_v39, 0.0 }
 0x23a   : > { %539 = vadd.xlane.f32.xlu0 %v538_v40  ;;  %5229 = vpow2.f32 %v527_v3 }
 0x23c   : > { %v6086_v44 = vpop.eup %5225 }
 0x23d   : > { %v541_v45 = vsel %vm486_vm3, %v6086_v44, 0.0 }
 0x23e   : > { %542 = vadd.xlane.f32.xlu1 %v541_v45 }
 0x240   : > { %v6099_v49 = vpop.eup %5227 }
 0x241   : > { %v544_v50 = vsel %vm486_vm3, %v6099_v49, 0.0 }
 0x242   : > { %545 = vadd.xlane.f32.xlu0 %v544_v50 }
 0x244   : > { %v6153_v7 = vpop.eup %5229 }
 0x245   : > { %v547_v9 = vsel %vm486_vm3, %v6153_v7, 0.0 }
 0x24f   : > { %5013 = vrot.lane.b32.xlu1 %v6120_v55, %s5651_s11 }
 0x253   : > { %5018 = vrot.lane.b32.xlu1 %v6126_v56, %s5651_s11 }
 0x257   : > { %726 = vrot.lane.b32.xlu1 %v5999_v13, %s5651_s11 }
 0x258   : > { %5008 = vrot.lane.b32.xlu0 %v6132_v57, %s5651_s11 }
 0x25c   : > { %5023 = vrot.lane.b32.xlu0 %v6132_v57, %s5652_s5 }
 0x260   : > { %702 = vrot.lane.b32.xlu0 %v6009_v16, %s5651_s11 }
 0x264   : > { %704 = vrot.lane.b32.xlu0 %v6016_v18, %s5651_s11 }
 0x268   : > { %5033 = vrot.lane.b32.xlu0 %v6126_v56, %s5652_s5 }
 0x26c   : > { %710 = vrot.lane.b32.xlu0 %v6037_v24, %s5651_s11 }
 0x270   : > { %1152 = vrot.lane.b32.xlu0 %v5999_v13, %s5652_s5 }
 0x274   : > { %1126 = vrot.lane.b32.xlu0 %v6001_v14, %s5652_s5 }
 0x278   : > { %5043 = vrot.lane.b32.xlu0 %v6120_v55, %s5653_s17 }
 0x27b   : > { %548 = vadd.xlane.f32.xlu1 %v547_v9 }
 0x27c   : > { %1132 = vrot.lane.b32.xlu0 %v6023_v20, %s5652_s5 }
 0x280   : > { %1134 = vrot.lane.b32.xlu0 %v6030_v22, %s5652_s5 }
 0x284   : > { %1138 = vrot.lane.b32.xlu0 %v6044_v26, %s5652_s5 }
 0x288   : > { %5053 = vrot.lane.b32.xlu0 %v6132_v57, %s5654_s18 }
 0x28c   : > { %700 = vrot.lane.b32.xlu1 %v6001_v14, %s5651_s11  ;;  %1547 = vrot.lane.b32.xlu0 %v6009_v16, %s5653_s17 }
 0x290   : > { %5028 = vrot.lane.b32.xlu1 %v6120_v55, %s5652_s5  ;;  %1549 = vrot.lane.b32.xlu0 %v6016_v18, %s5653_s17 }
 0x294   : > { %706 = vrot.lane.b32.xlu1 %v6023_v20, %s5651_s11  ;;  %5063 = vrot.lane.b32.xlu0 %v6126_v56, %s5654_s18 }
 0x298   : > { %708 = vrot.lane.b32.xlu1 %v6030_v22, %s5651_s11  ;;  %1555 = vrot.lane.b32.xlu0 %v6037_v24, %s5653_s17 }
 0x29c   : > { %712 = vrot.lane.b32.xlu1 %v6044_v26, %s5651_s11  ;;  %1990 = vrot.lane.b32.xlu0 %v5999_v13, %s5654_s18 }
 0x2a0   : > { %5038 = vrot.lane.b32.xlu1 %v6132_v57, %s5653_s17  ;;  %1964 = vrot.lane.b32.xlu0 %v6001_v14, %s5654_s18 }
 0x2a4   : > { %1128 = vrot.lane.b32.xlu1 %v6009_v16, %s5652_s5  ;;  %5073 = vrot.lane.b32.xlu0 %v6120_v55, %s5655_s19 }
 0x2a8   : > { %1130 = vrot.lane.b32.xlu1 %v6016_v18, %s5652_s5  ;;  %1970 = vrot.lane.b32.xlu0 %v6023_v20, %s5654_s18 }
 0x2ac   : > { %5048 = vrot.lane.b32.xlu1 %v6126_v56, %s5653_s17  ;;  %1972 = vrot.lane.b32.xlu0 %v6030_v22, %s5654_s18 }
 0x2b0   : > { %1136 = vrot.lane.b32.xlu1 %v6037_v24, %s5652_s5  ;;  %1976 = vrot.lane.b32.xlu0 %v6044_v26, %s5654_s18 }
 0x2b4   : > { %1571 = vrot.lane.b32.xlu1 %v5999_v13, %s5653_s17  ;;  %5083 = vrot.lane.b32.xlu0 %v6132_v57, %s5656_s6 }
 0x2b8   : > { %1545 = vrot.lane.b32.xlu1 %v6001_v14, %s5653_s17  ;;  %2385 = vrot.lane.b32.xlu0 %v6009_v16, %s5655_s19 }
 0x2bb   : > { %v531_v10 = vpop.xlane.xlu1 %530 }
 0x2bc   : > { %5231 = vrcp.f32 %v531_v10  ;;  %5058 = vrot.lane.b32.xlu1 %v6120_v55, %s5654_s18  ;;  %2387 = vrot.lane.b32.xlu0 %v6016_v18, %s5655_s19 }
 0x2bf   : > { %v534_v58 = vpop.xlane.xlu0 %533 }
 0x2c0   : > { %5233 = vrcp.f32 %v534_v58  ;;  %1551 = vrot.lane.b32.xlu1 %v6023_v20, %s5653_s17  ;;  %5093 = vrot.lane.b32.xlu0 %v6126_v56, %s5656_s6 }
 0x2c3   : > { %v537_v59 = vpop.xlane.xlu1 %536 }
 0x2c4   : > { %5235 = vrcp.f32 %v537_v59  ;;  %1553 = vrot.lane.b32.xlu1 %v6030_v22, %s5653_s17  ;;  %2393 = vrot.lane.b32.xlu0 %v6037_v24, %s5655_s19 }
 0x2c6   : > { %v5232_v60 = vpop.eup %5231 }
 0x2c7   : > { %v540_v61 = vpop.xlane.xlu0 %539  ;;  %v557_v62 = vmul.f32 %v5232_v60, %v6062_v25 }
 0x2c8   : > { %5237 = vrcp.f32 %v540_v61  ;;  %1557 = vrot.lane.b32.xlu1 %v6044_v26, %s5653_s17  ;;  %2828 = vrot.lane.b32.xlu0 %v5999_v13, %s5656_s6 }
 0x2c9   : > { %4226 = vmatmul.mubr.msk.f32.vlgmr.msra.gmra.mrb[0].mxu1 %vm486_vm3, %v557_v62 }
 0x2ca   : > { %v5234_v63 = vpop.eup %5233  ;;  %4228 = vmatprep.mubr.msk.f32.mxu1 %vm5649_vm0, %v7710_v1 }
 0x2cb   : > { %v543_v5 = vpop.xlane.xlu1 %542  ;;  %v558_v8 = vmul.f32 %v5234_v63, %v6066_v31 }
 0x2cc   : > { %5239 = vrcp.f32 %v543_v5  ;;  %5068 = vrot.lane.b32.xlu1 %v6132_v57, %s5655_s19  ;;  %2802 = vrot.lane.b32.xlu0 %v6001_v14, %s5656_s6  ;;  %v6378_v5 = vpack.i.bf16 %v6095_v47, %v6092_v46  ;;  %v6396_v47 = vpack.i.bf16 %v6108_v52, %v6105_v51 }
 0x2cd   : > { %4229 = vmatmul.mubr.msk.f32.gmra.mrb[2].mxu1 %vm486_vm3, %v558_v8 }
 0x2ce   : > { %v5236_v11 = vpop.eup %5235  ;;  %4231 = vmatprep.mubr.msk.f32.mxu1 %vm5649_vm0, %v7710_v1 }
 0x2cf   : > { %v546_v12 = vpop.xlane.xlu0 %545  ;;  %v559_v15 = vmul.f32 %v5236_v11, %v6070_v36  ;;  %v5014_v30 = vpop.permute.xlu1 %5013 }
 0x2d0   : > { %5241 = vrcp.f32 %v546_v12  ;;  %1966 = vrot.lane.b32.xlu1 %v6009_v16, %s5654_s18  ;;  %5103 = vrot.lane.b32.xlu0 %v6120_v55, %s5657_s25  ;;  %v5016_v33 = vunpack.i.h.bf16 %v5014_v30  ;;  %v5015_v34 = vunpack.i.l.bf16 %v5014_v30 }
 0x2d1   : > { %4232 = vmatmul.mubr.msk.f32.gmra.mrb[4].mxu1 %vm486_vm3, %v559_v15 }
 0x2d2   : > { %v5238_v17 = vpop.eup %5237  ;;  %4234 = vmatprep.mubr.msk.f32.mxu1 %vm5649_vm0, %v7710_v1  ;;  %v4762_v37 = vpack.c.bf16 %v5016_v33, %v5015_v34 }
 0x2d3   : > { %v5009_v19 = vpop.permute.xlu0 %5008  ;;  %v560_v21 = vmul.f32 %v5238_v17, %v6074_v39  ;;  %v5019_v38 = vpop.permute.xlu1 %5018 }
 0x2d4   : > { %v5011_v23 = vunpack.i.h.bf16 %v5009_v19  ;;  %v5010_v25 = vunpack.i.l.bf16 %v5009_v19  ;;  %1968 = vrot.lane.b32.xlu1 %v6016_v18, %s5654_s18  ;;  %2808 = vrot.lane.b32.xlu0 %v6023_v20, %s5656_s6  ;;  %v5021_v40 = vunpack.i.h.bf16 %v5019_v38  ;;  %v5020_v43 = vunpack.i.l.bf16 %v5019_v38 }
 0x2d5   : > { %4235 = vmatmul.mubr.msk.f32.gmra.mrb[6].mxu1 %vm486_vm3, %v560_v21 }
 0x2d6   : > { %v5240_v27 = vpop.eup %5239  ;;  %v4758_v28 = vpack.c.bf16 %v5011_v23, %v5010_v25  ;;  %4237 = vmatprep.mubr.msk.f32.mxu1 %vm5649_vm0, %v7710_v1  ;;  %v4766_v45 = vpack.c.bf16 %v5021_v40, %v5020_v43 }
 0x2d7   : > { %v561_v29 = vmul.f32 %v5240_v27, %v6086_v44  ;;  %v6260_v31 = vpop.permute.xlu0 %5023 }
 0x2d8   : > { %4760 = vmatpush3.bf16.xpose.msk.msra.mxu1 %vm5966_vm2, %v4758_v28  ;;  %5078 = vrot.lane.b32.xlu1 %v6126_v56, %s5655_s19  ;;  %v5025_v10 = vunpack.i.l.bf16 %v6260_v31 }
 0x2d9   : > { %4238 = vmatmul.mubr.msk.f32.gmra.mrb[8].mxu1 %vm486_vm3, %v561_v29  ;;  %4761 = vmatprep.subr.bf16.mxu1 %v7708_v0 }
 0x2da   : > { %v5242_v32 = vpop.eup %5241  ;;  %4240 = vmatprep.mubr.msk.f32.mxu1 %vm5649_vm0, %v7710_v1  ;;  %2810 = vrot.lane.b32.xlu0 %v6030_v22, %s5656_s6 }
 0x2db   : > { %v562_v35 = vmul.f32 %v5242_v32, %v6099_v49  ;;  %v6273_v36 = vpop.permute.xlu0 %702 }
 0x2dc   : > { %1974 = vrot.lane.b32.xlu1 %v6037_v24, %s5654_s18 }
 0x2dd   : > { %4241 = vmatmul.mubr.msk.f32.gmra.mrb[10].mxu1 %vm486_vm3, %v562_v35 }
 0x2de   : > { %4243 = vmatprep.mubr.msk.f32.mxu1 %vm5649_vm0, %v7710_v1  ;;  %2814 = vrot.lane.b32.xlu0 %v6044_v26, %s5656_s6 }
 0x2df   : > { %v6282_v39 = vpop.permute.xlu0 %704 }
 0x2e0   : > { %4764 = vmatpush3.bf16.xpose.msk.msra.mxu1 %vm5966_vm2, %v4762_v37  ;;  %2409 = vrot.lane.b32.xlu1 %v5999_v13, %s5655_s19 }
 0x2e1   : > { %4765 = vmatprep.subr.bf16.mxu1 %v7708_v0 }
 0x2e2   : > { %3221 = vrot.lane.b32.xlu0 %v6001_v14, %s5657_s25 }
 0x2e3   : > { %v6291_v44 = vpop.permute.xlu0 %5033 }
 0x2e4   : > { %2383 = vrot.lane.b32.xlu1 %v6001_v14, %s5655_s19  ;;  %v727_v14 = vpop.permute.xlu1 %726  ;;  %v5035_v11 = vunpack.i.l.bf16 %v6291_v44 }
 0x2e6   : > { %3225 = vrot.lane.b32.xlu0 %v6016_v18, %s5657_s25 }
 0x2e7   : > { %v6297_v48 = vpop.permute.xlu0 %710 }
 0x2e8   : > { %4768 = vmatpush3.bf16.xpose.msk.msra.mxu1 %vm5966_vm2, %v4766_v45  ;;  %5088 = vrot.lane.b32.xlu1 %v6120_v55, %s5656_s6 }
 0x2e9   : > { %4258 = vmatprep.subr.mxu1 %v7710_v1 }
 0x2ea   : > { %3229 = vrot.lane.b32.xlu0 %v6030_v22, %s5657_s25 }
 0x2eb   : > { %v6306_v49 = vpop.permute.xlu0 %1152 }
 0x2ec   : > { %2389 = vrot.lane.b32.xlu1 %v6023_v20, %s5655_s19 }
 0x2ee   : > { %3233 = vrot.lane.b32.xlu0 %v6044_v26, %s5657_s25 }
 0x2ef   : > { %v6312_v50 = vpop.permute.xlu0 %1126 }
 0x2f0   : > { %4259 = vmatpush3.xpose.msk.msra.mxu1 %vm343_vm1, %v727_v14  ;;  %2391 = vrot.lane.b32.xlu1 %v6030_v22, %s5655_s19 }
 0x2f1   : > { %4778 = vmatprep.subr.bf16.mxu1 %v7708_v0 }
 0x2f3   : > { %v6318_v53 = vpop.permute.xlu0 %5043 }
 0x2f4   : > { %2395 = vrot.lane.b32.xlu1 %v6044_v26, %s5655_s19  ;;  %v5046_v29 = vunpack.i.h.bf16 %v6318_v53 }
 0x2f7   : > { %v6322_v55 = vpop.permute.xlu0 %1132 }
 0x2f8   : > { %5098 = vrot.lane.b32.xlu1 %v6132_v57, %s5657_s25 }
 0x2fb   : > { %v6328_v6 = vpop.permute.xlu0 %1134 }
 0x2fc   : > { %2804 = vrot.lane.b32.xlu1 %v6009_v16, %s5656_s6 }
 0x2ff   : > { %v6332_v22 = vpop.permute.xlu0 %1138 }
 0x300   : > { %2806 = vrot.lane.b32.xlu1 %v6016_v18, %s5656_s6 }
 0x303   : > { %v6338_v26 = vpop.permute.xlu0 %5053 }
 0x304   : > { %5108 = vrot.lane.b32.xlu1 %v6126_v56, %s5657_s25  ;;  %v5026_v56 = vunpack.i.h.bf16 %v6260_v31  ;;  %v5045_v31 = vunpack.i.l.bf16 %v6318_v53  ;;  %v5055_v14 = vunpack.i.l.bf16 %v6338_v26 }
 0x306   : > { %v4804_v34 = vpack.c.bf16 %v5046_v29, %v5045_v31 }
 0x307   : > { %v6342_v3 = vpop.permute.xlu0 %1547 }
 0x308   : > { %v549_v2 = vpop.xlane.xlu1 %548  ;;  %2812 = vrot.lane.b32.xlu1 %v6037_v24, %s5656_s6 }
 0x309   : > { %5243 = vrcp.f32 %v549_v2 }
 0x30b   : > { %v6348_v58 = vpop.permute.xlu0 %1549 }
 0x30c   : > { %v701_v57 = vpop.permute.xlu1 %700  ;;  %3247 = vrot.lane.b32.xlu1 %v5999_v13, %s5657_s25  ;;  %v4779_v13 = vpack.c.bf16 %v5026_v56, %v5025_v10 }
 0x30f   : > { %v6358_v61 = vpop.permute.xlu0 %5063 }
 0x310   : > { %v5029_v9 = vpop.permute.xlu1 %5028  ;;  %3223 = vrot.lane.b32.xlu1 %v6009_v16, %s5657_s25 }
 0x311   : > { %v5030_v62 = vunpack.i.l.bf16 %v5029_v9 }
 0x313   : > { %v5244_v18 = vpop.eup %5243 }
 0x314   : > { %v563_v59 = vmul.f32 %v5244_v18, %v6153_v7  ;;  %v707_v60 = vpop.permute.xlu1 %706  ;;  %3227 = vrot.lane.b32.xlu1 %v6023_v20, %s5657_s25  ;;  %v5031_v7 = vunpack.i.h.bf16 %v5029_v9  ;;  %v6367_v20 = vpack.i.bf16 %v6082_v42, %v6079_v41  ;;  %v5036_v42 = vunpack.i.h.bf16 %v6291_v44 }
 0x316   : > { %4244 = vmatmul.mubr.msk.f32.gmra.mrb[12].mxu1 %vm486_vm3, %v563_v59  ;;  %5113 = vrot.lane.b32.xlu0 %v6367_v20, %s5651_s11  ;;  %v4783_v8 = vpack.c.bf16 %v5031_v7, %v5030_v62  ;;  %v4787_v15 = vpack.c.bf16 %v5036_v42, %v5035_v11 }
 0x317   : > { %4260 = vmatprep.mubr.msk.f32.mxu1 %vm5649_vm0, %v7710_v1 }
 0x318   : > { %v709_v16 = vpop.permute.xlu1 %708  ;;  %3231 = vrot.lane.b32.xlu1 %v6037_v24, %s5657_s25  ;;  %v6370_v24 = vpop.permute.xlu0 %1555 }
 0x31a   : > { %4261 = vmatmul.mubr.msk.f32.vlgmr.msra.gmra.mrb[14].mxu1 %vm343_vm1, %v701_v57  ;;  %5123 = vrot.lane.b32.xlu0 %v6396_v47, %s5651_s11 }
 0x31b   : > { %4781 = vmatpush3.bf16.xpose.msk.msra.mxu1 %vm5966_vm2, %v4779_v13  ;;  %4263 = vmatprep.mubr.msk.f32.mxu1 %vm5649_vm0, %v7710_v1 }
 0x31c   : > { %4782 = vmatprep.subr.bf16.mxu1 %v7708_v0  ;;  %v713_v63 = vpop.permute.xlu1 %712  ;;  %5118 = vrot.lane.b32.xlu1 %v6378_v5, %s5651_s11  ;;  %v6392_v46 = vpop.permute.xlu0 %1990 }
 0x31e   : > { %4264 = vmatmul.mubr.msk.f32.gmra.mrb[16].mxu1 %vm343_vm1, %v6273_v36  ;;  %5128 = vrot.lane.b32.xlu0 %v6367_v20, %s5652_s5 }
 0x31f   : > { %4266 = vmatprep.mubr.msk.f32.mxu1 %vm5649_vm0, %v7710_v1 }
 0x320   : > { %v5039_v41 = vpop.permute.xlu1 %5038  ;;  %952 = vrot.lane.b32.xlu1 %v6114_v54, %s5651_s11  ;;  %v6406_v19 = vpop.permute.xlu0 %1964 }
 0x321   : > { %v5041_v52 = vunpack.i.h.bf16 %v5039_v41  ;;  %v5040_v21 = vunpack.i.l.bf16 %v5039_v41 }
 0x322   : > { %4267 = vmatmul.mubr.msk.f32.gmra.mrb[18].mxu1 %vm343_vm1, %v6282_v39  ;;  %5138 = vrot.lane.b32.xlu0 %v6396_v47, %s5652_s5 }
 0x323   : > { %4785 = vmatpush3.bf16.xpose.msk.msra.mxu1 %vm5966_vm2, %v4783_v8  ;;  %4269 = vmatprep.mubr.msk.f32.mxu1 %vm5649_vm0, %v7710_v1  ;;  %v4800_v27 = vpack.c.bf16 %v5041_v52, %v5040_v21 }
 0x324   : > { %4786 = vmatprep.subr.bf16.mxu1 %v7708_v0  ;;  %v1129_v12 = vpop.permute.xlu1 %1128  ;;  %5133 = vrot.lane.b32.xlu1 %v6378_v5, %s5652_s5  ;;  %v6420_v23 = vpop.permute.xlu0 %5073 }
 0x325   : > { %v5075_v8 = vunpack.i.l.bf16 %v6420_v23 }
 0x326   : > { %4270 = vmatmul.mubr.msk.f32.gmra.mrb[20].mxu1 %vm343_vm1, %v707_v60  ;;  %5143 = vrot.lane.b32.xlu0 %v6367_v20, %s5653_s17 }
 0x327   : > { %4272 = vmatprep.mubr.msk.f32.mxu1 %vm5649_vm0, %v7710_v1 }
 0x328   : > { %v1131_v17 = vpop.permute.xlu1 %1130  ;;  %1371 = vrot.lane.b32.xlu1 %v6114_v54, %s5652_s5  ;;  %v6429_v28 = vpop.permute.xlu0 %1970 }
 0x32a   : > { %4273 = vmatmul.mubr.msk.f32.gmra.mrb[22].mxu1 %vm343_vm1, %v709_v16  ;;  %5153 = vrot.lane.b32.xlu0 %v6396_v47, %s5653_s17 }
 0x32b   : > { %4789 = vmatpush3.bf16.xpose.msk.msra.mxu1 %vm5966_vm2, %v4787_v15  ;;  %4275 = vmatprep.mubr.msk.f32.mxu1 %vm5649_vm0, %v7710_v1 }
 0x32c   : > { %4328 = vmatprep.subr.mxu1 %v7710_v1  ;;  %v5049_v51 = vpop.permute.xlu1 %5048  ;;  %5148 = vrot.lane.b32.xlu1 %v6378_v5, %s5653_s17  ;;  %v6447_v33 = vpop.permute.xlu0 %1972 }
 0x32d   : > { %v5051_v36 = vunpack.i.h.bf16 %v5049_v51  ;;  %v5050_v37 = vunpack.i.l.bf16 %v5049_v51 }
 0x32e   : > { %4276 = vmatmul.mubr.msk.f32.gmra.mrb[24].mxu1 %vm343_vm1, %v6297_v48  ;;  %5158 = vrot.lane.b32.xlu0 %v6367_v20, %s5654_s18 }
 0x32f   : > { %4278 = vmatprep.mubr.msk.f32.mxu1 %vm5649_vm0, %v7710_v1  ;;  %v4808_v40 = vpack.c.bf16 %v5051_v36, %v5050_v37 }
 0x330   : > { %v1137_v25 = vpop.permute.xlu1 %1136  ;;  %1790 = vrot.lane.b32.xlu1 %v6114_v54, %s5653_s17  ;;  %v6463_v38 = vpop.permute.xlu0 %1976 }
 0x332   : > { %4279 = vmatmul.mubr.msk.f32.gmra.mrb[26].mxu1 %vm343_vm1, %v713_v63  ;;  %5168 = vrot.lane.b32.xlu0 %v6396_v47, %s5654_s18 }
 0x333   : > { %4329 = vmatpush3.xpose.msk.msra.mxu1 %vm343_vm1, %v6306_v49  ;;  %4330 = vmatprep.mubr.msk.f32.mxu1 %vm5649_vm0, %v7710_v1  ;;  %v5056_v49 = vunpack.i.h.bf16 %v6338_v26 }
 0x334   : > { %4799 = vmatprep.subr.bf16.mxu1 %v7708_v0  ;;  %v1572_v30 = vpop.permute.xlu1 %1571  ;;  %5163 = vrot.lane.b32.xlu1 %v6378_v5, %s5654_s18  ;;  %v6476_v44 = vpop.permute.xlu0 %5083 }
 0x335   : > { %v4821_v53 = vpack.c.bf16 %v5056_v49, %v5055_v14 }
 0x336   : > { %4331 = vmatmul.mubr.msk.f32.vlgmr.msra.gmra.mrb[28].mxu1 %vm343_vm1, %v6312_v50  ;;  %5173 = vrot.lane.b32.xlu0 %v6367_v20, %s5655_s19 }
 0x337   : > { %4802 = vmatpush3.bf16.xpose.msk.msra.mxu1 %vm5966_vm2, %v4800_v27  ;;  %4333 = vmatprep.mubr.msk.f32.mxu1 %vm5649_vm0, %v7710_v1  ;;  %v5085_v27 = vunpack.i.l.bf16 %v6476_v44 }
 0x338   : > { %4803 = vmatprep.subr.bf16.mxu1 %v7708_v0  ;;  %v1546_v32 = vpop.permute.xlu1 %1545  ;;  %2209 = vrot.lane.b32.xlu1 %v6114_v54, %s5654_s18  ;;  %v6489_v48 = vpop.permute.xlu0 %2385 }
 0x33a   : > { %4334 = vmatmul.mubr.msk.f32.gmra.mrb[30].mxu1 %vm343_vm1, %v1129_v12  ;;  %5183 = vrot.lane.b32.xlu0 %v6396_v47, %s5655_s19 }
 0x33b   : > { %4336 = vmatprep.mubr.msk.f32.mxu1 %vm5649_vm0, %v7710_v1 }
 0x33c   : > { %v5059_v35 = vpop.permute.xlu1 %5058  ;;  %5178 = vrot.lane.b32.xlu1 %v6378_v5, %s5655_s19 }
 0x33d   : > { %v5060_v2 = vunpack.i.l.bf16 %v5059_v35 }
 0x33e   : > { %4337 = vmatmul.mubr.msk.f32.gmra.mrb[32].mxu1 %vm343_vm1, %v1131_v17  ;;  %2628 = vrot.lane.b32.xlu0 %v6114_v54, %s5655_s19  ;;  %v5066_v54 = vunpack.i.h.bf16 %v6358_v61 }
 0x33f   : > { %4806 = vmatpush3.bf16.xpose.msk.msra.mxu1 %vm5966_vm2, %v4804_v34  ;;  %4339 = vmatprep.mubr.msk.f32.mxu1 %vm5649_vm0, %v7710_v1 }
 0x340   : > { %4807 = vmatprep.subr.bf16.mxu1 %v7708_v0  ;;  %v1552_v39 = vpop.permute.xlu1 %1551  ;;  %5188 = vrot.lane.b32.xlu1 %v6367_v20, %s5656_s6 }
 0x342   : > { %4340 = vmatmul.mubr.msk.f32.gmra.mrb[34].mxu1 %vm343_vm1, %v6322_v55  ;;  %v6507_v55 = vpop.permute.xlu0 %2387  ;;  %5198 = vrot.lane.b32.xlu0 %v6396_v47, %s5656_s6 }
 0x343   : > { %4342 = vmatprep.mubr.msk.f32.mxu1 %vm5649_vm0, %v7710_v1 }
 0x344   : > { %v1554_v43 = vpop.permute.xlu1 %1553  ;;  %5193 = vrot.lane.b32.xlu1 %v6378_v5, %s5656_s6  ;;  %v5076_v5 = vunpack.i.h.bf16 %v6420_v23 }
 0x346   : > { %4343 = vmatmul.mubr.msk.f32.gmra.mrb[36].mxu1 %vm343_vm1, %v6328_v6  ;;  %v6520_v57 = vpop.permute.xlu0 %5093  ;;  %v4846_v11 = vpack.c.bf16 %v5076_v5, %v5075_v8 }
 0x347   : > { %4810 = vmatpush3.bf16.xpose.msk.msra.mxu1 %vm5966_vm2, %v4808_v40  ;;  %4345 = vmatprep.mubr.msk.f32.mxu1 %vm5649_vm0, %v7710_v1 }
 0x348   : > { %4398 = vmatprep.subr.mxu1 %v7710_v1  ;;  %v1558_v45 = vpop.permute.xlu1 %1557 }
 0x34a   : > { %4346 = vmatmul.mubr.msk.f32.gmra.mrb[38].mxu1 %vm343_vm1, %v1137_v25  ;;  %v6528_v56 = vpop.permute.xlu0 %2393  ;;  %v5086_v25 = vunpack.i.h.bf16 %v6476_v44 }
 0x34b   : > { %4348 = vmatprep.mubr.msk.f32.mxu1 %vm5649_vm0, %v7710_v1 }
 0x34c   : > { %v5069_v50 = vpop.permute.xlu1 %5068  ;;  %v4863_v29 = vpack.c.bf16 %v5086_v25, %v5085_v27  ;;  %v695_v27 = vld [vmem:[#allocation8 + $0x48] sm:$0xff] }
 0x34d   : > { %v5070_v7 = vunpack.i.l.bf16 %v5069_v50 }
 0x34e   : > { %4349 = vmatmul.mubr.msk.f32.gmra.mrb[40].mxu1 %vm343_vm1, %v6332_v22  ;;  %v5061_v22 = vunpack.i.h.bf16 %v5059_v35 }
 0x34f   : > { %4399 = vmatpush3.xpose.msk.msra.mxu1 %vm343_vm1, %v1572_v30  ;;  %4400 = vmatprep.mubr.msk.f32.mxu1 %vm5649_vm0, %v7710_v1 }
 0x350   : > { %4820 = vmatprep.subr.bf16.mxu1 %v7708_v0  ;;  %v1967_v6 = vpop.permute.xlu1 %1966  ;;  %v4825_v9 = vpack.c.bf16 %v5061_v22, %v5060_v2 }
 0x352   : > { %4401 = vmatmul.mubr.msk.f32.vlgmr.msra.gmra.mrb[42].mxu1 %vm343_vm1, %v1546_v32 }
 0x353   : > { %4823 = vmatpush3.bf16.xpose.msk.msra.mxu1 %vm5966_vm2, %v4821_v53  ;;  %4403 = vmatprep.mubr.msk.f32.mxu1 %vm5649_vm0, %v7710_v1 }
 0x354   : > { %4824 = vmatprep.subr.bf16.mxu1 %v7708_v0  ;;  %v1969_v26 = vpop.permute.xlu1 %1968 }
 0x356   : > { %4404 = vmatmul.mubr.msk.f32.gmra.mrb[44].mxu1 %vm343_vm1, %v6342_v3  ;;  %v5065_v3 = vunpack.i.l.bf16 %v6358_v61  ;;  %v5071_v61 = vunpack.i.h.bf16 %v5069_v50 }
 0x357   : > { %4406 = vmatprep.mubr.msk.f32.mxu1 %vm5649_vm0, %v7710_v1 }
 0x358   : > { %v5079_v18 = vpop.permute.xlu1 %5078  ;;  %v4829_v59 = vpack.c.bf16 %v5066_v54, %v5065_v3  ;;  %v4842_v20 = vpack.c.bf16 %v5071_v61, %v5070_v7 }
 0x359   : > { %v5081_v12 = vunpack.i.h.bf16 %v5079_v18  ;;  %v5080_v15 = vunpack.i.l.bf16 %v5079_v18 }
 0x35a   : > { %4407 = vmatmul.mubr.msk.f32.gmra.mrb[46].mxu1 %vm343_vm1, %v6348_v58  ;;  %v6542_v58 = vpop.permute.xlu0 %2828 }
 0x35b   : > { %4827 = vmatpush3.bf16.xpose.msk.msra.mxu1 %vm5966_vm2, %v4825_v9  ;;  %4409 = vmatprep.mubr.msk.f32.mxu1 %vm5649_vm0, %v7710_v1  ;;  %v4850_v51 = vpack.c.bf16 %v5081_v12, %v5080_v15 }
 0x35c   : > { %4828 = vmatprep.subr.bf16.mxu1 %v7708_v0  ;;  %v1975_v10 = vpop.permute.xlu1 %1974 }
 0x35e   : > { %4410 = vmatmul.mubr.msk.f32.gmra.mrb[48].mxu1 %vm343_vm1, %v1552_v39  ;;  %v6550_v16 = vpop.permute.xlu0 %2802 }
 0x35f   : > { %4412 = vmatprep.mubr.msk.f32.mxu1 %vm5649_vm0, %v7710_v1 }
 0x360   : > { %v2410_v60 = vpop.permute.xlu1 %2409 }
 0x362   : > { %4413 = vmatmul.mubr.msk.f32.gmra.mrb[50].mxu1 %vm343_vm1, %v1554_v43  ;;  %v6561_v63 = vpop.permute.xlu0 %5103 }
 0x363   : > { %4831 = vmatpush3.bf16.xpose.msk.msra.mxu1 %vm5966_vm2, %v4829_v59  ;;  %4415 = vmatprep.mubr.msk.f32.mxu1 %vm5649_vm0, %v7710_v1 }
 0x364   : > { %4468 = vmatprep.subr.mxu1 %v7710_v1  ;;  %v2384_v13 = vpop.permute.xlu1 %2383 }
 0x366   : > { %4416 = vmatmul.mubr.msk.f32.gmra.mrb[52].mxu1 %vm343_vm1, %v6370_v24  ;;  %v6574_v41 = vpop.permute.xlu0 %2808 }
 0x367   : > { %4418 = vmatprep.mubr.msk.f32.mxu1 %vm5649_vm0, %v7710_v1 }
 0x368   : > { %v5089_v62 = vpop.permute.xlu1 %5088 }
 0x369   : > { %v5090_v34 = vunpack.i.l.bf16 %v5089_v62 }
 0x36a   : > { %4419 = vmatmul.mubr.msk.f32.gmra.mrb[54].mxu1 %vm343_vm1, %v1558_v45  ;;  %v6584_v47 = vpop.permute.xlu0 %2810  ;;  %v5096_v45 = vunpack.i.h.bf16 %v6520_v57 }
 0x36b   : > { %4469 = vmatpush3.xpose.msk.msra.mxu1 %vm343_vm1, %v6392_v46  ;;  %4470 = vmatprep.mubr.msk.f32.mxu1 %vm5649_vm0, %v7710_v1 }
 0x36c   : > { %4841 = vmatprep.subr.bf16.mxu1 %v7708_v0  ;;  %v6564_v24 = vpop.permute.xlu1 %2389 }
 0x36e   : > { %4471 = vmatmul.mubr.msk.f32.vlgmr.msra.gmra.mrb[56].mxu1 %vm343_vm1, %v6406_v19  ;;  %v6594_v19 = vpop.permute.xlu0 %2814 }
 0x36f   : > { %4844 = vmatpush3.bf16.xpose.msk.msra.mxu1 %vm5966_vm2, %v4842_v20  ;;  %4473 = vmatprep.mubr.msk.f32.mxu1 %vm5649_vm0, %v7710_v1 }
 0x370   : > { %4845 = vmatprep.subr.bf16.mxu1 %v7708_v0  ;;  %v6577_v42 = vpop.permute.xlu1 %2391 }
 0x372   : > { %4474 = vmatmul.mubr.msk.f32.gmra.mrb[58].mxu1 %vm343_vm1, %v1967_v6  ;;  %v6608_v21 = vpop.permute.xlu0 %3221 }
 0x373   : > { %4476 = vmatprep.mubr.msk.f32.mxu1 %vm5649_vm0, %v7710_v1 }
 0x374   : > { %v6582_v46 = vpop.permute.xlu1 %2395 }
 0x376   : > { %4477 = vmatmul.mubr.msk.f32.gmra.mrb[60].mxu1 %vm343_vm1, %v1969_v26 }
 0x377   : > { %4848 = vmatpush3.bf16.xpose.msk.msra.mxu1 %vm5966_vm2, %v4846_v11  ;;  %4479 = vmatprep.mubr.msk.f32.mxu1 %vm5649_vm0, %v7710_v1 }
 0x378   : > { %4849 = vmatprep.subr.bf16.mxu1 %v7708_v0  ;;  %v6592_v17 = vpop.permute.xlu1 %5098 }
 0x379   : > { %v5101_v18 = vunpack.i.h.bf16 %v6592_v17  ;;  %v5100_v54 = vunpack.i.l.bf16 %v6592_v17 }
 0x37a   : > { %4480 = vmatmul.mubr.msk.f32.gmra.mrb[62].mxu1 %vm343_vm1, %v6429_v28  ;;  %v6618_v28 = vpop.permute.xlu0 %3225 }
 0x37b   : > { %4482 = vmatprep.mubr.msk.f32.mxu1 %vm5649_vm0, %v7710_v1 }
 0x37c   : > { %v6600_v52 = vpop.permute.xlu1 %2804 }
 0x37e   : > { %4483 = vmatmul.mubr.msk.f32.gmra.mrb[64].mxu1 %vm343_vm1, %v6447_v33  ;;  %v6627_v31 = vpop.permute.xlu0 %3229  ;;  %v5091_v33 = vunpack.i.h.bf16 %v5089_v62  ;;  %v5105_v62 = vunpack.i.l.bf16 %v6561_v63 }
 0x37f   : > { %4852 = vmatpush3.bf16.xpose.msk.msra.mxu1 %vm5966_vm2, %v4850_v51  ;;  %4485 = vmatprep.mubr.msk.f32.mxu1 %vm5649_vm0, %v7710_v1  ;;  %v694_v51 = vld [vmem:[#allocation8 + $0x40] sm:$0xff] }
 0x380   : > { %4538 = vmatprep.subr.mxu1 %v7710_v1  ;;  %v6611_v23 = vpop.permute.xlu1 %2806  ;;  %v4867_v37 = vpack.c.bf16 %v5091_v33, %v5090_v34 }
 0x382   : > { %4486 = vmatmul.mubr.msk.f32.gmra.mrb[66].mxu1 %vm343_vm1, %v1975_v10  ;;  %v6637_v35 = vpop.permute.xlu0 %3233 }
 0x383   : > { %4488 = vmatprep.mubr.msk.f32.mxu1 %vm5649_vm0, %v7710_v1 }
 0x384   : > { %v6620_v30 = vpop.permute.xlu1 %5108 }
 0x385   : > { %v5111_v8 = vunpack.i.h.bf16 %v6620_v30 }
 0x386   : > { %4489 = vmatmul.mubr.msk.f32.gmra.mrb[68].mxu1 %vm343_vm1, %v6463_v38 }
 0x387   : > { %4539 = vmatpush3.xpose.msk.msra.mxu1 %vm343_vm1, %v2410_v60  ;;  %4540 = vmatprep.mubr.msk.f32.mxu1 %vm5649_vm0, %v7710_v1 }
 0x388   : > { %4862 = vmatprep.subr.bf16.mxu1 %v7708_v0  ;;  %v6630_v32 = vpop.permute.xlu1 %2812  ;;  %v5114_v38 = vpop.permute.xlu0 %5113 }
 0x389   : > { %v5116_v40 = vunpack.i.h.bf16 %v5114_v38  ;;  %v5115_v43 = vunpack.i.l.bf16 %v5114_v38 }
 0x38a   : > { %4541 = vmatmul.mubr.msk.f32.vlgmr.msra.gmra.mrb[70].mxu1 %vm343_vm1, %v2384_v13 }
 0x38b   : > { %4865 = vmatpush3.bf16.xpose.msk.msra.mxu1 %vm5966_vm2, %v4863_v29  ;;  %4543 = vmatprep.mubr.msk.f32.mxu1 %vm5649_vm0, %v7710_v1  ;;  %v4770_v44 = vpack.c.bf16 %v5116_v40, %v5115_v43 }
 0x38c   : > { %4866 = vmatprep.subr.bf16.mxu1 %v7708_v0  ;;  %v6640_v36 = vpop.permute.xlu1 %3247  ;;  %v5124_v53 = vpop.permute.xlu0 %5123 }
 0x38d   : > { %4771 = vmatpush3.bf16.msra.mxu0 %v4770_v44  ;;  %v5125_v9 = vunpack.i.l.bf16 %v5124_v53  ;;  %v698_v44 = vld [vmem:[#allocation8 + $0x60] sm:$0xff] }
 0x38e   : > { %4544 = vmatmul.mubr.msk.f32.gmra.mrb[72].mxu1 %vm343_vm1, %v6489_v48  ;;  %v5095_v48 = vunpack.i.l.bf16 %v6520_v57  ;;  %4772 = vmatprep.subr.bf16.mxu0 %v7708_v0  ;;  %v5126_v57 = vunpack.i.h.bf16 %v5124_v53 }
 0x38f   : > { %4546 = vmatprep.mubr.msk.f32.mxu1 %vm5649_vm0, %v7710_v1 }
 0x390   : > { %v6646_v39 = vpop.permute.xlu1 %3223  ;;  %v4871_v14 = vpack.c.bf16 %v5096_v45, %v5095_v48  ;;  %v4776_v60 = vpack.c.bf16 %v5126_v57, %v5125_v9 }
 0x392   : > { %4547 = vmatmul.mubr.msk.f32.gmra.mrb[74].mxu1 %vm343_vm1, %v6507_v55 }
 0x393   : > { %4869 = vmatpush3.bf16.xpose.msk.msra.mxu1 %vm5966_vm2, %v4867_v37  ;;  %4549 = vmatprep.mubr.msk.f32.mxu1 %vm5649_vm0, %v7710_v1  ;;  %v697_v37 = vld [vmem:[#allocation8 + $0x58] sm:$0xff] }
 0x394   : > { %4870 = vmatprep.subr.bf16.mxu1 %v7708_v0  ;;  %v6657_v49 = vpop.permute.xlu1 %3227 }
 0x396   : > { %4550 = vmatmul.mubr.msk.f32.gmra.mrb[76].mxu1 %vm343_vm1, %v6564_v24 }
 0x397   : > { %4552 = vmatprep.mubr.msk.f32.mxu1 %vm5649_vm0, %v7710_v1 }
 0x398   : > { %v6664_v50 = vpop.permute.xlu1 %3231 }
 0x39a   : > { %4553 = vmatmul.mubr.msk.f32.gmra.mrb[78].mxu1 %vm343_vm1, %v6577_v42  ;;  %v5110_v42 = vunpack.i.l.bf16 %v6620_v30 }
 0x39b   : > { %4873 = vmatpush3.bf16.xpose.msk.msra.mxu1 %vm5966_vm2, %v4871_v14  ;;  %4555 = vmatprep.mubr.msk.f32.mxu1 %vm5649_vm0, %v7710_v1 }
 0x39c   : > { %v651_v55 = vpop.f32.mrb[0].mxu1  ;;  %4608 = vmatprep.subr.mxu1 %v7710_v1  ;;  %v5119_v6 = vpop.permute.xlu1 %5118  ;;  %v4892_v12 = vpack.c.bf16 %v5111_v8, %v5110_v42 }
 0x39d   : > { %685 = vst.msk [vmem:[%s6674_s29] sm:$0xff] %vm343_vm1, %v651_v55  ;;  %v4227_v22 = vpop.f32.mrb[1].mxu1  ;;  %v5121_v2 = vunpack.i.h.bf16 %v5119_v6  ;;  %v5120_v26 = vunpack.i.l.bf16 %v5119_v6 }
 0x39e   : > { %4556 = vmatmul.mubr.msk.f32.gmra.mrb[80].mxu1 %vm343_vm1, %v6528_v56  ;;  %v4884_v56 = vpack.c.bf16 %v5101_v18, %v5100_v54  ;;  %v1120_v54 = vld [vmem:[#allocation8 + $0x78] sm:$0xff] }
 0x39f   : > { %4558 = vmatprep.mubr.msk.f32.mxu1 %vm5649_vm0, %v7710_v1  ;;  %v4773_v3 = vpack.c.bf16 %v5121_v2, %v5120_v26  ;;  %v1119_v2 = vld [vmem:[#allocation8 + $0x70] sm:$0xff] }
 0x3a0   : > { %v656_v10 = vpop.f32.mrb[2].mxu1  ;;  %v953_v7 = vpop.permute.xlu1 %952 }
 0x3a1   : > { %686 = vst.msk [vmem:[%s6674_s29 + $0x8] sm:$0xff] %vm343_vm1, %v656_v10  ;;  %v4230_v59 = vpop.f32.mrb[3].mxu1  ;;  %4774 = vmatpush3.bf16.msra.mxu0 %v4773_v3 }
 0x3a2   : > { %4559 = vmatmul.mubr.msk.f32.gmra.mrb[82].mxu1 %vm343_vm1, %v6582_v46  ;;  %4775 = vmatprep.subr.bf16.mxu0 %v7708_v0 }
 0x3a3   : > { %4609 = vmatpush3.xpose.msk.msra.mxu1 %vm343_vm1, %v6542_v58  ;;  %4610 = vmatprep.mubr.msk.f32.mxu1 %vm5649_vm0, %v7710_v1  ;;  %v5106_v58 = vunpack.i.h.bf16 %v6561_v63 }
 0x3a4   : > { %v661_v13 = vpop.f32.mrb[4].mxu1  ;;  %4883 = vmatprep.subr.bf16.mxu1 %v7708_v0 }
 0x3a5   : > { %687 = vst.msk [vmem:[%s6674_s29 + $0x10] sm:$0xff] %vm343_vm1, %v661_v13  ;;  %v4233_v61 = vpop.f32.mrb[5].mxu1  ;;  %4777 = vmatpush3.bf16.msra.mxu0 %v4776_v60  ;;  %v4888_v24 = vpack.c.bf16 %v5106_v58, %v5105_v62  ;;  %v1122_v62 = vld [vmem:[#allocation8 + $0x88] sm:$0xff] }
 0x3a6   : > { %4611 = vmatmul.mubr.msk.f32.vlgmr.msra.gmra.mrb[84].mxu1 %vm343_vm1, %v6550_v16  ;;  %4293 = vmatprep.subr.mxu0 %v7710_v1 }
 0x3a7   : > { %4886 = vmatpush3.bf16.xpose.msk.msra.mxu1 %vm5966_vm2, %v4884_v56  ;;  %4613 = vmatprep.mubr.msk.f32.mxu1 %vm5649_vm0, %v7710_v1  ;;  %v1121_v56 = vld [vmem:[#allocation8 + $0x80] sm:$0xff] }
 0x3a8   : > { %v666_v20 = vpop.f32.mrb[6].mxu1  ;;  %4887 = vmatprep.subr.bf16.mxu1 %v7708_v0 }
 0x3a9   : > { %688 = vst.msk [vmem:[%s6674_s29 + $0x18] sm:$0xff] %vm343_vm1, %v666_v20  ;;  %v4236_v16 = vpop.f32.mrb[7].mxu1  ;;  %4294 = vmatpush3.msra.mxu0 %v953_v7 }
 0x3aa   : > { %4614 = vmatmul.mubr.msk.f32.gmra.mrb[86].mxu1 %vm343_vm1, %v6600_v52  ;;  %4790 = vmatprep.subr.bf16.mxu0 %v7708_v0 }
 0x3ab   : > { %4616 = vmatprep.mubr.msk.f32.mxu1 %vm5649_vm0, %v7710_v1 }
 0x3ac   : > { %v671_v5 = vpop.f32.mrb[8].mxu1 }
 0x3ad   : > { %689 = vst.msk [vmem:[%s6674_s29 + $0x20] sm:$0xff] %vm343_vm1, %v671_v5  ;;  %v4239_v63 = vpop.f32.mrb[9].mxu1 }
 0x3ae   : > { %4617 = vmatmul.mubr.msk.f32.gmra.mrb[88].mxu1 %vm343_vm1, %v6611_v23  ;;  %v1123_v63 = vld [vmem:[#allocation8 + $0x90] sm:$0xff] }
 0x3af   : > { %4890 = vmatpush3.bf16.xpose.msk.msra.mxu1 %vm5966_vm2, %v4888_v24  ;;  %4619 = vmatprep.mubr.msk.f32.mxu1 %vm5649_vm0, %v7710_v1 }
 0x3b0   : > { %v676_v11 = vpop.f32.mrb[10].mxu1  ;;  %4891 = vmatprep.subr.bf16.mxu1 %v7708_v0 }
 0x3b1   : > { %690 = vst.msk [vmem:[%s6674_s29 + $0x28] sm:$0xff] %vm343_vm1, %v676_v11  ;;  %v4242_v46 = vpop.f32.mrb[11].mxu1 }
 0x3b2   : > { %4620 = vmatmul.mubr.msk.f32.gmra.mrb[90].mxu1 %vm343_vm1, %v6574_v41 }
 0x3b3   : > { %4622 = vmatprep.mubr.msk.f32.mxu1 %vm5649_vm0, %v7710_v1 }
 0x3b6   : > { %4623 = vmatmul.mubr.msk.f32.gmra.mrb[92].mxu1 %vm343_vm1, %v6584_v47  ;;  %v693_v47 = vld [vmem:[#allocation8 + $0x38] sm:$0xff] }
 0x3b7   : > { %4894 = vmatpush3.bf16.xpose.msk.msra.mxu1 %vm5966_vm2, %v4892_v12  ;;  %4625 = vmatprep.mubr.msk.f32.mxu1 %vm5649_vm0, %v7710_v1  ;;  %v1124_v12 = vld [vmem:[#allocation8 + $0x98] sm:$0xff] }
 0x3b8   : > { %4678 = vmatprep.subr.mxu1 %v7710_v1 }
 0x3ba   : > { %4626 = vmatmul.mubr.msk.f32.gmra.mrb[94].mxu1 %vm343_vm1, %v6630_v32  ;;  %v696_v32 = vld [vmem:[#allocation8 + $0x50] sm:$0xff] }
 0x3bb   : > { %4628 = vmatprep.mubr.msk.f32.mxu1 %vm5649_vm0, %v7710_v1 }
 0x3be   : > { %4629 = vmatmul.mubr.msk.f32.gmra.mrb[96].mxu1 %vm343_vm1, %v6594_v19 }
 0x3bf   : > { %4679 = vmatpush3.xpose.msk.msra.mxu1 %vm343_vm1, %v6640_v36  ;;  %4680 = vmatprep.mubr.msk.f32.mxu1 %vm5649_vm0, %v7710_v1 }
 0x3c0   : > { %4904 = vmatprep.subr.bf16.mxu1 %v7708_v0  ;;  %v2796_v0 = vld [vmem:[#allocation8 + $0x158] sm:$0xff] }
 0x3c2   : > { %4681 = vmatmul.mubr.msk.f32.vlgmr.msra.gmra.mrb[98].mxu1 %vm343_vm1, %v6608_v21 }
 0x3c3   : > { %4683 = vmatprep.mubr.msk.f32.mxu1 %vm5649_vm0, %v7710_v1 }
 0x3c6   : > { %4684 = vmatmul.mubr.msk.f32.gmra.mrb[100].mxu1 %vm343_vm1, %v6646_v39 }
 0x3c7   : > { %4686 = vmatprep.mubr.msk.f32.mxu1 %vm5649_vm0, %v7710_v1 }
 0x3ca   : > { %4687 = vmatmul.mubr.msk.f32.gmra.mrb[102].mxu1 %vm343_vm1, %v6618_v28 }
 0x3cb   : > { %4689 = vmatprep.mubr.msk.f32.mxu1 %vm5649_vm0, %v7710_v1 }
 0x3ce   : > { %4690 = vmatmul.mubr.msk.f32.gmra.mrb[104].mxu1 %vm343_vm1, %v6657_v49 }
 0x3cf   : > { %4692 = vmatprep.mubr.msk.f32.mxu1 %vm5649_vm0, %v7710_v1 }
 0x3d2   : > { %4693 = vmatmul.mubr.msk.f32.gmra.mrb[106].mxu1 %vm343_vm1, %v6627_v31 }
 0x3d3   : > { %4695 = vmatprep.mubr.msk.f32.mxu1 %vm5649_vm0, %v7710_v1 }
 0x3d6   : > { %4696 = vmatmul.mubr.msk.f32.gmra.mrb[108].mxu1 %vm343_vm1, %v6664_v50  ;;  %v699_v50 = vld [vmem:[#allocation8 + $0x68] sm:$0xff] }
 0x3d7   : > { %4698 = vmatprep.mubr.msk.f32.mxu1 %vm5649_vm0, %v7710_v1 }
 0x3da   : > { %4699 = vmatmul.mubr.msk.f32.gmra.mrb[110].mxu1 %vm343_vm1, %v6637_v35 }
 0x3db   : > { %4733 = vmatprep.mubr.msk.f32.mxu1 %vm5649_vm0, %v7710_v1 }
 0x3e9   : > { %v681_v4 = vpop.f32.mrb[12].mxu1 }
 0x3ea   : > { %691 = vst.msk [vmem:[%s6674_s29 + $0x30] sm:$0xff] %vm343_vm1, %v681_v4  ;;  %v4245_v41 = vpop.f32.mrb[13].mxu1 }
 0x3ed   : > { %v822_v15 = vpop.f32.mrb[14].mxu1 }
 0x3ee   : > { %v6778_v17 = vadd.f32 %v822_v15, %v693_v47  ;;  %v4262_v19 = vpop.f32.mrb[15].mxu1 }
 0x3ef   : > { %v1125_v19 = vld [vmem:[#allocation8 + $0xa0] sm:$0xff] }
 0x3f0   : > { %v856_v52 = vsel %vm486_vm3, %v6778_v17, -inf }
 0x3f1   : > { %857 = vmax.xlane.f32.xlu1 %v856_v52  ;;  %v827_v21 = vpop.f32.mrb[16].mxu1 }
 0x3f2   : > { %v6782_v23 = vadd.f32 %v827_v21, %v694_v51  ;;  %v4265_v25 = vpop.f32.mrb[17].mxu1 }
 0x3f4   : > { %v859_v28 = vsel %vm486_vm3, %v6782_v23, -inf }
 0x3f5   : > { %860 = vmax.xlane.f32.xlu0 %v859_v28  ;;  %v832_v30 = vpop.f32.mrb[18].mxu1 }
 0x3f6   : > { %v6786_v29 = vadd.f32 %v832_v30, %v695_v27  ;;  %v4268_v31 = vpop.f32.mrb[19].mxu1  ;;  %v1538_v27 = vld [vmem:[#allocation8 + $0xa8] sm:$0xff] }
 0x3f8   : > { %v862_v33 = vsel %vm486_vm3, %v6786_v29, -inf }
 0x3f9   : > { %863 = vmax.xlane.f32.xlu0 %v862_v33  ;;  %v837_v34 = vpop.f32.mrb[20].mxu1  ;;  %v1539_v33 = vld [vmem:[#allocation8 + $0xb0] sm:$0xff] }
 0x3fa   : > { %v6790_v35 = vadd.f32 %v837_v34, %v696_v32  ;;  %v4271_v36 = vpop.f32.mrb[21].mxu1 }
 0x3fc   : > { %v865_v38 = vsel %vm486_vm3, %v6790_v35, -inf }
 0x3fd   : > { %866 = vmax.xlane.f32.xlu0 %v865_v38  ;;  %v842_v39 = vpop.f32.mrb[22].mxu1 }
 0x3fe   : > { %v6794_v40 = vadd.f32 %v842_v39, %v697_v37  ;;  %v4274_v43 = vpop.f32.mrb[23].mxu1  ;;  %v1540_v39 = vld [vmem:[#allocation8 + $0xb8] sm:$0xff] }
 0x400   : > { %v868_v45 = vsel %vm486_vm3, %v6794_v40, -inf }
 0x401   : > { %869 = vmax.xlane.f32.xlu1 %v868_v45  ;;  %v847_v48 = vpop.f32.mrb[24].mxu1 }
 0x402   : > { %v6798_v49 = vadd.f32 %v847_v48, %v698_v44  ;;  %v4277_v14 = vpop.f32.mrb[25].mxu1 }
 0x403   : > { %v1541_v14 = vld [vmem:[#allocation8 + $0xc0] sm:$0xff] }
 0x404   : > { %v871_v53 = vsel %vm486_vm3, %v6798_v49, -inf }
 0x405   : > { %872 = vmax.xlane.f32.xlu0 %v871_v53  ;;  %v852_v55 = vpop.f32.mrb[26].mxu1 }
 0x406   : > { %v6802_v6 = vadd.f32 %v852_v55, %v699_v50  ;;  %v4280_v22 = vpop.f32.mrb[27].mxu1 }
 0x408   : > { %v874_v26 = vsel %vm486_vm3, %v6802_v6, -inf }
 0x409   : > { %875 = vmax.xlane.f32.xlu1 %v874_v26  ;;  %v1248_v57 = vpop.f32.mrb[28].mxu1 }
 0x40a   : > { %v6806_v9 = vadd.f32 %v1248_v57, %v1119_v2  ;;  %v4332_v18 = vpop.f32.mrb[29].mxu1  ;;  %v1542_v2 = vld [vmem:[#allocation8 + $0xc8] sm:$0xff] }
 0x40c   : > { %v1282_v3 = vsel %vm486_vm3, %v6806_v9, -inf }
 0x40d   : > { %1283 = vmax.xlane.f32.xlu0 %v1282_v3  ;;  %v1253_v10 = vpop.f32.mrb[30].mxu1  ;;  %v1543_v3 = vld [vmem:[#allocation8 + $0xd0] sm:$0xff] }
 0x40e   : > { %v6810_v59 = vadd.f32 %v1253_v10, %v1120_v54  ;;  %v4335_v60 = vpop.f32.mrb[31].mxu1 }
 0x410   : > { %v1285_v13 = vsel %vm486_vm3, %v6810_v59, -inf }
 0x411   : > { %1286 = vmax.xlane.f32.xlu1 %v1285_v13  ;;  %v1258_v61 = vpop.f32.mrb[32].mxu1 }
 0x412   : > { %v6814_v7 = vadd.f32 %v1258_v61, %v1121_v56  ;;  %v4338_v58 = vpop.f32.mrb[33].mxu1  ;;  %v1544_v61 = vld [vmem:[#allocation8 + $0xd8] sm:$0xff] }
 0x414   : > { %v1288_v20 = vsel %vm486_vm3, %v6814_v7, -inf }
 0x415   : > { %1289 = vmax.xlane.f32.xlu0 %v1288_v20  ;;  %v1263_v16 = vpop.f32.mrb[34].mxu1 }
 0x416   : > { %v6818_v24 = vadd.f32 %v1263_v16, %v1122_v62  ;;  %v4341_v5 = vpop.f32.mrb[35].mxu1 }
 0x417   : > { %v1957_v5 = vld [vmem:[#allocation8 + $0xe0] sm:$0xff] }
 0x418   : > { %v1291_v8 = vsel %vm486_vm3, %v6818_v24, -inf }
 0x419   : > { %1292 = vmax.xlane.f32.xlu1 %v1291_v8  ;;  %v1268_v42 = vpop.f32.mrb[36].mxu1 }
 0x41a   : > { %v6822_v11 = vadd.f32 %v1268_v42, %v1123_v63  ;;  %v4344_v46 = vpop.f32.mrb[37].mxu1 }
 0x41c   : > { %v1294_v4 = vsel %vm486_vm3, %v6822_v11, -inf }
 0x41d   : > { %1295 = vmax.xlane.f32.xlu0 %v1294_v4  ;;  %v1273_v41 = vpop.f32.mrb[38].mxu1 }
 0x41e   : > { %v6826_v47 = vadd.f32 %v1273_v41, %v1124_v12  ;;  %v4347_v15 = vpop.f32.mrb[39].mxu1  ;;  %v1958_v12 = vld [vmem:[#allocation8 + $0xe8] sm:$0xff] }
 0x420   : > { %v1297_v51 = vsel %vm486_vm3, %v6826_v47, -inf }
 0x421   : > { %1298 = vmax.xlane.f32.xlu1 %v1297_v51  ;;  %v1278_v52 = vpop.f32.mrb[40].mxu1  ;;  %v6868_v51 = vpop.permute.xlu0 %5128 }
 0x422   : > { %v6830_v21 = vadd.f32 %v1278_v52, %v1125_v19  ;;  %v4350_v25 = vpop.f32.mrb[41].mxu1  ;;  %v1959_v52 = vld [vmem:[#allocation8 + $0xf0] sm:$0xff] }
 0x424   : > { %v1300_v28 = vsel %vm486_vm3, %v6830_v21, -inf }
 0x425   : > { %1301 = vmax.xlane.f32.xlu0 %v1300_v28  ;;  %v1667_v30 = vpop.f32.mrb[42].mxu1  ;;  %v6872_v28 = vpop.permute.xlu1 %5133 }
 0x426   : > { %v6834_v31 = vadd.f32 %v1667_v30, %v1538_v27  ;;  %v4402_v32 = vpop.f32.mrb[43].mxu1 }
 0x428   : > { %v1701_v34 = vsel %vm486_vm3, %v6834_v31, -inf }
 0x429   : > { %1702 = vmax.xlane.f32.xlu1 %v1701_v34  ;;  %v1672_v36 = vpop.f32.mrb[44].mxu1 }
 0x42a   : > { %v6838_v37 = vadd.f32 %v1672_v36, %v1539_v33  ;;  %v4405_v38 = vpop.f32.mrb[45].mxu1  ;;  %v1960_v33 = vld [vmem:[#allocation8 + $0xf8] sm:$0xff]  ;;  %v6878_v36 = vpop.permute.xlu0 %5138 }
 0x42c   : > { %v1704_v43 = vsel %vm486_vm3, %v6838_v37, -inf }
 0x42d   : > { %1705 = vmax.xlane.f32.xlu0 %v1704_v43  ;;  %v1677_v44 = vpop.f32.mrb[46].mxu1 }
 0x42e   : > { %v6842_v45 = vadd.f32 %v1677_v44, %v1540_v39  ;;  %v4408_v48 = vpop.f32.mrb[47].mxu1  ;;  %v1961_v44 = vld [vmem:[#allocation8 + $0x100] sm:$0xff] }
 0x42f   : > { %v6882_v48 = vpop.permute.xlu1 %1371 }
 0x430   : > { %v1707_v50 = vsel %vm486_vm3, %v6842_v45, -inf }
 0x431   : > { %1708 = vmax.xlane.f32.xlu1 %v1707_v50  ;;  %v1682_v53 = vpop.f32.mrb[48].mxu1 }
 0x432   : > { %v6846_v55 = vadd.f32 %v1682_v53, %v1541_v14  ;;  %v4411_v22 = vpop.f32.mrb[49].mxu1 }
 0x434   : > { %v1710_v26 = vsel %vm486_vm3, %v6846_v55, -inf }
 0x435   : > { %1711 = vmax.xlane.f32.xlu0 %v1710_v26  ;;  %v1687_v57 = vpop.f32.mrb[50].mxu1  ;;  %v1962_v26 = vld [vmem:[#allocation8 + $0x108] sm:$0xff] }
 0x436   : > { %v6850_v18 = vadd.f32 %v1687_v57, %v1542_v2  ;;  %v4414_v54 = vpop.f32.mrb[51].mxu1  ;;  %v6888_v2 = vpop.permute.xlu0 %5143 }
 0x438   : > { %v1713_v10 = vsel %vm486_vm3, %v6850_v18, -inf }
 0x439   : > { %1714 = vmax.xlane.f32.xlu1 %v1713_v10  ;;  %v1692_v60 = vpop.f32.mrb[52].mxu1 }
 0x43a   : > { %v6854_v56 = vadd.f32 %v1692_v60, %v1543_v3  ;;  %v4417_v13 = vpop.f32.mrb[53].mxu1  ;;  %v6892_v3 = vpop.permute.xlu1 %5148 }
 0x43b   : > { %7757 = vst [vmem:[#allocation20_spill] sm:$0xff] %v6892_v3  ;;  %v1963_v13 = vld [vmem:[#allocation8 + $0x110] sm:$0xff] }
 0x43c   : > { %v1716_v58 = vsel %vm486_vm3, %v6854_v56, -inf }
 0x43d   : > { %1717 = vmax.xlane.f32.xlu0 %v1716_v58  ;;  %v1697_v62 = vpop.f32.mrb[54].mxu1  ;;  %v6898_v58 = vpop.permute.xlu0 %5153 }
 0x43e   : > { %v6858_v20 = vadd.f32 %v1697_v62, %v1544_v61  ;;  %v4420_v16 = vpop.f32.mrb[55].mxu1  ;;  %7758 = vst [vmem:[#allocation21_spill] sm:$0xff] %v6898_v58 }
 0x440   : > { %v1719_v63 = vsel %vm486_vm3, %v6858_v20, -inf }
 0x441   : > { %1720 = vmax.xlane.f32.xlu1 %v1719_v63  ;;  %v2086_v8 = vpop.f32.mrb[56].mxu1  ;;  %v2376_v63 = vld [vmem:[#allocation8 + $0x118] sm:$0xff] }
 0x442   : > { %v6862_v42 = vadd.f32 %v2086_v8, %v1957_v5  ;;  %v4472_v46 = vpop.f32.mrb[57].mxu1  ;;  %v6902_v8 = vpop.permute.xlu1 %1790 }
 0x443   : > { %7759 = vst [vmem:[#allocation22_spill] sm:$0xff] %v6902_v8 }
 0x444   : > { %v2120_v4 = vsel %vm486_vm3, %v6862_v42, -inf }
 0x445   : > { %2121 = vmax.xlane.f32.xlu0 %v2120_v4  ;;  %v2091_v41 = vpop.f32.mrb[58].mxu1 }
 0x446   : > { %v6866_v15 = vadd.f32 %v2091_v41, %v1958_v12  ;;  %v4475_v19 = vpop.f32.mrb[59].mxu1 }
 0x447   : > { %v6908_v19 = vpop.permute.xlu0 %5158 }
 0x448   : > { %v2123_v25 = vsel %vm486_vm3, %v6866_v15, -inf  ;;  %7760 = vst [vmem:[#allocation23_spill] sm:$0xff] %v6908_v19 }
 0x449   : > { %2124 = vmax.xlane.f32.xlu0 %v2123_v25  ;;  %v2096_v27 = vpop.f32.mrb[60].mxu1 }
 0x44a   : > { %v6874_v30 = vadd.f32 %v2096_v27, %v1959_v52  ;;  %v4478_v32 = vpop.f32.mrb[61].mxu1  ;;  %v2377_v52 = vld [vmem:[#allocation8 + $0x120] sm:$0xff] }
 0x44b   : > { %v6912_v32 = vpop.permute.xlu1 %5163 }
 0x44c   : > { %v2126_v34 = vsel %vm486_vm3, %v6874_v30, -inf  ;;  %7761 = vst [vmem:[#allocation24_spill] sm:$0xff] %v6912_v32 }
 0x44d   : > { %2127 = vmax.xlane.f32.xlu0 %v2126_v34  ;;  %v2101_v38 = vpop.f32.mrb[62].mxu1 }
 0x44e   : > { %v6880_v39 = vadd.f32 %v2101_v38, %v1960_v33  ;;  %v4481_v43 = vpop.f32.mrb[63].mxu1  ;;  %v2378_v38 = vld [vmem:[#allocation8 + $0x128] sm:$0xff] }
 0x450   : > { %v2129_v14 = vsel %vm486_vm3, %v6880_v39, -inf }
 0x451   : > { %2130 = vmax.xlane.f32.xlu0 %v2129_v14  ;;  %v2106_v50 = vpop.f32.mrb[64].mxu1 }
 0x452   : > { %v6886_v53 = vadd.f32 %v2106_v50, %v1961_v44  ;;  %v4484_v22 = vpop.f32.mrb[65].mxu1  ;;  %v6918_v44 = vpop.permute.xlu0 %5168 }
 0x453   : > { %7762 = vst [vmem:[#allocation25_spill] sm:$0xff] %v6918_v44 }
 0x454   : > { %v2132_v57 = vsel %vm486_vm3, %v6886_v53, -inf }
 0x455   : > { %2133 = vmax.xlane.f32.xlu1 %v2132_v57  ;;  %v2111_v54 = vpop.f32.mrb[66].mxu1  ;;  %v6922_v57 = vpop.permute.xlu1 %2209 }
 0x456   : > { %v6894_v10 = vadd.f32 %v2111_v54, %v1962_v26  ;;  %v4487_v60 = vpop.f32.mrb[67].mxu1  ;;  %v2379_v26 = vld [vmem:[#allocation8 + $0x130] sm:$0xff]  ;;  %7763 = vst [vmem:[#allocation26_spill] sm:$0xff] %v6922_v57 }
 0x458   : > { %v2135_v61 = vsel %vm486_vm3, %v6894_v10, -inf }
 0x459   : > { %2136 = vmax.xlane.f32.xlu0 %v2135_v61  ;;  %v2116_v62 = vpop.f32.mrb[68].mxu1 }
 0x45a   : > { %v6900_v16 = vadd.f32 %v2116_v62, %v1963_v13  ;;  %v4490_v5 = vpop.f32.mrb[69].mxu1  ;;  %v6928_v62 = vpop.permute.xlu0 %5173 }
 0x45b   : > { %7764 = vst [vmem:[#allocation27_spill] sm:$0xff] %v6928_v62  ;;  %v2380_v5 = vld [vmem:[#allocation8 + $0x138] sm:$0xff] }
 0x45c   : > { %v2138_v46 = vsel %vm486_vm3, %v6900_v16, -inf }
 0x45d   : > { %2139 = vmax.xlane.f32.xlu1 %v2138_v46  ;;  %v2505_v12 = vpop.f32.mrb[70].mxu1 }
 0x45e   : > { %v6906_v4 = vadd.f32 %v2505_v12, %v2376_v63  ;;  %v4542_v41 = vpop.f32.mrb[71].mxu1  ;;  %v6932_v12 = vpop.permute.xlu1 %5178 }
 0x45f   : > { %7765 = vst [vmem:[#allocation28_spill] sm:$0xff] %v6932_v12 }
 0x460   : > { %v2539_v25 = vsel %vm486_vm3, %v6906_v4, -inf }
 0x461   : > { %2540 = vmax.xlane.f32.xlu1 %v2539_v25  ;;  %v2510_v27 = vpop.f32.mrb[72].mxu1  ;;  %v2381_v25 = vld [vmem:[#allocation8 + $0x140] sm:$0xff] }
 0x462   : > { %v6914_v33 = vadd.f32 %v2510_v27, %v2377_v52  ;;  %v4545_v34 = vpop.f32.mrb[73].mxu1 }
 0x463   : > { %v6938_v34 = vpop.permute.xlu0 %5183 }
 0x464   : > { %v2542_v43 = vsel %vm486_vm3, %v6914_v33, -inf  ;;  %7766 = vst [vmem:[#allocation29_spill] sm:$0xff] %v6938_v34 }
 0x465   : > { %2543 = vmax.xlane.f32.xlu1 %v2542_v43  ;;  %v2515_v14 = vpop.f32.mrb[74].mxu1 }
 0x466   : > { %v6920_v50 = vadd.f32 %v2515_v14, %v2378_v38  ;;  %v4548_v22 = vpop.f32.mrb[75].mxu1 }
 0x467   : > { %v2382_v22 = vld [vmem:[#allocation8 + $0x148] sm:$0xff] }
 0x468   : > { %v2545_v54 = vsel %vm486_vm3, %v6920_v50, -inf }
 0x469   : > { %2546 = vmax.xlane.f32.xlu0 %v2545_v54  ;;  %v2520_v60 = vpop.f32.mrb[76].mxu1 }
 0x46a   : > { %v6926_v13 = vadd.f32 %v2520_v60, %v2379_v26  ;;  %v4551_v61 = vpop.f32.mrb[77].mxu1  ;;  %v6942_v26 = vpop.permute.xlu1 %5188 }
 0x46b   : > { %7767 = vst [vmem:[#allocation30_spill] sm:$0xff] %v6942_v26 }
 0x46c   : > { %v2548_v63 = vsel %vm486_vm3, %v6926_v13, -inf }
 0x46d   : > { %2549 = vmax.xlane.f32.xlu0 %v2548_v63  ;;  %v2525_v46 = vpop.f32.mrb[78].mxu1  ;;  %v6948_v63 = vpop.permute.xlu0 %2628 }
 0x46e   : > { %v6934_v41 = vadd.f32 %v2525_v46, %v2380_v5  ;;  %v4554_v52 = vpop.f32.mrb[79].mxu1  ;;  %7768 = vst [vmem:[#allocation31_spill] sm:$0xff] %v6948_v63  ;;  %v2795_v46 = vld [vmem:[#allocation8 + $0x150] sm:$0xff]  ;;  %v2797_v63 = vld [vmem:[#allocation8 + $0x160] sm:$0xff] }
 0x470   : > { %v2551_v27 = vsel %vm486_vm3, %v6934_v41, -inf }
 0x471   : > { %2552 = vmax.xlane.f32.xlu1 %v2551_v27  ;;  %v2530_v38 = vpop.f32.mrb[80].mxu1  ;;  %v6952_v27 = vpop.permute.xlu1 %5193 }
 0x472   : > { %v6940_v43 = vadd.f32 %v2530_v38, %v2381_v25  ;;  %v4557_v14 = vpop.f32.mrb[81].mxu1  ;;  %7769 = vst [vmem:[#allocation32_spill] sm:$0xff] %v6952_v27 }
 0x474   : > { %v2554_v54 = vsel %vm486_vm3, %v6940_v43, -inf }
 0x475   : > { %2555 = vmax.xlane.f32.xlu0 %v2554_v54  ;;  %v2535_v60 = vpop.f32.mrb[82].mxu1 }
 0x476   : > { %v6946_v61 = vadd.f32 %v2535_v60, %v2382_v22  ;;  %v4560_v5 = vpop.f32.mrb[83].mxu1  ;;  %v6958_v22 = vpop.permute.xlu0 %5198 }
 0x477   : > { %7770 = vst [vmem:[#allocation33_spill] sm:$0xff] %v6958_v22 }
 0x478   : > { %v2557_v52 = vsel %vm486_vm3, %v6946_v61, -inf }
 0x479   : > { %2558 = vmax.xlane.f32.xlu1 %v2557_v52  ;;  %v2924_v25 = vpop.f32.mrb[84].mxu1 }
 0x47a   : > { %v6954_v38 = vadd.f32 %v2924_v25, %v2795_v46  ;;  %v4612_v14 = vpop.f32.mrb[85].mxu1 }
 0x47c   : > { %v2958_v54 = vsel %vm486_vm3, %v6954_v38, -inf }
 0x47d   : > { %2959 = vmax.xlane.f32.xlu1 %v2958_v54  ;;  %v2929_v60 = vpop.f32.mrb[86].mxu1 }
 0x47e   : > { %v6960_v5 = vadd.f32 %v2929_v60, %v2796_v0  ;;  %v858_v1 = vpop.xlane.xlu1 %857  ;;  %v4615_v26 = vpop.f32.mrb[87].mxu1  ;;  %v2798_v0 = vld [vmem:[#allocation8 + $0x168] sm:$0xff] }
 0x47f   : > { %v877_v52 = vsub.f32 %v6778_v17, %v858_v1 }
 0x480   : > { %v2961_v46 = vsel %vm486_vm3, %v6960_v5, -inf }
 0x481   : > { %v884_v25 = vmul.f32 1.442695, %v877_v52  ;;  %2962 = vmax.xlane.f32.xlu1 %v2961_v46  ;;  %v2934_v14 = vpop.f32.mrb[88].mxu1  ;;  %v2799_v46 = vld [vmem:[#allocation8 + $0x170] sm:$0xff] }
 0x482   : > { %v6965_v27 = vadd.f32 %v2934_v14, %v2797_v63  ;;  %v861_v34 = vpop.xlane.xlu0 %860  ;;  %v4618_v12 = vpop.f32.mrb[89].mxu1 }
 0x483   : > { %5245 = vpow2.f32 %v884_v25  ;;  %v878_v54 = vsub.f32 %v6782_v23, %v861_v34 }
 0x484   : > { %v2964_v26 = vsel %vm486_vm3, %v6965_v27, -inf }
 0x485   : > { %v886_v60 = vmul.f32 1.442695, %v878_v54  ;;  %2965 = vmax.xlane.f32.xlu0 %v2964_v26  ;;  %v2939_v1 = vpop.f32.mrb[90].mxu1  ;;  %v2800_v54 = vld [vmem:[#allocation8 + $0x178] sm:$0xff] }
 0x486   : > { %v6970_v17 = vadd.f32 %v2939_v1, %v2798_v0  ;;  %v864_v22 = vpop.xlane.xlu0 %863  ;;  %v4621_v52 = vpop.f32.mrb[91].mxu1 }
 0x487   : > { %5247 = vpow2.f32 %v886_v60  ;;  %v879_v63 = vsub.f32 %v6786_v29, %v864_v22 }
 0x488   : > { %v2967_v12 = vsel %vm486_vm3, %v6970_v17, -inf }
 0x489   : > { %2968 = vmax.xlane.f32.xlu0 %v2967_v12  ;;  %v2944_v23 = vpop.f32.mrb[92].mxu1  ;;  %v888_v14 = vmul.f32 1.442695, %v879_v63 }
 0x48a   : > { %v6975_v34 = vadd.f32 %v2944_v23, %v2799_v46  ;;  %v4624_v25 = vpop.f32.mrb[93].mxu1  ;;  %v867_v26 = vpop.xlane.xlu0 %866  ;;  %v2801_v23 = vld [vmem:[#allocation8 + $0x180] sm:$0xff] }
 0x48b   : > { %5249 = vpow2.f32 %v888_v14  ;;  %v880_v52 = vsub.f32 %v6790_v35, %v867_v26 }
 0x48c   : > { %v2970_v0 = vsel %vm486_vm3, %v6975_v34, -inf }
 0x48d   : > { %v6979_v1 = vpop.eup %5245  ;;  %2971 = vmax.xlane.f32.xlu1 %v2970_v0  ;;  %v2949_v60 = vpop.f32.mrb[94].mxu1  ;;  %v890_v62 = vmul.f32 1.442695, %v880_v52  ;;  %v3214_v52 = vld [vmem:[#allocation8 + $0x188] sm:$0xff] }
 0x48e   : > { %v6981_v29 = vadd.f32 %v2949_v60, %v2800_v54  ;;  %v4627_v22 = vpop.f32.mrb[95].mxu1  ;;  %v898_v46 = vsel %vm486_vm3, %v6979_v1, 0.0  ;;  %v870_v54 = vpop.xlane.xlu1 %869 }
 0x48f   : > { %v881_v26 = vsub.f32 %v6794_v40, %v870_v54  ;;  %5251 = vpow2.f32 %v890_v62  ;;  %v3216_v40 = vld [vmem:[#allocation8 + $0x198] sm:$0xff] }
 0x490   : > { %v2973_v63 = vsel %vm486_vm3, %v6981_v29, -inf }
 0x491   : > { %v6988_v12 = vpop.eup %5247  ;;  %899 = vadd.xlane.f32.xlu1 %v898_v46  ;;  %2974 = vmax.xlane.f32.xlu0 %v2973_v63  ;;  %v2954_v25 = vpop.f32.mrb[96].mxu1 }
 0x492   : > { %v4630_v0 = vpop.f32.mrb[97].mxu1  ;;  %v6990_v60 = vadd.f32 %v2954_v25, %v2801_v23  ;;  %v901_v35 = vsel %vm486_vm3, %v6988_v12, 0.0  ;;  %v873_v22 = vpop.xlane.xlu0 %872  ;;  %v892_v25 = vmul.f32 1.442695, %v881_v26 }
 0x494   : > { %v2976_v46 = vsel %vm486_vm3, %v6990_v60, -inf  ;;  %5253 = vpow2.f32 %v892_v25 }
 0x495   : > { %902 = vadd.xlane.f32.xlu1 %v901_v35  ;;  %v3343_v14 = vpop.f32.mrb[98].mxu1  ;;  %v6997_v63 = vpop.eup %5249  ;;  %v882_v35 = vsub.f32 %v6798_v49, %v873_v22  ;;  %v3215_v22 = vld [vmem:[#allocation8 + $0x190] sm:$0xff] }
 0x496   : > { %v4682_v57 = vpop.f32.mrb[99].mxu1  ;;  %v876_v0 = vpop.xlane.xlu1 %875  ;;  %v7001_v54 = vadd.f32 %v3343_v14, %v3214_v52 }
 0x497   : > { %v904_v57 = vsel %vm486_vm3, %v6997_v63, 0.0  ;;  %v894_v3 = vmul.f32 1.442695, %v882_v35 }
 0x499   : > { %2977 = vmax.xlane.f32.xlu1 %v2976_v46  ;;  %v3348_v23 = vpop.f32.mrb[100].mxu1  ;;  %v7013_v14 = vpop.eup %5251 }
 0x49a   : > { %v1284_v44 = vpop.xlane.xlu0 %1283  ;;  %v4685_v32 = vpop.f32.mrb[101].mxu1  ;;  %v7018_v35 = vadd.f32 %v3348_v23, %v3215_v22 }
 0x49b   : > { %v1303_v19 = vsub.f32 %v6806_v9, %v1284_v44  ;;  %v883_v32 = vsub.f32 %v6802_v6, %v876_v0  ;;  %v3217_v9 = vld [vmem:[#allocation8 + $0x1a0] sm:$0xff]  ;;  %v3377_v44 = vsel %vm486_vm3, %v7001_v54, -inf }
 0x49c   : > { %v3380_v23 = vsel %vm486_vm3, %v7018_v35, -inf }
 0x49d   : > { %v1310_v62 = vmul.f32 1.442695, %v1303_v19  ;;  %905 = vadd.xlane.f32.xlu1 %v904_v57  ;;  %v3353_v8 = vpop.f32.mrb[102].mxu1 }
 0x49e   : > { %v7005_v46 = vadd.f32 %v3353_v8, %v3216_v40  ;;  %v1287_v58 = vpop.xlane.xlu1 %1286  ;;  %v4688_v26 = vpop.f32.mrb[103].mxu1  ;;  %v907_v40 = vsel %vm486_vm3, %v7013_v14, 0.0 }
 0x49f   : > { %5255 = vpow2.f32 %v1310_v62  ;;  %v1304_v49 = vsub.f32 %v6810_v59, %v1287_v58  ;;  %v896_v59 = vmul.f32 1.442695, %v883_v32  ;;  %v3219_v32 = vld [vmem:[#allocation8 + $0x1b0] sm:$0xff] }
 0x4a0   : > { %v3383_v19 = vsel %vm486_vm3, %v7005_v46, -inf  ;;  %5257 = vpow2.f32 %v894_v3 }
 0x4a1   : > { %v1312_v8 = vmul.f32 1.442695, %v1304_v49  ;;  %3378 = vmax.xlane.f32.xlu1 %v3377_v44  ;;  %3384 = vmax.xlane.f32.xlu0 %v3383_v19  ;;  %v3358_v52 = vpop.f32.mrb[104].mxu1 }
 0x4a2   : > { %v7015_v25 = vadd.f32 %v3358_v52, %v3217_v9  ;;  %v1290_v6 = vpop.xlane.xlu0 %1289  ;;  %v4691_v0 = vpop.f32.mrb[105].mxu1 }
 0x4a3   : > { %v1305_v58 = vsub.f32 %v6814_v7, %v1290_v6  ;;  %5259 = vpow2.f32 %v1312_v8  ;;  %v7025_v7 = vpop.eup %5253 }
 0x4a4   : > { %v3386_v57 = vsel %vm486_vm3, %v7015_v25, -inf  ;;  %5261 = vpow2.f32 %v896_v59  ;;  %v910_v59 = vsel %vm486_vm3, %v7025_v7, 0.0 }
 0x4a5   : > { %v1314_v62 = vmul.f32 1.442695, %v1305_v58  ;;  %908 = vadd.xlane.f32.xlu1 %v907_v40  ;;  %3387 = vmax.xlane.f32.xlu0 %v3386_v57  ;;  %v3363_v26 = vpop.f32.mrb[106].mxu1 }
 0x4a6   : > { %v1293_v49 = vpop.xlane.xlu1 %1292  ;;  %v4694_v9 = vpop.f32.mrb[107].mxu1 }
 0x4a7   : > { %v1306_v3 = vsub.f32 %v6818_v24, %v1293_v49  ;;  %5263 = vpow2.f32 %v1314_v62 }
 0x4a9   : > { %v7029_v44 = vpop.eup %5255  ;;  %v1316_v19 = vmul.f32 1.442695, %v1306_v3  ;;  %3381 = vmax.xlane.f32.xlu1 %v3380_v23  ;;  %v3368_v22 = vpop.f32.mrb[108].mxu1 }
 0x4aa   : > { %v1296_v8 = vpop.xlane.xlu0 %1295  ;;  %v1324_v52 = vsel %vm486_vm3, %v7029_v44, 0.0  ;;  %v7033_v6 = vadd.f32 %v3368_v22, %v3219_v32  ;;  %v4697_v0 = vpop.f32.mrb[109].mxu1  ;;  %v3218_v22 = vld [vmem:[#allocation8 + $0x1a8] sm:$0xff] }
 0x4ab   : > { %v1307_v24 = vsub.f32 %v6822_v11, %v1296_v8  ;;  %1325 = vadd.xlane.f32.xlu0 %v1324_v52  ;;  %v7040_v40 = vpop.eup %5257  ;;  %5265 = vpow2.f32 %v1316_v19 }
 0x4ac   : > { %v3392_v58 = vsel %vm486_vm3, %v7033_v6, -inf  ;;  %v913_v11 = vsel %vm486_vm3, %v7040_v40, 0.0 }
 0x4ad   : > { %911 = vadd.xlane.f32.xlu1 %v910_v59  ;;  %v3373_v57 = vpop.f32.mrb[110].mxu1  ;;  %v7042_v9 = vpop.eup %5259  ;;  %v1318_v3 = vmul.f32 1.442695, %v1307_v24  ;;  %v7054_v59 = vadd.f32 %v3363_v26, %v3218_v22 }
 0x4ae   : > { %v1299_v62 = vpop.xlane.xlu1 %1298  ;;  %v4700_v49 = vpop.f32.mrb[111].mxu1  ;;  %7771 = vst [vmem:[#allocation34_spill] sm:$0xff] %v7042_v9  ;;  %v1327_v19 = vsel %vm486_vm3, %v7042_v9, 0.0 }
 0x4af   : > { %v1308_v32 = vsub.f32 %v6826_v47, %v1299_v62  ;;  %3393 = vmax.xlane.f32.xlu0 %v3392_v58  ;;  %v7047_v23 = vpop.eup %5261  ;;  %5267 = vpow2.f32 %v1318_v3  ;;  %v3220_v47 = vld [vmem:[#allocation8 + $0x1b8] sm:$0xff] }
 0x4b0   : > { %v916_v58 = vsel %vm486_vm3, %v7047_v23, 0.0  ;;  %v7060_v49 = vadd.f32 %v3373_v57, %v3220_v47 }
 0x4b1   : > { %914 = vadd.xlane.f32.xlu1 %v913_v11  ;;  %v7051_v52 = vpop.eup %5263  ;;  %v1320_v0 = vmul.f32 1.442695, %v1308_v32 }
 0x4b2   : > { %v1302_v8 = vpop.xlane.xlu0 %1301  ;;  %7772 = vst [vmem:[#allocation35_spill] sm:$0xff] %v7051_v52  ;;  %v1330_v62 = vsel %vm486_vm3, %v7051_v52, 0.0  ;;  %v3395_v32 = vsel %vm486_vm3, %v7060_v49, -inf }
 0x4b3   : > { %v1309_v24 = vsub.f32 %v6830_v21, %v1302_v8  ;;  %1328 = vadd.xlane.f32.xlu0 %v1327_v19  ;;  %5269 = vpow2.f32 %v1320_v0  ;;  %v3389_v21 = vsel %vm486_vm3, %v7054_v59, -inf }
 0x4b5   : > { %917 = vadd.xlane.f32.xlu1 %v916_v58  ;;  %v7062_v11 = vpop.eup %5265  ;;  %v1322_v3 = vmul.f32 1.442695, %v1309_v24 }
 0x4b6   : > { %7773 = vst [vmem:[#allocation36_spill] sm:$0xff] %v7062_v11  ;;  %v1333_v26 = vsel %vm486_vm3, %v7062_v11, 0.0  ;;  %v1703_v57 = vpop.xlane.xlu1 %1702 }
 0x4b7   : > { %1331 = vadd.xlane.f32.xlu0 %v1330_v62  ;;  %5271 = vpow2.f32 %v1322_v3 }
 0x4b9   : > { %3390 = vmax.xlane.f32.xlu1 %v3389_v21  ;;  %v7070_v22 = vpop.eup %5267 }
 0x4ba   : > { %7774 = vst [vmem:[#allocation37_spill] sm:$0xff] %v7070_v22  ;;  %v1336_v8 = vsel %vm486_vm3, %v7070_v22, 0.0  ;;  %v1706_v0 = vpop.xlane.xlu0 %1705 }
 0x4bb   : > { %1334 = vadd.xlane.f32.xlu0 %v1333_v26 }
 0x4bd   : > { %3396 = vmax.xlane.f32.xlu1 %v3395_v32  ;;  %v7074_v19 = vpop.eup %5269 }
 0x4be   : > { %7775 = vst [vmem:[#allocation38_spill] sm:$0xff] %v7074_v19  ;;  %v1709_v24 = vpop.xlane.xlu1 %1708  ;;  %v1339_v47 = vsel %vm486_vm3, %v7074_v19, 0.0 }
 0x4c1   : > { %1337 = vadd.xlane.f32.xlu1 %v1336_v8  ;;  %v7078_v58 = vpop.eup %5271 }
 0x4c2   : > { %v1712_v62 = vpop.xlane.xlu0 %1711  ;;  %v1342_v26 = vsel %vm486_vm3, %v7078_v58, 0.0 }
 0x4c5   : > { %1340 = vadd.xlane.f32.xlu1 %v1339_v47  ;;  %v7086_v47 = vld [vmem:[%s5946_s1 + $0x30] sm:$0xff] }
 0x4c6   : > { %v1715_v3 = vpop.xlane.xlu1 %1714 }
 0x4c7   : > { %v1726_v21 = vsub.f32 %v6850_v18, %v1715_v3 }
 0x4c9   : > { %v1737_v32 = vmul.f32 1.442695, %v1726_v21  ;;  %1343 = vadd.xlane.f32.xlu1 %v1342_v26 }
 0x4ca   : > { %v1718_v22 = vpop.xlane.xlu0 %1717 }
 0x4cb   : > { %5273 = vpow2.f32 %v1737_v32  ;;  %v1727_v8 = vsub.f32 %v6854_v56, %v1718_v22  ;;  %v1722_v56 = vsub.f32 %v6834_v31, %v1703_v57  ;;  %v1724_v31 = vsub.f32 %v6842_v45, %v1709_v24 }
 0x4cc   : > { %v1725_v32 = vsub.f32 %v6846_v55, %v1712_v62 }
 0x4cd   : > { %v1739_v11 = vmul.f32 1.442695, %v1727_v8  ;;  %v1733_v57 = vmul.f32 1.442695, %v1724_v31 }
 0x4ce   : > { %v1721_v52 = vpop.xlane.xlu1 %1720 }
 0x4cf   : > { %5275 = vpow2.f32 %v1739_v11  ;;  %v1728_v19 = vsub.f32 %v6858_v20, %v1721_v52  ;;  %v1729_v11 = vmul.f32 1.442695, %v1722_v56 }
 0x4d1   : > { %v1741_v9 = vmul.f32 1.442695, %v1728_v19  ;;  %3047 = vrot.lane.b32.xlu0 %v7086_v47, %s5656_s6 }
 0x4d2   : > { %v2122_v19 = vpop.xlane.xlu0 %2121 }
 0x4d3   : > { %5277 = vpow2.f32 %v1741_v9  ;;  %v1723_v9 = vsub.f32 %v6838_v37, %v1706_v0  ;;  %v2141_v56 = vsub.f32 %v6862_v42, %v2122_v19  ;;  %v5442_v0 = vld [vmem:[%s5946_s1] sm:$0xff] }
 0x4d4   : > { %5279 = vpow2.f32 %v1729_v11 }
 0x4d5   : > { %v7090_v18 = vpop.eup %5273  ;;  %v1731_v26 = vmul.f32 1.442695, %v1723_v9  ;;  %v2148_v11 = vmul.f32 1.442695, %v2141_v56 }
 0x4d6   : > { %v1755_v3 = vsel %vm486_vm3, %v7090_v18, 0.0  ;;  %v2125_v8 = vpop.xlane.xlu0 %2124 }
 0x4d7   : > { %1756 = vadd.xlane.f32.xlu1 %v1755_v3  ;;  %5281 = vpow2.f32 %v1731_v26  ;;  %v1735_v3 = vmul.f32 1.442695, %v1725_v32  ;;  %v2142_v9 = vsub.f32 %v6866_v15, %v2125_v8 }
 0x4d8   : > { %5283 = vpow2.f32 %v1733_v57 }
 0x4d9   : > { %v7094_v21 = vpop.eup %5275  ;;  %5285 = vpow2.f32 %v1735_v3  ;;  %v2150_v42 = vmul.f32 1.442695, %v2142_v9 }
 0x4da   : > { %v1758_v20 = vsel %vm486_vm3, %v7094_v21, 0.0  ;;  %5287 = vpow2.f32 %v2148_v11 }
 0x4db   : > { %1759 = vadd.xlane.f32.xlu1 %v1758_v20  ;;  %v5443_v20 = vld [vmem:[%s5946_s1 + $0x8] sm:$0xff]  ;;  %5289 = vpow2.f32 %v2150_v42 }
 0x4dd   : > { %v7099_v52 = vpop.eup %5277 }
 0x4de   : > { %7776 = vst [vmem:[#allocation39_spill] sm:$0xff] %v7099_v52  ;;  %v1761_v22 = vsel %vm486_vm3, %v7099_v52, 0.0  ;;  %v7107_v37 = vpop.eup %5279  ;;  %v5202_v52 = vpack.i.bf16 %v5443_v20, %v5442_v0 }
 0x4df   : > { %1762 = vadd.xlane.f32.xlu1 %v1761_v22  ;;  %v2128_v22 = vpop.xlane.xlu0 %2127  ;;  %v1743_v24 = vsel %vm486_vm3, %v7107_v37, 0.0 }
 0x4e0   : > { %v2143_v62 = vsub.f32 %v6874_v30, %v2128_v22 }
 0x4e1   : > { %v7114_v55 = vpop.eup %5281 }
 0x4e2   : > { %v2134_v45 = vpop.xlane.xlu1 %2133  ;;  %v1746_v31 = vsel %vm486_vm3, %v7114_v55, 0.0  ;;  %v7120_v57 = vpop.eup %5283  ;;  %v2152_v15 = vmul.f32 1.442695, %v2143_v62 }
 0x4e3   : > { %v2131_v19 = vpop.xlane.xlu0 %2130  ;;  %v7125_v3 = vpop.eup %5285 }
 0x4e4   : > { %v2144_v32 = vsub.f32 %v6880_v39, %v2131_v19  ;;  %5291 = vpow2.f32 %v2152_v15  ;;  %v1752_v20 = vsel %vm486_vm3, %v7125_v3, 0.0  ;;  %v7130_v22 = vpop.eup %5287  ;;  %v2145_v39 = vsub.f32 %v6886_v53, %v2134_v45 }
 0x4e5   : > { %v2162_v62 = vsel %vm486_vm3, %v7130_v22, 0.0  ;;  %v7136_v19 = vpop.eup %5289 }
 0x4e6   : > { %v2154_v56 = vmul.f32 1.442695, %v2144_v32 }
 0x4e7   : > { %v2137_v8 = vpop.xlane.xlu0 %2136 }
 0x4e8   : > { %v2146_v0 = vsub.f32 %v6894_v10, %v2137_v8  ;;  %5293 = vpow2.f32 %v2154_v56  ;;  %v2156_v10 = vmul.f32 1.442695, %v2145_v39  ;;  %v2165_v8 = vsel %vm486_vm3, %v7136_v19, 0.0 }
 0x4ea   : > { %v2140_v26 = vpop.xlane.xlu1 %2139  ;;  %v2158_v9 = vmul.f32 1.442695, %v2146_v0 }
 0x4ec   : > { %5295 = vpow2.f32 %v2158_v9 }
 0x4ed   : > { %5297 = vpow2.f32 %v2156_v10 }
 0x4ee   : > { %v2541_v30 = vpop.xlane.xlu1 %2540 }
 0x4f0   : > { %1744 = vadd.xlane.f32.xlu0 %v1743_v24  ;;  %5203 = vrot.lane.b32.xlu1 %v5202_v52, %s5657_s25  ;;  %v1749_v52 = vsel %vm486_vm3, %v7120_v57, 0.0  ;;  %v2560_v24 = vsub.f32 %v6906_v4, %v2541_v30  ;;  %v7142_v4 = vpop.eup %5291 }
 0x4f2   : > { %v2544_v42 = vpop.xlane.xlu1 %2543  ;;  %v2567_v15 = vmul.f32 1.442695, %v2560_v24  ;;  %v7148_v0 = vpop.eup %5293 }
 0x4f3   : > { %v2561_v30 = vsub.f32 %v6914_v33, %v2544_v42  ;;  %v2171_v24 = vsel %vm486_vm3, %v7148_v0, 0.0 }
 0x4f4   : > { %1747 = vadd.xlane.f32.xlu0 %v1746_v31  ;;  %v2147_v31 = vsub.f32 %v6900_v16, %v2140_v26  ;;  %5299 = vpow2.f32 %v2567_v15 }
 0x4f6   : > { %v2547_v11 = vpop.xlane.xlu0 %2546 }
 0x4f7   : > { %v2562_v32 = vsub.f32 %v6920_v50, %v2547_v11  ;;  %v2168_v50 = vsel %vm486_vm3, %v7142_v4, 0.0 }
 0x4f8   : > { %1750 = vadd.xlane.f32.xlu0 %v1749_v52  ;;  %v2160_v52 = vmul.f32 1.442695, %v2147_v31 }
 0x4f9   : > { %v2571_v56 = vmul.f32 1.442695, %v2562_v32 }
 0x4fa   : > { %v2550_v53 = vpop.xlane.xlu0 %2549  ;;  %5301 = vpow2.f32 %v2160_v52 }
 0x4fb   : > { %v2563_v16 = vsub.f32 %v6926_v13, %v2550_v53  ;;  %5303 = vpow2.f32 %v2571_v56  ;;  %v7154_v13 = vpop.eup %5295 }
 0x4fc   : > { %1753 = vadd.xlane.f32.xlu0 %v1752_v20  ;;  %v2569_v20 = vmul.f32 1.442695, %v2561_v30  ;;  %v7157_v15 = vpop.eup %5297 }
 0x4fd   : > { %v2573_v11 = vmul.f32 1.442695, %v2563_v16  ;;  %v2174_v52 = vsel %vm486_vm3, %v7157_v15, 0.0 }
 0x4fe   : > { %v2553_v45 = vpop.xlane.xlu1 %2552  ;;  %5305 = vpow2.f32 %v2569_v20 }
 0x4ff   : > { %v2564_v39 = vsub.f32 %v6934_v41, %v2553_v45  ;;  %5307 = vpow2.f32 %v2573_v11  ;;  %v2177_v41 = vsel %vm486_vm3, %v7154_v13, 0.0 }
 0x500   : > { %2163 = vadd.xlane.f32.xlu0 %v2162_v62 }
 0x501   : > { %v2575_v42 = vmul.f32 1.442695, %v2564_v39 }
 0x502   : > { %v2556_v33 = vpop.xlane.xlu0 %2555 }
 0x503   : > { %v2565_v10 = vsub.f32 %v6940_v43, %v2556_v33  ;;  %5309 = vpow2.f32 %v2575_v42 }
 0x504   : > { %2166 = vadd.xlane.f32.xlu0 %v2165_v8 }
 0x505   : > { %v2577_v32 = vmul.f32 1.442695, %v2565_v10 }
 0x506   : > { %v2559_v26 = vpop.xlane.xlu1 %2558 }
 0x507   : > { %v2566_v9 = vsub.f32 %v6946_v61, %v2559_v26  ;;  %v7161_v61 = vpop.eup %5299 }
 0x508   : > { %2169 = vadd.xlane.f32.xlu0 %v2168_v50  ;;  %v7164_v45 = vpop.eup %5301  ;;  %v2581_v43 = vsel %vm486_vm3, %v7161_v61, 0.0 }
 0x509   : > { %v2579_v31 = vmul.f32 1.442695, %v2566_v9  ;;  %v7170_v30 = vpop.eup %5303  ;;  %v2180_v20 = vsel %vm486_vm3, %v7164_v45, 0.0 }
 0x50a   : > { %v2960_v62 = vpop.xlane.xlu1 %2959  ;;  %v7173_v50 = vpop.eup %5305 }
 0x50b   : > { %5311 = vpow2.f32 %v2579_v31  ;;  %v2979_v53 = vsub.f32 %v6954_v38, %v2960_v62  ;;  %v2587_v38 = vsel %vm486_vm3, %v7170_v30, 0.0  ;;  %v7179_v39 = vpop.eup %5307  ;;  %v2584_v62 = vsel %vm486_vm3, %v7173_v50, 0.0 }
 0x50c   : > { %2172 = vadd.xlane.f32.xlu0 %v2171_v24  ;;  %5313 = vpow2.f32 %v2577_v32  ;;  %v2590_v42 = vsel %vm486_vm3, %v7179_v39, 0.0 }
 0x50d   : > { %v2986_v16 = vmul.f32 1.442695, %v2979_v53  ;;  %v7184_v24 = vpop.eup %5309 }
 0x50e   : > { %v2963_v8 = vpop.xlane.xlu1 %2962 }
 0x50f   : > { %v2980_v26 = vsub.f32 %v6960_v5, %v2963_v8  ;;  %5315 = vpow2.f32 %v2986_v16  ;;  %v2593_v8 = vsel %vm486_vm3, %v7184_v24, 0.0 }
 0x510   : > { %2178 = vadd.xlane.f32.xlu0 %v2177_v41 }
 0x511   : > { %v2988_v11 = vmul.f32 1.442695, %v2980_v26 }
 0x512   : > { %v2966_v56 = vpop.xlane.xlu0 %2965 }
 0x513   : > { %v2981_v9 = vsub.f32 %v6965_v27, %v2966_v56  ;;  %5317 = vpow2.f32 %v2988_v11 }
 0x514   : > { %2582 = vadd.xlane.f32.xlu0 %v2581_v43  ;;  %2175 = vadd.xlane.f32.xlu1 %v2174_v52 }
 0x515   : > { %v7190_v10 = vpop.eup %5311  ;;  %v2990_v31 = vmul.f32 1.442695, %v2981_v9 }
 0x516   : > { %v2969_v5 = vpop.xlane.xlu0 %2968  ;;  %v2599_v53 = vsel %vm486_vm3, %v7190_v10, 0.0  ;;  %v7197_v43 = vpop.eup %5313 }
 0x517   : > { %v2982_v41 = vsub.f32 %v6970_v17, %v2969_v5  ;;  %v2596_v17 = vsel %vm486_vm3, %v7197_v43, 0.0 }
 0x518   : > { %2588 = vadd.xlane.f32.xlu0 %v2587_v38  ;;  %2181 = vadd.xlane.f32.xlu1 %v2180_v20 }
 0x519   : > { %v2992_v52 = vmul.f32 1.442695, %v2982_v41  ;;  %v7202_v26 = vpop.eup %5315 }
 0x51a   : > { %v7182_v33 = vpop.xlane.xlu1 %2971  ;;  %v3000_v9 = vsel %vm486_vm3, %v7202_v26, 0.0 }
 0x51c   : > { %2591 = vadd.xlane.f32.xlu0 %v2590_v42  ;;  %2585 = vadd.xlane.f32.xlu1 %v2584_v62  ;;  %v5130_v42 = vunpack.i.l.bf16 %v6868_v51 }
 0x51d   : > { %v7207_v5 = vpop.eup %5317 }
 0x51e   : > { %v900_v27 = vpop.xlane.xlu1 %899  ;;  %v2975_v32 = vpop.xlane.xlu0 %2974 }
 0x51f   : > { %5319 = vrcp.f32 %v900_v27  ;;  %v2984_v56 = vsub.f32 %v6981_v29, %v2975_v32  ;;  %v5131_v29 = vunpack.i.h.bf16 %v6868_v51  ;;  %v3003_v32 = vsel %vm486_vm3, %v7207_v5, 0.0 }
 0x520   : > { %2600 = vadd.xlane.f32.xlu0 %v2599_v53  ;;  %2594 = vadd.xlane.f32.xlu1 %v2593_v8  ;;  %5321 = vpow2.f32 %v2990_v31  ;;  %v5136_v53 = vunpack.i.h.bf16 %v6872_v28  ;;  %v5135_v8 = vunpack.i.l.bf16 %v6872_v28 }
 0x521   : > { %v2996_v38 = vmul.f32 1.442695, %v2984_v56 }
 0x522   : > { %v903_v16 = vpop.xlane.xlu1 %902 }
 0x523   : > { %5323 = vrcp.f32 %v903_v16 }
 0x524   : > { %2597 = vadd.xlane.f32.xlu1 %v2596_v17  ;;  %5325 = vpow2.f32 %v2992_v52  ;;  %v4791_v52 = vpack.c.bf16 %v5131_v29, %v5130_v42  ;;  %v4794_v29 = vpack.c.bf16 %v5136_v53, %v5135_v8  ;;  %v5141_v42 = vunpack.i.h.bf16 %v6878_v36 }
 0x525   : > { %5327 = vpow2.f32 %v2996_v38 }
 0x526   : > { %v2978_v20 = vpop.xlane.xlu1 %2977 }
 0x527   : > { %v2985_v11 = vsub.f32 %v6990_v60, %v2978_v20  ;;  %v7778_v20 = vmov 0.0|0.0  }
 0x528   : > { %3001 = vadd.xlane.f32.xlu1 %v3000_v9 }
 0x529   : > { %v5320_v62 = vpop.eup %5319  ;;  %v2998_v31 = vmul.f32 1.442695, %v2985_v11 }
 0x52a   : > { %v906_v41 = vpop.xlane.xlu1 %905  ;;  %v926_v27 = vmul.f32 %v5320_v62, %v6979_v1  ;;  %v7214_v60 = vpop.eup %5321  ;;  %v7777_v1 = vmov 0.0   ;;  %v5140_v62 = vunpack.i.l.bf16 %v6878_v36 }
 0x52b   : > { %5329 = vrcp.f32 %v906_v41  ;;  %v3006_v11 = vsel %vm486_vm3, %v7214_v60, 0.0 }
 0x52c   : > { %3004 = vadd.xlane.f32.xlu1 %v3003_v32  ;;  %4296 = vmatmul.mubr.msk.f32.vlgmr.msra.gmra.mrb[14].mxu0 %vm486_vm3, %v926_v27  ;;  %5331 = vpow2.f32 %v2998_v31  ;;  %v5444_v27 = vld [vmem:[%s5946_s1 + $0x10] sm:$0xff] }
 0x52d   : > { %v5324_v51 = vpop.eup %5323  ;;  %4792 = vmatpush3.bf16.msra.mxu0 %v4791_v52  ;;  %4298 = vmatprep.mubr.msk.f32.mxu0 %vm5649_vm0, %v7777_v1  ;;  %v4797_v52 = vpack.c.bf16 %v5141_v42, %v5140_v62 }
 0x52e   : > { %v3379_v56 = vpop.xlane.xlu1 %3378  ;;  %v3385_v16 = vpop.xlane.xlu0 %3384  ;;  %4793 = vmatprep.subr.bf16.mxu0 %v7778_v20  ;;  %v927_v28 = vmul.f32 %v5324_v51, %v6988_v12  ;;  %v5445_v12 = vld [vmem:[%s5946_s1 + $0x18] sm:$0xff] }
 0x52f   : > { %v3398_v17 = vsub.f32 %v7001_v54, %v3379_v56  ;;  %v3400_v38 = vsub.f32 %v7005_v46, %v3385_v16  ;;  %v7227_v9 = vpop.eup %5325  ;;  %v5207_v32 = vpack.i.bf16 %v5445_v12, %v5444_v27 }
 0x530   : > { %3007 = vadd.xlane.f32.xlu1 %v3006_v11  ;;  %4299 = vmatmul.mubr.msk.f32.gmra.mrb[16].mxu0 %vm486_vm3, %v927_v28  ;;  %v3009_v36 = vsel %vm486_vm3, %v7227_v9, 0.0  ;;  %v7240_v8 = vpop.eup %5327 }
 0x531   : > { %v3405_v54 = vmul.f32 1.442695, %v3398_v17  ;;  %v3409_v46 = vmul.f32 1.442695, %v3400_v38  ;;  %4795 = vmatpush3.bf16.msra.mxu0 %v4794_v29  ;;  %4301 = vmatprep.mubr.msk.f32.mxu0 %vm5649_vm0, %v7777_v1  ;;  %v3015_v17 = vsel %vm486_vm3, %v7240_v8, 0.0 }
 0x532   : > { %v909_v31 = vpop.xlane.xlu1 %908  ;;  %v3388_v41 = vpop.xlane.xlu0 %3387  ;;  %4796 = vmatprep.subr.bf16.mxu0 %v7778_v20 }
 0x533   : > { %5333 = vpow2.f32 %v3405_v54  ;;  %v3401_v53 = vsub.f32 %v7015_v25, %v3388_v41 }
 0x534   : > { %3010 = vadd.xlane.f32.xlu1 %v3009_v36  ;;  %5335 = vrcp.f32 %v909_v31 }
 0x535   : > { %v5330_v51 = vpop.eup %5329  ;;  %5337 = vpow2.f32 %v3409_v46  ;;  %v3411_v56 = vmul.f32 1.442695, %v3401_v53  ;;  %4798 = vmatpush3.bf16.msra.mxu0 %v4797_v52 }
 0x536   : > { %v3382_v16 = vpop.xlane.xlu1 %3381  ;;  %5208 = vrot.lane.b32.xlu0 %v5207_v32, %s5657_s25  ;;  %4363 = vmatprep.subr.mxu0 %v7777_v1  ;;  %v928_v25 = vmul.f32 %v5330_v51, %v6997_v63  ;;  %v7247_v38 = vpop.eup %5331 }
 0x537   : > { %5339 = vpow2.f32 %v3411_v56  ;;  %v3018_v29 = vsel %vm486_vm3, %v7247_v38, 0.0  ;;  %v3399_v27 = vsub.f32 %v7018_v35, %v3382_v16 }
 0x538   : > { %v1326_v28 = vpop.xlane.xlu0 %1325  ;;  %3016 = vadd.xlane.f32.xlu1 %v3015_v17  ;;  %4302 = vmatmul.mubr.msk.f32.gmra.mrb[18].mxu0 %vm486_vm3, %v928_v25 }
 0x539   : > { %4364 = vmatpush3.msra.mxu0 %v6882_v48  ;;  %4304 = vmatprep.mubr.msk.f32.mxu0 %vm5649_vm0, %v7777_v1  ;;  %v2983_v48 = vsub.f32 %v6975_v34, %v7182_v33  ;;  %v3407_v33 = vmul.f32 1.442695, %v3399_v27 }
 0x53a   : > { %v912_v11 = vpop.xlane.xlu1 %911  ;;  %4811 = vmatprep.subr.bf16.mxu0 %v7778_v20 }
 0x53b   : > { %5341 = vrcp.f32 %v912_v11  ;;  %v2994_v32 = vmul.f32 1.442695, %v2983_v48 }
 0x53c   : > { %3019 = vadd.xlane.f32.xlu1 %v3018_v29  ;;  %v3394_v42 = vpop.xlane.xlu0 %3393 }
 0x53d   : > { %v7256_v63 = vpop.eup %5333 }
 0x53e   : > { %v915_v62 = vpop.xlane.xlu1 %914  ;;  %v3419_v54 = vsel %vm486_vm3, %v7256_v63, 0.0  ;;  %v5336_v46 = vpop.eup %5335 }
 0x53f   : > { %5343 = vrcp.f32 %v915_v62  ;;  %v7262_v31 = vpop.eup %5337  ;;  %v929_v41 = vmul.f32 %v5336_v46, %v7013_v14  ;;  %v3403_v14 = vsub.f32 %v7033_v6, %v3394_v42 }
 0x540   : > { %3420 = vadd.xlane.f32.xlu1 %v3419_v54  ;;  %v1329_v53 = vpop.xlane.xlu0 %1328  ;;  %v3425_v36 = vsel %vm486_vm3, %v7262_v31, 0.0 }
 0x541   : > { %4305 = vmatmul.mubr.msk.f32.gmra.mrb[20].mxu0 %vm486_vm3, %v929_v41  ;;  %v7271_v34 = vpop.eup %5339  ;;  %v3415_v17 = vmul.f32 1.442695, %v3403_v14  ;;  %v5145_v41 = vunpack.i.l.bf16 %v6888_v2 }
 0x542   : > { %v918_v12 = vpop.xlane.xlu1 %917  ;;  %4307 = vmatprep.mubr.msk.f32.mxu0 %vm5649_vm0, %v7777_v1  ;;  %v3428_v16 = vsel %vm486_vm3, %v7271_v34, 0.0 }
 0x543   : > { %5345 = vrcp.f32 %v918_v12 }
 0x544   : > { %3426 = vadd.xlane.f32.xlu1 %v3425_v36  ;;  %5347 = vrcp.f32 %v1326_v28  ;;  %v1332_v11 = vpop.xlane.xlu0 %1331 }
 0x545   : > { %v5342_v52 = vpop.eup %5341  ;;  %5349 = vpow2.f32 %v2994_v32  ;;  %v7779_v32 = vld [vmem:[#allocation20_spill] sm:$0xff] }
 0x546   : > { %v3391_v35 = vpop.xlane.xlu1 %3390  ;;  %v930_v56 = vmul.f32 %v5342_v52, %v7025_v7  ;;  %5351 = vpow2.f32 %v3407_v33  ;;  %v5150_v36 = vunpack.i.l.bf16 %v7779_v32 }
 0x547   : > { %v3402_v51 = vsub.f32 %v7054_v59, %v3391_v35  ;;  %5353 = vrcp.f32 %v1329_v53  ;;  %v5151_v53 = vunpack.i.h.bf16 %v7779_v32  ;;  %v7785_v32 = vld [vmem:[#allocation37_spill] sm:$0xff] }
 0x548   : > { %3429 = vadd.xlane.f32.xlu1 %v3428_v16  ;;  %4308 = vmatmul.mubr.msk.f32.gmra.mrb[22].mxu0 %vm486_vm3, %v930_v56  ;;  %v1335_v54 = vpop.xlane.xlu0 %1334 }
 0x549   : > { %v5344_v25 = vpop.eup %5343  ;;  %v3413_v29 = vmul.f32 1.442695, %v3402_v51  ;;  %4310 = vmatprep.mubr.msk.f32.mxu0 %vm5649_vm0, %v7777_v1  ;;  %v7780_v51 = vld [vmem:[#allocation34_spill] sm:$0xff] }
 0x54a   : > { %v3397_v6 = vpop.xlane.xlu1 %3396  ;;  %v931_v59 = vmul.f32 %v5344_v25, %v7040_v40  ;;  %v5146_v40 = vunpack.i.h.bf16 %v6888_v2  ;;  %v4815_v25 = vpack.c.bf16 %v5151_v53, %v5150_v36 }
 0x54b   : > { %5355 = vpow2.f32 %v3413_v29  ;;  %v3404_v7 = vsub.f32 %v7060_v49, %v3397_v6 }
 0x54c   : > { %5357 = vpow2.f32 %v3415_v17  ;;  %4311 = vmatmul.mubr.msk.f32.gmra.mrb[24].mxu0 %vm486_vm3, %v931_v59  ;;  %v4812_v33 = vpack.c.bf16 %v5146_v40, %v5145_v41  ;;  %v7781_v17 = vld [vmem:[#allocation21_spill] sm:$0xff]  ;;  %v7783_v40 = vld [vmem:[#allocation36_spill] sm:$0xff] }
 0x54d   : > { %v5346_v28 = vpop.eup %5345  ;;  %v3417_v42 = vmul.f32 1.442695, %v3404_v7  ;;  %5359 = vrcp.f32 %v1332_v11  ;;  %4313 = vmatprep.mubr.msk.f32.mxu0 %vm5649_vm0, %v7777_v1  ;;  %v5156_v11 = vunpack.i.h.bf16 %v7781_v17  ;;  %v5155_v29 = vunpack.i.l.bf16 %v7781_v17 }
 0x54e   : > { %v932_v62 = vmul.f32 %v5346_v28, %v7047_v23  ;;  %v1338_v46 = vpop.xlane.xlu1 %1337  ;;  %v5348_v48 = vpop.eup %5347 }
 0x54f   : > { %5361 = vpow2.f32 %v3417_v42  ;;  %v7289_v49 = vpop.eup %5349  ;;  %v1352_v23 = vmul.f32 %v5348_v48, %v7029_v44  ;;  %v7782_v42 = vld [vmem:[#allocation35_spill] sm:$0xff] }
 0x550   : > { %4314 = vmatmul.mubr.msk.f32.gmra.mrb[26].mxu0 %vm486_vm3, %v932_v62  ;;  %5363 = vrcp.f32 %v1335_v54  ;;  %v7294_v27 = vpop.eup %5351  ;;  %v3012_v2 = vsel %vm486_vm3, %v7289_v49, 0.0 }
 0x551   : > { %4365 = vmatprep.mubr.msk.f32.mxu0 %vm5649_vm0, %v7777_v1  ;;  %v5354_v12 = vpop.eup %5353  ;;  %5365 = vrcp.f32 %v1338_v46  ;;  %v3422_v6 = vsel %vm486_vm3, %v7294_v27, 0.0  ;;  %v4818_v46 = vpack.c.bf16 %v5156_v11, %v5155_v29 }
 0x552   : > { %v1341_v52 = vpop.xlane.xlu1 %1340  ;;  %v1353_v56 = vmul.f32 %v5354_v12, %v7780_v51  ;;  %v7784_v12 = vld [vmem:[#allocation22_spill] sm:$0xff] }
 0x553   : > { %5367 = vrcp.f32 %v1341_v52 }
 0x554   : > { %4366 = vmatmul.mubr.msk.f32.vlgmr.msra.gmra.mrb[28].mxu0 %vm486_vm3, %v1352_v23 }
 0x555   : > { %v7301_v14 = vpop.eup %5355  ;;  %3013 = vadd.xlane.f32.xlu0 %v3012_v2  ;;  %4813 = vmatpush3.bf16.msra.mxu0 %v4812_v33  ;;  %v7786_v2 = vld [vmem:[#allocation38_spill] sm:$0xff] }
 0x556   : > { %4368 = vmatprep.mubr.msk.f32.mxu0 %vm5649_vm0, %v7777_v1  ;;  %v3431_v44 = vsel %vm486_vm3, %v7301_v14, 0.0  ;;  %v7308_v35 = vpop.eup %5357  ;;  %4814 = vmatprep.subr.bf16.mxu0 %v7778_v20  ;;  %v1344_v28 = vpop.xlane.xlu1 %1343 }
 0x557   : > { %3432 = vadd.xlane.f32.xlu1 %v3431_v44  ;;  %v5360_v16 = vpop.eup %5359  ;;  %v3434_v48 = vsel %vm486_vm3, %v7308_v35, 0.0  ;;  %5369 = vrcp.f32 %v1344_v28 }
 0x558   : > { %4369 = vmatmul.mubr.msk.f32.gmra.mrb[30].mxu0 %vm486_vm3, %v1353_v56  ;;  %v1354_v62 = vmul.f32 %v5360_v16, %v7782_v42  ;;  %v5446_v56 = vld [vmem:[%s5946_s1 + $0x20] sm:$0xff]  ;;  %v5447_v16 = vld [vmem:[%s5946_s1 + $0x28] sm:$0xff]  ;;  %s5570_s1 = sshll.u32 %s5665_s12, 4  ;;  %s5571_s1 = int_to_ptr.vmem [resolvable:$false] %s5570_s1 }
 0x559   : > { %v7316_v59 = vpop.eup %5361  ;;  %3423 = vadd.xlane.f32.xlu0 %v3422_v6  ;;  %4816 = vmatpush3.bf16.msra.mxu0 %v4815_v25  ;;  %v5212_v25 = vpack.i.bf16 %v5447_v16, %v5446_v56  ;;  %v7789_v56 = vld [vmem:[#allocation25_spill] sm:$0xff]  ;;  %s5572_s11 = scalar_lea.vmem %s5571_s1, 1792  ;;  %p5573_p3 = scmp.lt.s32.totalorder %s7636_s22, %s5571_s1 }
 0x55a   : > { %4371 = vmatprep.mubr.msk.f32.mxu0 %vm5649_vm0, %v7777_v1  ;;  %v3437_v7 = vsel %vm486_vm3, %v7316_v59, 0.0  ;;  %4817 = vmatprep.subr.bf16.mxu0 %v7778_v20  ;;  %v5364_v54 = vpop.eup %5363  ;;  %v5171_v16 = vunpack.i.h.bf16 %v7789_v56  ;;  %p5574_p9 = scmp.lt.s32.totalorder %s5572_s11, %s5566_s7 }
 0x55b   : > { %3438 = vadd.xlane.f32.xlu1 %v3437_v7  ;;  %v1355_v41 = vmul.f32 %v5364_v54, %v7783_v40  ;;  %v5366_v23 = vpop.eup %5365 }
 0x55c   : > { %4372 = vmatmul.mubr.msk.f32.gmra.mrb[32].mxu0 %vm486_vm3, %v1354_v62  ;;  %v1356_v53 = vmul.f32 %v5366_v23, %v7785_v32  ;;  %p5575_p6 = por %p5574_p9, %p5573_p3 }
 0x55d   : > { %3435 = vadd.xlane.f32.xlu0 %v3434_v48  ;;  %4819 = vmatpush3.bf16.msra.mxu0 %v4818_v46  ;;  %v5368_v36 = vpop.eup %5367  ;;  %v7787_v46 = vld [vmem:[#allocation23_spill] sm:$0xff] }
 0x55e   : > { %4374 = vmatprep.mubr.msk.f32.mxu0 %vm5649_vm0, %v7777_v1  ;;  %4433 = vmatprep.subr.mxu0 %v7777_v1  ;;  %v1357_v52 = vmul.f32 %v5368_v36, %v7786_v2  ;;  %v5161_v48 = vunpack.i.h.bf16 %v7787_v46  ;;  %v5160_v40 = vunpack.i.l.bf16 %v7787_v46  ;;  %p5576_p4 = pnand %p5575_p6, %p5569_p13 }
 0x560   : > { %4375 = vmatmul.mubr.msk.f32.gmra.mrb[34].mxu0 %vm486_vm3, %v1355_v41  ;;  %v4833_v36 = vpack.c.bf16 %v5161_v48, %v5160_v40 }
 0x561   : > { %4434 = vmatpush3.msra.mxu0 %v7784_v12  ;;  %4377 = vmatprep.mubr.msk.f32.mxu0 %vm5649_vm0, %v7777_v1  ;;  %v5370_v44 = vpop.eup %5369  ;;  %v7788_v12 = vld [vmem:[#allocation24_spill] sm:$0xff] }
 0x562   : > { %4832 = vmatprep.subr.bf16.mxu0 %v7778_v20  ;;  %v1358_v17 = vmul.f32 %v5370_v44, %v7078_v58  ;;  %v7358_v58 = vpop.permute.xlu0 %3047  ;;  %v5166_v32 = vunpack.i.h.bf16 %v7788_v12 }
 0x564   : > { %v1757_v33 = vpop.xlane.xlu1 %1756  ;;  %4378 = vmatmul.mubr.msk.f32.gmra.mrb[36].mxu0 %vm486_vm3, %v1356_v53  ;;  %v5165_v53 = vunpack.i.l.bf16 %v7788_v12  ;;  %v7792_v12 = vld [vmem:[#allocation27_spill] sm:$0xff] }
 0x565   : > { %4380 = vmatprep.mubr.msk.f32.mxu0 %vm5649_vm0, %v7777_v1 }
 0x566   : > { %v4836_v44 = vpack.c.bf16 %v5166_v32, %v5165_v53  ;;  %v5176_v32 = vunpack.i.h.bf16 %v7792_v12  ;;  %v5175_v53 = vunpack.i.l.bf16 %v7792_v12 }
 0x568   : > { %v1760_v51 = vpop.xlane.xlu1 %1759  ;;  %4381 = vmatmul.mubr.msk.f32.gmra.mrb[38].mxu0 %vm486_vm3, %v1357_v52 }
 0x569   : > { %4383 = vmatprep.mubr.msk.f32.mxu0 %vm5649_vm0, %v7777_v1 }
 0x56c   : > { %v1763_v11 = vpop.xlane.xlu1 %1762  ;;  %5213 = vrot.lane.b32.xlu1 %v5212_v25, %s5657_s25  ;;  %4384 = vmatmul.mubr.msk.f32.gmra.mrb[40].mxu0 %vm486_vm3, %v1358_v17  ;;  %v5170_v25 = vunpack.i.l.bf16 %v7789_v56 }
 0x56d   : > { %4435 = vmatprep.mubr.msk.f32.mxu0 %vm5649_vm0, %v7777_v1 }
 0x570   : > { %v5204_v29 = vpop.permute.xlu1 %5203 }
 0x571   : > { %v5206_v6 = vunpack.i.h.bf16 %v5204_v29  ;;  %v5205_v7 = vunpack.i.l.bf16 %v5204_v29 }
 0x573   : > { %v7352_v28 = vpack.c.bf16 %v5206_v6, %v5205_v7  ;;  %3466 = vrot.lane.b32.xlu0 %v7086_v47, %s5657_s25  ;;  %v4839_v6 = vpack.c.bf16 %v5171_v16, %v5170_v25  ;;  %v4854_v16 = vpack.c.bf16 %v5176_v32, %v5175_v53 }
 0x575   : > { %4908 = vmatpush3.bf16.msra.mxu1 %v7352_v28 }
 0x576   : > { %4905 = vmatprep.subr.bf16.mxu1 %v7778_v20 }
 0x57d   : > { %v1745_v42 = vpop.xlane.xlu0 %1744 }
 0x57e   : > { %5371 = vrcp.f32 %v1745_v42 }
 0x581   : > { %v1748_v62 = vpop.xlane.xlu0 %1747 }
 0x582   : > { %5373 = vrcp.f32 %v1748_v62  ;;  %v7790_v62 = vld [vmem:[#allocation26_spill] sm:$0xff] }
 0x585   : > { %v1751_v54 = vpop.xlane.xlu0 %1750 }
 0x586   : > { %5375 = vrcp.f32 %v1751_v54 }
 0x588   : > { %v5372_v41 = vpop.eup %5371 }
 0x589   : > { %v1771_v23 = vmul.f32 %v5372_v41, %v7107_v37  ;;  %v1754_v47 = vpop.xlane.xlu0 %1753  ;;  %v7791_v41 = vld [vmem:[#allocation39_spill] sm:$0xff] }
 0x58a   : > { %5377 = vrcp.f32 %v1754_v47 }
 0x58b   : > { %4436 = vmatmul.mubr.msk.f32.vlgmr.msra.gmra.mrb[42].mxu0 %vm486_vm3, %v1771_v23  ;;  %5379 = vrcp.f32 %v1757_v33 }
 0x58c   : > { %v5374_v2 = vpop.eup %5373  ;;  %4834 = vmatpush3.bf16.msra.mxu0 %v4833_v36  ;;  %4438 = vmatprep.mubr.msk.f32.mxu0 %vm5649_vm0, %v7777_v1  ;;  %5381 = vrcp.f32 %v1760_v51 }
 0x58d   : > { %v2164_v52 = vpop.xlane.xlu0 %2163  ;;  %4835 = vmatprep.subr.bf16.mxu0 %v7778_v20  ;;  %v1772_v37 = vmul.f32 %v5374_v2, %v7114_v55  ;;  %5383 = vrcp.f32 %v1763_v11 }
 0x58e   : > { %5385 = vrcp.f32 %v2164_v52 }
 0x58f   : > { %4439 = vmatmul.mubr.msk.f32.gmra.mrb[44].mxu0 %vm486_vm3, %v1772_v37  ;;  %v7793_v37 = vld [vmem:[#allocation28_spill] sm:$0xff] }
 0x590   : > { %v5376_v17 = vpop.eup %5375  ;;  %4837 = vmatpush3.bf16.msra.mxu0 %v4836_v44  ;;  %4441 = vmatprep.mubr.msk.f32.mxu0 %vm5649_vm0, %v7777_v1  ;;  %v5181_v44 = vunpack.i.h.bf16 %v7793_v37  ;;  %v5180_v56 = vunpack.i.l.bf16 %v7793_v37 }
 0x591   : > { %v2167_v33 = vpop.xlane.xlu0 %2166  ;;  %4838 = vmatprep.subr.bf16.mxu0 %v7778_v20  ;;  %v1773_v29 = vmul.f32 %v5376_v17, %v7120_v57 }
 0x592   : > { %5387 = vrcp.f32 %v2167_v33 }
 0x593   : > { %4442 = vmatmul.mubr.msk.f32.gmra.mrb[46].mxu0 %vm486_vm3, %v1773_v29  ;;  %v4857_v29 = vpack.c.bf16 %v5181_v44, %v5180_v56  ;;  %v7797_v56 = vld [vmem:[#allocation32_spill] sm:$0xff] }
 0x594   : > { %v5378_v55 = vpop.eup %5377  ;;  %4840 = vmatpush3.bf16.msra.mxu0 %v4839_v6  ;;  %4444 = vmatprep.mubr.msk.f32.mxu0 %vm5649_vm0, %v7777_v1  ;;  %v7794_v6 = vld [vmem:[#allocation29_spill] sm:$0xff] }
 0x595   : > { %v2170_v7 = vpop.xlane.xlu0 %2169  ;;  %4503 = vmatprep.subr.mxu0 %v7777_v1  ;;  %v1774_v51 = vmul.f32 %v5378_v55, %v7125_v3  ;;  %v5380_v42 = vpop.eup %5379  ;;  %v5186_v55 = vunpack.i.h.bf16 %v7794_v6 }
 0x596   : > { %v1775_v11 = vmul.f32 %v5380_v42, %v7090_v18  ;;  %v5382_v54 = vpop.eup %5381  ;;  %5389 = vrcp.f32 %v2170_v7  ;;  %v5185_v7 = vunpack.i.l.bf16 %v7794_v6 }
 0x597   : > { %4445 = vmatmul.mubr.msk.f32.gmra.mrb[48].mxu0 %vm486_vm3, %v1774_v51  ;;  %v1776_v46 = vmul.f32 %v5382_v54, %v7094_v21  ;;  %v5384_v48 = vpop.eup %5383 }
 0x598   : > { %4504 = vmatpush3.msra.mxu0 %v7790_v62  ;;  %4447 = vmatprep.mubr.msk.f32.mxu0 %vm5649_vm0, %v7777_v1  ;;  %v1777_v23 = vmul.f32 %v5384_v48, %v7791_v41  ;;  %v5386_v47 = vpop.eup %5385  ;;  %v7795_v41 = vld [vmem:[#allocation31_spill] sm:$0xff] }
 0x599   : > { %v2173_v57 = vpop.xlane.xlu0 %2172  ;;  %4853 = vmatprep.subr.bf16.mxu0 %v7778_v20  ;;  %v2190_v21 = vmul.f32 %v5386_v47, %v7130_v22 }
 0x59a   : > { %5391 = vrcp.f32 %v2173_v57  ;;  %v4860_v57 = vpack.c.bf16 %v5186_v55, %v5185_v7 }
 0x59b   : > { %4448 = vmatmul.mubr.msk.f32.gmra.mrb[50].mxu0 %vm486_vm3, %v1775_v11 }
 0x59c   : > { %4450 = vmatprep.mubr.msk.f32.mxu0 %vm5649_vm0, %v7777_v1  ;;  %v5388_v52 = vpop.eup %5387 }
 0x59d   : > { %v2179_v3 = vpop.xlane.xlu0 %2178  ;;  %v2191_v22 = vmul.f32 %v5388_v52, %v7136_v19 }
 0x59f   : > { %4451 = vmatmul.mubr.msk.f32.gmra.mrb[52].mxu0 %vm486_vm3, %v1776_v46 }
 0x5a0   : > { %4453 = vmatprep.mubr.msk.f32.mxu0 %vm5649_vm0, %v7777_v1  ;;  %v5390_v33 = vpop.eup %5389 }
 0x5a1   : > { %v2583_v18 = vpop.xlane.xlu0 %2582  ;;  %v2176_v40 = vpop.xlane.xlu1 %2175  ;;  %v2192_v19 = vmul.f32 %v5390_v33, %v7142_v4  ;;  %v7798_v33 = vld [vmem:[#allocation33_spill] sm:$0xff] }
 0x5a2   : > { %5393 = vrcp.f32 %v2176_v40  ;;  %v5200_v6 = vunpack.i.l.bf16 %v7798_v33 }
 0x5a3   : > { %4454 = vmatmul.mubr.msk.f32.gmra.mrb[54].mxu0 %vm486_vm3, %v1777_v23  ;;  %5395 = vrcp.f32 %v2179_v3 }
 0x5a4   : > { %4505 = vmatprep.mubr.msk.f32.mxu0 %vm5649_vm0, %v7777_v1  ;;  %v5392_v62 = vpop.eup %5391 }
 0x5a5   : > { %v2589_v36 = vpop.xlane.xlu0 %2588  ;;  %v2182_v2 = vpop.xlane.xlu1 %2181  ;;  %v2193_v3 = vmul.f32 %v5392_v62, %v7148_v0 }
 0x5a6   : > { %5397 = vrcp.f32 %v2182_v2  ;;  %v7796_v2 = vld [vmem:[#allocation30_spill] sm:$0xff] }
 0x5a7   : > { %4506 = vmatmul.mubr.msk.f32.vlgmr.msra.gmra.mrb[56].mxu0 %vm486_vm3, %v2190_v21  ;;  %5399 = vrcp.f32 %v2583_v18  ;;  %v5191_v52 = vunpack.i.h.bf16 %v7796_v2  ;;  %v5190_v37 = vunpack.i.l.bf16 %v7796_v2 }
 0x5a8   : > { %4855 = vmatpush3.bf16.msra.mxu0 %v4854_v16  ;;  %4508 = vmatprep.mubr.msk.f32.mxu0 %vm5649_vm0, %v7777_v1  ;;  %v5196_v16 = vunpack.i.h.bf16 %v7797_v56 }
 0x5a9   : > { %v2592_v25 = vpop.xlane.xlu0 %2591  ;;  %v2586_v17 = vpop.xlane.xlu1 %2585  ;;  %4856 = vmatprep.subr.bf16.mxu0 %v7778_v20  ;;  %v4875_v44 = vpack.c.bf16 %v5191_v52, %v5190_v37 }
 0x5aa   : > { %5401 = vrcp.f32 %v2586_v17  ;;  %v5195_v17 = vunpack.i.l.bf16 %v7797_v56 }
 0x5ab   : > { %4509 = vmatmul.mubr.msk.f32.gmra.mrb[58].mxu0 %vm486_vm3, %v2191_v22  ;;  %5403 = vrcp.f32 %v2589_v36 }
 0x5ac   : > { %4858 = vmatpush3.bf16.msra.mxu0 %v4857_v29  ;;  %4511 = vmatprep.mubr.msk.f32.mxu0 %vm5649_vm0, %v7777_v1  ;;  %v5394_v46 = vpop.eup %5393  ;;  %5405 = vrcp.f32 %v2592_v25  ;;  %v5201_v29 = vunpack.i.h.bf16 %v7798_v33 }
 0x5ad   : > { %v7414_v51 = vpop.xlane.xlu0 %2600  ;;  %v2595_v42 = vpop.xlane.xlu1 %2594  ;;  %4859 = vmatprep.subr.bf16.mxu0 %v7778_v20  ;;  %v2194_v47 = vmul.f32 %v5394_v46, %v7157_v15 }
 0x5ae   : > { %v5396_v12 = vpop.eup %5395  ;;  %5407 = vrcp.f32 %v2595_v42 }
 0x5af   : > { %4512 = vmatmul.mubr.msk.f32.gmra.mrb[60].mxu0 %vm486_vm3, %v2192_v19  ;;  %v2195_v18 = vmul.f32 %v5396_v12, %v7154_v13 }
 0x5b0   : > { %4861 = vmatpush3.bf16.msra.mxu0 %v4860_v57  ;;  %4514 = vmatprep.mubr.msk.f32.mxu0 %vm5649_vm0, %v7777_v1  ;;  %v5398_v32 = vpop.eup %5397 }
 0x5b1   : > { %v5209_v11 = vpop.permute.xlu0 %5208  ;;  %v2598_v54 = vpop.xlane.xlu1 %2597  ;;  %4573 = vmatprep.subr.mxu0 %v7777_v1  ;;  %v2196_v53 = vmul.f32 %v5398_v32, %v7164_v45 }
 0x5b2   : > { %v5211_v48 = vunpack.i.h.bf16 %v5209_v11  ;;  %v5210_v40 = vunpack.i.l.bf16 %v5209_v11  ;;  %v5400_v21 = vpop.eup %5399  ;;  %5409 = vrcp.f32 %v2598_v54 }
 0x5b3   : > { %4515 = vmatmul.mubr.msk.f32.gmra.mrb[62].mxu0 %vm486_vm3, %v2193_v3  ;;  %v2609_v13 = vmul.f32 %v5400_v21, %v7161_v61  ;;  %v4878_v61 = vpack.c.bf16 %v5196_v16, %v5195_v17  ;;  %5411 = vrcp.f32 %v7414_v51 }
 0x5b4   : > { %v7424_v4 = vpack.c.bf16 %v5211_v48, %v5210_v40  ;;  %4574 = vmatpush3.msra.mxu0 %v7795_v41  ;;  %4517 = vmatprep.mubr.msk.f32.mxu0 %vm5649_vm0, %v7777_v1  ;;  %v5402_v36 = vpop.eup %5401 }
 0x5b5   : > { %v3002_v23 = vpop.xlane.xlu1 %3001  ;;  %4874 = vmatprep.subr.bf16.mxu0 %v7778_v20  ;;  %v2610_v25 = vmul.f32 %v5402_v36, %v7173_v50  ;;  %v5404_v22 = vpop.eup %5403  ;;  %v4881_v50 = vpack.c.bf16 %v5201_v29, %v5200_v6 }
 0x5b6   : > { %4909 = vmatpush3.bf16.msra.mxu1 %v7424_v4  ;;  %v2611_v7 = vmul.f32 %v5404_v22, %v7170_v30  ;;  %v5406_v42 = vpop.eup %5405  ;;  %5413 = vrcp.f32 %v3002_v23 }
 0x5b7   : > { %4518 = vmatmul.mubr.msk.f32.gmra.mrb[64].mxu0 %vm486_vm3, %v2194_v47  ;;  %4906 = vmatprep.subr.bf16.mxu1 %v7778_v20  ;;  %v2612_v19 = vmul.f32 %v5406_v42, %v7179_v39 }
 0x5b8   : > { %4520 = vmatprep.mubr.msk.f32.mxu0 %vm5649_vm0, %v7777_v1  ;;  %v5408_v62 = vpop.eup %5407 }
 0x5b9   : > { %v3005_v0 = vpop.xlane.xlu1 %3004  ;;  %v2613_v30 = vmul.f32 %v5408_v62, %v7184_v24 }
 0x5ba   : > { %5415 = vrcp.f32 %v3005_v0 }
 0x5bb   : > { %4521 = vmatmul.mubr.msk.f32.gmra.mrb[66].mxu0 %vm486_vm3, %v2195_v18 }
 0x5bc   : > { %4523 = vmatprep.mubr.msk.f32.mxu0 %vm5649_vm0, %v7777_v1  ;;  %v5410_v51 = vpop.eup %5409 }
 0x5bd   : > { %v3008_v15 = vpop.xlane.xlu1 %3007  ;;  %v2614_v39 = vmul.f32 %v5410_v51, %v7197_v43  ;;  %v5412_v54 = vpop.eup %5411 }
 0x5be   : > { %5417 = vrcp.f32 %v3008_v15  ;;  %v2615_v24 = vmul.f32 %v5412_v54, %v7190_v10 }
 0x5bf   : > { %4524 = vmatmul.mubr.msk.f32.gmra.mrb[68].mxu0 %vm486_vm3, %v2196_v53 }
 0x5c0   : > { %4575 = vmatprep.mubr.msk.f32.mxu0 %vm5649_vm0, %v7777_v1 }
 0x5c1   : > { %v3011_v45 = vpop.xlane.xlu1 %3010 }
 0x5c2   : > { %5419 = vrcp.f32 %v3011_v45 }
 0x5c3   : > { %4576 = vmatmul.mubr.msk.f32.vlgmr.msra.gmra.mrb[70].mxu0 %vm486_vm3, %v2609_v13 }
 0x5c4   : > { %4876 = vmatpush3.bf16.msra.mxu0 %v4875_v44  ;;  %4578 = vmatprep.mubr.msk.f32.mxu0 %vm5649_vm0, %v7777_v1 }
 0x5c5   : > { %4877 = vmatprep.subr.bf16.mxu0 %v7778_v20  ;;  %v3017_v55 = vpop.xlane.xlu1 %3016 }
 0x5c7   : > { %4579 = vmatmul.mubr.msk.f32.gmra.mrb[72].mxu0 %vm486_vm3, %v2610_v25 }
 0x5c8   : > { %4879 = vmatpush3.bf16.msra.mxu0 %v4878_v61  ;;  %4581 = vmatprep.mubr.msk.f32.mxu0 %vm5649_vm0, %v7777_v1 }
 0x5c9   : > { %4880 = vmatprep.subr.bf16.mxu0 %v7778_v20  ;;  %v3020_v57 = vpop.xlane.xlu1 %3019 }
 0x5cb   : > { %4582 = vmatmul.mubr.msk.f32.gmra.mrb[74].mxu0 %vm486_vm3, %v2611_v7 }
 0x5cc   : > { %4882 = vmatpush3.bf16.msra.mxu0 %v4881_v50  ;;  %4584 = vmatprep.mubr.msk.f32.mxu0 %vm5649_vm0, %v7777_v1 }
 0x5cd   : > { %4643 = vmatprep.subr.mxu0 %v7777_v1  ;;  %v3421_v11 = vpop.xlane.xlu1 %3420 }
 0x5cf   : > { %4585 = vmatmul.mubr.msk.f32.gmra.mrb[76].mxu0 %vm486_vm3, %v2612_v19 }
 0x5d0   : > { %4644 = vmatpush3.msra.mxu0 %v7358_v58  ;;  %4587 = vmatprep.mubr.msk.f32.mxu0 %vm5649_vm0, %v7777_v1  ;;  %v5414_v58 = vpop.eup %5413 }
 0x5d1   : > { %4895 = vmatprep.subr.bf16.mxu0 %v7778_v20  ;;  %v3427_v3 = vpop.xlane.xlu1 %3426  ;;  %v3028_v46 = vmul.f32 %v5414_v58, %v7202_v26  ;;  %v5416_v43 = vpop.eup %5415 }
 0x5d2   : > { %v3029_v10 = vmul.f32 %v5416_v43, %v7207_v5  ;;  %v5418_v40 = vpop.eup %5417 }
 0x5d3   : > { %4588 = vmatmul.mubr.msk.f32.gmra.mrb[78].mxu0 %vm486_vm3, %v2613_v30  ;;  %v5420_v23 = vpop.eup %5419 }
 0x5d4   : > { %4590 = vmatprep.mubr.msk.f32.mxu0 %vm5649_vm0, %v7777_v1 }
 0x5d5   : > { %v3430_v48 = vpop.xlane.xlu1 %3429 }
 0x5d7   : > { %4591 = vmatmul.mubr.msk.f32.gmra.mrb[80].mxu0 %vm486_vm3, %v2614_v39 }
 0x5d8   : > { %4593 = vmatprep.mubr.msk.f32.mxu0 %vm5649_vm0, %v7777_v1 }
 0x5db   : > { %4594 = vmatmul.mubr.msk.f32.gmra.mrb[82].mxu0 %vm486_vm3, %v2615_v24 }
 0x5dc   : > { %4645 = vmatprep.mubr.msk.f32.mxu0 %vm5649_vm0, %v7777_v1 }
 0x5df   : > { %4646 = vmatmul.mubr.msk.f32.vlgmr.msra.gmra.mrb[84].mxu0 %vm486_vm3, %v3028_v46 }
 0x5e0   : > { %4897 = vmatpush3.bf16.msra.mxu0 %v7352_v28  ;;  %4648 = vmatprep.mubr.msk.f32.mxu0 %vm5649_vm0, %v7777_v1  ;;  %v3030_v28 = vmul.f32 %v5418_v40, %v7214_v60 }
 0x5e1   : > { %4898 = vmatprep.subr.bf16.mxu0 %v7778_v20 }
 0x5e2   : > { %v3014_v41 = vpop.xlane.xlu0 %3013 }
 0x5e3   : > { %5421 = vrcp.f32 %v3014_v41  ;;  %4649 = vmatmul.mubr.msk.f32.gmra.mrb[86].mxu0 %vm486_vm3, %v3029_v10 }
 0x5e4   : > { %4900 = vmatpush3.bf16.msra.mxu0 %v7424_v4  ;;  %v3433_v26 = vpop.xlane.xlu1 %3432  ;;  %4651 = vmatprep.mubr.msk.f32.mxu0 %vm5649_vm0, %v7777_v1  ;;  %5423 = vrcp.f32 %v3017_v55  ;;  %v3031_v4 = vmul.f32 %v5420_v23, %v7227_v9 }
 0x5e5   : > { %4901 = vmatprep.subr.bf16.mxu0 %v7778_v20  ;;  %5425 = vrcp.f32 %v3020_v57 }
 0x5e6   : > { %v3424_v5 = vpop.xlane.xlu0 %3423 }
 0x5e7   : > { %4652 = vmatmul.mubr.msk.f32.gmra.mrb[88].mxu0 %vm486_vm3, %v3030_v28 }
 0x5e8   : > { %v3439_v47 = vpop.xlane.xlu1 %3438  ;;  %4654 = vmatprep.mubr.msk.f32.mxu0 %vm5649_vm0, %v7777_v1 }
 0x5e9   : > { %5427 = vrcp.f32 %v3439_v47 }
 0x5ea   : > { %5429 = vrcp.f32 %v3421_v11  ;;  %v3436_v18 = vpop.xlane.xlu0 %3435 }
 0x5eb   : > { %4655 = vmatmul.mubr.msk.f32.gmra.mrb[90].mxu0 %vm486_vm3, %v3031_v4  ;;  %5431 = vrcp.f32 %v3424_v5 }
 0x5ec   : > { %v5214_v12 = vpop.permute.xlu1 %5213  ;;  %4657 = vmatprep.mubr.msk.f32.mxu0 %vm5649_vm0, %v7777_v1  ;;  %5433 = vrcp.f32 %v3427_v3 }
 0x5ed   : > { %v5422_v60 = vpop.eup %5421  ;;  %v5216_v20 = vunpack.i.h.bf16 %v5214_v12  ;;  %v5215_v0 = vunpack.i.l.bf16 %v5214_v12  ;;  %5435 = vrcp.f32 %v3430_v48 }
 0x5ee   : > { %v3032_v32 = vmul.f32 %v5422_v60, %v7289_v49  ;;  %v5424_v15 = vpop.eup %5423  ;;  %v3467_v21 = vpop.permute.xlu0 %3466  ;;  %5437 = vrcp.f32 %v3433_v26 }
 0x5ef   : > { %v4902_v53 = vpack.c.bf16 %v5216_v20, %v5215_v0  ;;  %v5426_v9 = vpop.eup %5425  ;;  %v3033_v2 = vmul.f32 %v5424_v15, %v7240_v8  ;;  %5439 = vrcp.f32 %v3436_v18 }
 0x5f0   : > { %4658 = vmatmul.mubr.msk.f32.gmra.mrb[92].mxu0 %vm486_vm3, %v3032_v32  ;;  %v3034_v37 = vmul.f32 %v5426_v9, %v7247_v38 }
 0x5f1   : > { %4903 = vmatpush3.bf16.msra.mxu0 %v4902_v53  ;;  %4910 = vmatpush3.bf16.msra.mxu1 %v4902_v53 }
 0x5f2   : > { %4660 = vmatprep.mubr.msk.f32.mxu0 %vm5649_vm0, %v7777_v1  ;;  %4907 = vmatprep.subr.mxu1 %v7777_v1 }
 0x5f3   : > { %v5428_v52 = vpop.eup %5427  ;;  %4713 = vmatprep.subr.mxu0 %v7777_v1 }
 0x5f4   : > { %v3453_v49 = vmul.f32 %v5428_v52, %v7316_v59  ;;  %4661 = vmatmul.mubr.msk.f32.gmra.mrb[94].mxu0 %vm486_vm3, %v3033_v2  ;;  %v5430_v8 = vpop.eup %5429 }
 0x5f5   : > { %4911 = vmatpush3.msra.mxu1 %v3467_v21  ;;  %4663 = vmatprep.mubr.msk.f32.mxu0 %vm5649_vm0, %v7777_v1  ;;  %v3447_v59 = vmul.f32 %v5430_v8, %v7256_v63  ;;  %v5432_v13 = vpop.eup %5431 }
 0x5f6   : > { %4734 = vmatmul.mubr.msk.f32.vlgmr.msra.gmra.mrb[112].mxu1 %vm486_vm3, %v3453_v49  ;;  %4714 = vmatpush3.msra.mxu0 %v3467_v21  ;;  %v3448_v36 = vmul.f32 %v5432_v13, %v7294_v27  ;;  %v5434_v38 = vpop.eup %5433 }
 0x5f7   : > { %v3449_v63 = vmul.f32 %v5434_v38, %v7262_v31  ;;  %v5436_v16 = vpop.eup %5435 }
 0x5f8   : > { %4664 = vmatmul.mubr.msk.f32.gmra.mrb[96].mxu0 %vm486_vm3, %v3034_v37  ;;  %v3450_v45 = vmul.f32 %v5436_v16, %v7271_v34  ;;  %v5438_v25 = vpop.eup %5437 }
 0x5f9   : > { %4715 = vmatprep.mubr.msk.f32.mxu0 %vm5649_vm0, %v7777_v1  ;;  %v3451_v31 = vmul.f32 %v5438_v25, %v7301_v14  ;;  %v5440_v22 = vpop.eup %5439 }
 0x5fa   : > { %v3452_v34 = vmul.f32 %v5440_v22, %v7308_v35 }
 0x5fc   : > { %4716 = vmatmul.mubr.msk.f32.vlgmr.msra.gmra.mrb[98].mxu0 %vm486_vm3, %v3447_v59 }
 0x5fd   : > { %4718 = vmatprep.mubr.msk.f32.mxu0 %vm5649_vm0, %v7777_v1 }
 0x5ff   : > { %v1048_v44 = vpop.f32.mrb[14].mxu0 }
 0x600   : > { %4719 = vmatmul.mubr.msk.f32.gmra.mrb[100].mxu0 %vm486_vm3, %v3448_v36  ;;  %1089 = vrot.lane.b32.xlu1 %v1048_v44, %s5658_s10  ;;  %v4297_v56 = vpop.f32.mrb[15].mxu0 }
 0x601   : > { %4721 = vmatprep.mubr.msk.f32.mxu0 %vm5649_vm0, %v7777_v1 }
 0x603   : > { %v1053_v17 = vpop.f32.mrb[16].mxu0 }
 0x604   : > { %4722 = vmatmul.mubr.msk.f32.gmra.mrb[102].mxu0 %vm486_vm3, %v3449_v63  ;;  %1091 = vrot.lane.b32.xlu1 %v1053_v17, %s5658_s10  ;;  %v4300_v27 = vpop.f32.mrb[17].mxu0 }
 0x605   : > { %4724 = vmatprep.mubr.msk.f32.mxu0 %vm5649_vm0, %v7777_v1 }
 0x608   : > { %4725 = vmatmul.mubr.msk.f32.gmra.mrb[104].mxu0 %vm486_vm3, %v3450_v45 }
 0x609   : > { %4727 = vmatprep.mubr.msk.f32.mxu0 %vm5649_vm0, %v7777_v1 }
 0x60b   : > { %v1058_v61 = vpop.f32.mrb[18].mxu0 }
 0x60c   : > { %4728 = vmatmul.mubr.msk.f32.gmra.mrb[106].mxu0 %vm486_vm3, %v3451_v31  ;;  %1093 = vrot.lane.b32.xlu1 %v1058_v61, %s5658_s10  ;;  %v4303_v33 = vpop.f32.mrb[19].mxu0 }
 0x60d   : > { %4730 = vmatprep.mubr.msk.f32.mxu0 %vm5649_vm0, %v7777_v1 }
 0x610   : > { %4731 = vmatmul.mubr.msk.f32.gmra.mrb[108].mxu0 %vm486_vm3, %v3452_v34 }
 0x614   : > { %v1063_v29 = vpop.f32.mrb[20].mxu0 }
 0x615   : > { %1095 = vrot.lane.b32.xlu1 %v1063_v29, %s5658_s10  ;;  %v4306_v6 = vpop.f32.mrb[21].mxu0 }
 0x61b   : > { %v1068_v55 = vpop.f32.mrb[22].mxu0 }
 0x61c   : > { %1097 = vrot.lane.b32.xlu1 %v1068_v55, %s5658_s10  ;;  %v4309_v14 = vpop.f32.mrb[23].mxu0 }
 0x61f   : > { %v1073_v7 = vpop.f32.mrb[24].mxu0 }
 0x620   : > { %1099 = vrot.lane.b32.xlu1 %v1073_v7, %s5658_s10  ;;  %v4312_v42 = vpop.f32.mrb[25].mxu0 }
 0x623   : > { %v1078_v50 = vpop.f32.mrb[26].mxu0 }
 0x624   : > { %1101 = vrot.lane.b32.xlu0 %v1078_v50, %s5658_s10  ;;  %v4315_v1 = vpop.f32.mrb[27].mxu0 }
 0x627   : > { %v1467_v19 = vpop.f32.mrb[28].mxu0 }
 0x628   : > { %1508 = vrot.lane.b32.xlu1 %v1467_v19, %s5659_s13  ;;  %v4367_v35 = vpop.f32.mrb[29].mxu0 }
 0x62b   : > { %v1472_v62 = vpop.f32.mrb[30].mxu0 }
 0x62c   : > { %1510 = vrot.lane.b32.xlu0 %v1472_v62, %s5659_s13  ;;  %v4370_v57 = vpop.f32.mrb[31].mxu0 }
 0x62f   : > { %v1477_v30 = vpop.f32.mrb[32].mxu0 }
 0x630   : > { %1512 = vrot.lane.b32.xlu1 %v1477_v30, %s5659_s13  ;;  %v4373_v51 = vpop.f32.mrb[33].mxu0 }
 0x633   : > { %v1482_v11 = vpop.f32.mrb[34].mxu0 }
 0x634   : > { %1514 = vrot.lane.b32.xlu0 %v1482_v11, %s5659_s13  ;;  %v4376_v39 = vpop.f32.mrb[35].mxu0 }
 0x637   : > { %v1487_v54 = vpop.f32.mrb[36].mxu0 }
 0x638   : > { %1516 = vrot.lane.b32.xlu1 %v1487_v54, %s5659_s13  ;;  %v4379_v24 = vpop.f32.mrb[37].mxu0 }
 0x63b   : > { %v1492_v58 = vpop.f32.mrb[38].mxu0 }
 0x63c   : > { %1518 = vrot.lane.b32.xlu0 %v1492_v58, %s5659_s13  ;;  %v4382_v3 = vpop.f32.mrb[39].mxu0 }
 0x63f   : > { %v1497_v46 = vpop.f32.mrb[40].mxu0 }
 0x640   : > { %1520 = vrot.lane.b32.xlu1 %v1497_v46, %s5659_s13  ;;  %v4385_v43 = vpop.f32.mrb[41].mxu0 }
 0x65e   : > { %v1886_v48 = vpop.f32.mrb[42].mxu0 }
 0x65f   : > { %1927 = vrot.lane.b32.xlu0 %v1886_v48, %s5660_s28  ;;  %v4437_v10 = vpop.f32.mrb[43].mxu0 }
 0x662   : > { %v1891_v40 = vpop.f32.mrb[44].mxu0 }
 0x663   : > { %1929 = vrot.lane.b32.xlu1 %v1891_v40, %s5660_s28  ;;  %v4440_v41 = vpop.f32.mrb[45].mxu0 }
 0x666   : > { %v1896_v26 = vpop.f32.mrb[46].mxu0 }
 0x667   : > { %1931 = vrot.lane.b32.xlu0 %v1896_v26, %s5660_s28  ;;  %v4443_v28 = vpop.f32.mrb[47].mxu0 }
 0x66a   : > { %v1901_v23 = vpop.f32.mrb[48].mxu0 }
 0x66b   : > { %1933 = vrot.lane.b32.xlu1 %v1901_v23, %s5660_s28  ;;  %v4446_v5 = vpop.f32.mrb[49].mxu0 }
 0x66e   : > { %v1906_v47 = vpop.f32.mrb[50].mxu0 }
 0x66f   : > { %1935 = vrot.lane.b32.xlu0 %v1906_v47, %s5660_s28  ;;  %v4449_v4 = vpop.f32.mrb[51].mxu0 }
 0x672   : > { %v1911_v12 = vpop.f32.mrb[52].mxu0  ;;  %v1090_v60 = vpop.permute.xlu1 %1089 }
 0x673   : > { %1937 = vrot.lane.b32.xlu1 %v1911_v12, %s5660_s28  ;;  %v4452_v20 = vpop.f32.mrb[53].mxu0  ;;  %1111 = vst.msk [vmem:[%s6674_s29] sm:$0xff] %vm1110_vm4, %v1090_v60 }
 0x676   : > { %v1916_v0 = vpop.f32.mrb[54].mxu0  ;;  %v1092_v18 = vpop.permute.xlu1 %1091 }
 0x677   : > { %1939 = vrot.lane.b32.xlu0 %v1916_v0, %s5660_s28  ;;  %v4455_v32 = vpop.f32.mrb[55].mxu0  ;;  %1112 = vst.msk [vmem:[%s6674_s29 + $0x8] sm:$0xff] %vm1110_vm4, %v1092_v18 }
 0x67a   : > { %v2305_v15 = vpop.f32.mrb[56].mxu0 }
 0x67b   : > { %2346 = vrot.lane.b32.xlu1 %v2305_v15, %s5661_s20  ;;  %v4507_v53 = vpop.f32.mrb[57].mxu0 }
 0x67e   : > { %v2310_v9 = vpop.f32.mrb[58].mxu0  ;;  %v1094_v21 = vpop.permute.xlu1 %1093 }
 0x67f   : > { %2348 = vrot.lane.b32.xlu0 %v2310_v9, %s5661_s20  ;;  %v4510_v2 = vpop.f32.mrb[59].mxu0  ;;  %1113 = vst.msk [vmem:[%s6674_s29 + $0x10] sm:$0xff] %vm1110_vm4, %v1094_v21 }
 0x682   : > { %v2315_v52 = vpop.f32.mrb[60].mxu0 }
 0x683   : > { %2350 = vrot.lane.b32.xlu1 %v2315_v52, %s5661_s20  ;;  %v4513_v49 = vpop.f32.mrb[61].mxu0 }
 0x686   : > { %v2320_v37 = vpop.f32.mrb[62].mxu0 }
 0x687   : > { %2352 = vrot.lane.b32.xlu0 %v2320_v37, %s5661_s20  ;;  %v4516_v8 = vpop.f32.mrb[63].mxu0  ;;  %v1096_v59 = vpop.permute.xlu1 %1095 }
 0x688   : > { %1114 = vst.msk [vmem:[%s6674_s29 + $0x18] sm:$0xff] %vm1110_vm4, %v1096_v59 }
 0x68a   : > { %v2325_v13 = vpop.f32.mrb[64].mxu0 }
 0x68b   : > { %2354 = vrot.lane.b32.xlu1 %v2325_v13, %s5661_s20  ;;  %v4519_v36 = vpop.f32.mrb[65].mxu0 }
 0x68e   : > { %v2330_v38 = vpop.f32.mrb[66].mxu0  ;;  %v1098_v44 = vpop.permute.xlu1 %1097 }
 0x68f   : > { %2356 = vrot.lane.b32.xlu0 %v2330_v38, %s5661_s20  ;;  %v4522_v56 = vpop.f32.mrb[67].mxu0  ;;  %1115 = vst.msk [vmem:[%s6674_s29 + $0x20] sm:$0xff] %vm1110_vm4, %v1098_v44 }
 0x692   : > { %v2335_v63 = vpop.f32.mrb[68].mxu0  ;;  %v1100_v16 = vpop.permute.xlu1 %1099 }
 0x693   : > { %2358 = vrot.lane.b32.xlu1 %v2335_v63, %s5661_s20  ;;  %v4525_v17 = vpop.f32.mrb[69].mxu0  ;;  %1116 = vst.msk [vmem:[%s6674_s29 + $0x28] sm:$0xff] %vm1110_vm4, %v1100_v16 }
 0x696   : > { %v2724_v27 = vpop.f32.mrb[70].mxu0  ;;  %v1102_v45 = vpop.permute.xlu0 %1101 }
 0x697   : > { %2765 = vrot.lane.b32.xlu0 %v2724_v27, %s5662_s24  ;;  %v4577_v25 = vpop.f32.mrb[71].mxu0  ;;  %1117 = vst.msk [vmem:[%s6674_s29 + $0x30] sm:$0xff] %vm1110_vm4, %v1102_v45 }
 0x69a   : > { %v2729_v31 = vpop.f32.mrb[72].mxu0  ;;  %v1509_v22 = vpop.permute.xlu1 %1508 }
 0x69b   : > { %2767 = vrot.lane.b32.xlu1 %v2729_v31, %s5662_s24  ;;  %v4580_v61 = vpop.f32.mrb[73].mxu0  ;;  %1530 = vst.msk [vmem:[%s6674_s29] sm:$0xff] %vm1529_vm5, %v1509_v22 }
 0x69e   : > { %v2734_v33 = vpop.f32.mrb[74].mxu0  ;;  %v1511_v34 = vpop.permute.xlu0 %1510 }
 0x69f   : > { %2769 = vrot.lane.b32.xlu0 %v2734_v33, %s5662_s24  ;;  %v4583_v29 = vpop.f32.mrb[75].mxu0  ;;  %1531 = vst.msk [vmem:[%s6674_s29 + $0x8] sm:$0xff] %vm1529_vm5, %v1511_v34 }
 0x6a2   : > { %v2739_v6 = vpop.f32.mrb[76].mxu0  ;;  %v1513_v55 = vpop.permute.xlu1 %1512 }
 0x6a3   : > { %2771 = vrot.lane.b32.xlu1 %v2739_v6, %s5662_s24  ;;  %v4586_v14 = vpop.f32.mrb[77].mxu0  ;;  %1532 = vst.msk [vmem:[%s6674_s29 + $0x10] sm:$0xff] %vm1529_vm5, %v1513_v55 }
 0x6a6   : > { %v2744_v7 = vpop.f32.mrb[78].mxu0  ;;  %v1515_v42 = vpop.permute.xlu0 %1514 }
 0x6a7   : > { %2773 = vrot.lane.b32.xlu0 %v2744_v7, %s5662_s24  ;;  %v4589_v50 = vpop.f32.mrb[79].mxu0  ;;  %1533 = vst.msk [vmem:[%s6674_s29 + $0x18] sm:$0xff] %vm1529_vm5, %v1515_v42 }
 0x6aa   : > { %v2749_v1 = vpop.f32.mrb[80].mxu0  ;;  %v1517_v19 = vpop.permute.xlu1 %1516 }
 0x6ab   : > { %2775 = vrot.lane.b32.xlu1 %v2749_v1, %s5662_s24  ;;  %v4592_v35 = vpop.f32.mrb[81].mxu0  ;;  %1534 = vst.msk [vmem:[%s6674_s29 + $0x20] sm:$0xff] %vm1529_vm5, %v1517_v19 }
 0x6ae   : > { %v2754_v62 = vpop.f32.mrb[82].mxu0  ;;  %v1519_v57 = vpop.permute.xlu0 %1518 }
 0x6af   : > { %2777 = vrot.lane.b32.xlu0 %v2754_v62, %s5662_s24  ;;  %v4595_v30 = vpop.f32.mrb[83].mxu0  ;;  %1535 = vst.msk [vmem:[%s6674_s29 + $0x28] sm:$0xff] %vm1529_vm5, %v1519_v57 }
 0x6b2   : > { %v3143_v51 = vpop.f32.mrb[84].mxu0  ;;  %v1521_v11 = vpop.permute.xlu1 %1520 }
 0x6b3   : > { %3184 = vrot.lane.b32.xlu1 %v3143_v51, %s5663_s14  ;;  %v4647_v39 = vpop.f32.mrb[85].mxu0  ;;  %1536 = vst.msk [vmem:[%s6674_s29 + $0x30] sm:$0xff] %vm1529_vm5, %v1521_v11 }
 0x6b6   : > { %v3148_v54 = vpop.f32.mrb[86].mxu0 }
 0x6b7   : > { %3186 = vrot.lane.b32.xlu0 %v3148_v54, %s5663_s14  ;;  %v4650_v24 = vpop.f32.mrb[87].mxu0 }
 0x6ba   : > { %v3153_v58 = vpop.f32.mrb[88].mxu0 }
 0x6bb   : > { %3188 = vrot.lane.b32.xlu1 %v3153_v58, %s5663_s14  ;;  %v4653_v3 = vpop.f32.mrb[89].mxu0 }
 0x6be   : > { %v3158_v46 = vpop.f32.mrb[90].mxu0 }
 0x6bf   : > { %3190 = vrot.lane.b32.xlu0 %v3158_v46, %s5663_s14  ;;  %v4656_v43 = vpop.f32.mrb[91].mxu0 }
 0x6c3   : > { %v3163_v48 = vpop.f32.mrb[92].mxu0 }
 0x6c4   : > { %3192 = vrot.lane.b32.xlu1 %v3163_v48, %s5663_s14  ;;  %v4659_v10 = vpop.f32.mrb[93].mxu0 }
 0x6c7   : > { %v3168_v40 = vpop.f32.mrb[94].mxu0 }
 0x6c8   : > { %3194 = vrot.lane.b32.xlu0 %v3168_v40, %s5663_s14  ;;  %v4662_v41 = vpop.f32.mrb[95].mxu0 }
 0x6c9   : > { %v3592_v26 = vpop.f32.mrb[112].mxu1 }
 0x6ca   : > { %v4735_v28 = vpop.f32.mrb[113].mxu1 }
 0x6cb   : > { %v3173_v23 = vpop.f32.mrb[96].mxu0 }
 0x6cc   : > { %3196 = vrot.lane.b32.xlu1 %v3173_v23, %s5663_s14  ;;  %v4665_v5 = vpop.f32.mrb[97].mxu0 }
 0x6cf   : > { %v3562_v47 = vpop.f32.mrb[98].mxu0 }
 0x6d0   : > { %3603 = vrot.lane.b32.xlu0 %v3562_v47, %s5664_s23  ;;  %v4717_v4 = vpop.f32.mrb[99].mxu0 }
 0x6d1   : > { %v1928_v12 = vpop.permute.xlu0 %1927 }
 0x6d2   : > { %1949 = vst.msk [vmem:[%s6674_s29] sm:$0xff] %vm1948_vm6, %v1928_v12 }
 0x6d3   : > { %v3567_v60 = vpop.f32.mrb[100].mxu0 }
 0x6d4   : > { %3605 = vrot.lane.b32.xlu1 %v3567_v60, %s5664_s23  ;;  %v4720_v20 = vpop.f32.mrb[101].mxu0 }
 0x6d5   : > { %v1930_v0 = vpop.permute.xlu1 %1929 }
 0x6d6   : > { %1950 = vst.msk [vmem:[%s6674_s29 + $0x8] sm:$0xff] %vm1948_vm6, %v1930_v0 }
 0x6d7   : > { %v3572_v18 = vpop.f32.mrb[102].mxu0 }
 0x6d8   : > { %3607 = vrot.lane.b32.xlu0 %v3572_v18, %s5664_s23  ;;  %v4723_v32 = vpop.f32.mrb[103].mxu0 }
 0x6d9   : > { %v1932_v15 = vpop.permute.xlu0 %1931 }
 0x6da   : > { %1951 = vst.msk [vmem:[%s6674_s29 + $0x10] sm:$0xff] %vm1948_vm6, %v1932_v15 }
 0x6db   : > { %v3577_v53 = vpop.f32.mrb[104].mxu0 }
 0x6dc   : > { %3609 = vrot.lane.b32.xlu1 %v3577_v53, %s5664_s23  ;;  %v4726_v9 = vpop.f32.mrb[105].mxu0 }
 0x6dd   : > { %v1934_v21 = vpop.permute.xlu1 %1933 }
 0x6de   : > { %1952 = vst.msk [vmem:[%s6674_s29 + $0x18] sm:$0xff] %vm1948_vm6, %v1934_v21 }
 0x6df   : > { %v3582_v2 = vpop.f32.mrb[106].mxu0 }
 0x6e0   : > { %3611 = vrot.lane.b32.xlu0 %v3582_v2, %s5664_s23  ;;  %v4729_v52 = vpop.f32.mrb[107].mxu0 }
 0x6e1   : > { %v1936_v49 = vpop.permute.xlu0 %1935 }
 0x6e2   : > { %1953 = vst.msk [vmem:[%s6674_s29 + $0x20] sm:$0xff] %vm1948_vm6, %v1936_v49 }
 0x6e3   : > { %v3587_v37 = vpop.f32.mrb[108].mxu0 }
 0x6e4   : > { %3615 = vrot.lane.b32.xlu0 %v3592_v26, %s5664_s23  ;;  %3613 = vrot.lane.b32.xlu1 %v3587_v37, %s5664_s23  ;;  %v4732_v8 = vpop.f32.mrb[109].mxu0 }
 0x6e5   : > { %v1938_v59 = vpop.permute.xlu1 %1937 }
 0x6e6   : > { %1954 = vst.msk [vmem:[%s6674_s29 + $0x28] sm:$0xff] %vm1948_vm6, %v1938_v59 }
 0x6e9   : > { %v1940_v13 = vpop.permute.xlu0 %1939 }
 0x6ea   : > { %1955 = vst.msk [vmem:[%s6674_s29 + $0x30] sm:$0xff] %vm1948_vm6, %v1940_v13 }
 0x6ed   : > { %v2347_v36 = vpop.permute.xlu1 %2346 }
 0x6ee   : > { %2368 = vst.msk [vmem:[%s6674_s29] sm:$0xff] %vm2367_vm7, %v2347_v36 }
 0x6f1   : > { %v2349_v38 = vpop.permute.xlu0 %2348 }
 0x6f2   : > { %2369 = vst.msk [vmem:[%s6674_s29 + $0x8] sm:$0xff] %vm2367_vm7, %v2349_v38 }
 0x6f5   : > { %v2351_v44 = vpop.permute.xlu1 %2350 }
 0x6f6   : > { %2370 = vst.msk [vmem:[%s6674_s29 + $0x10] sm:$0xff] %vm2367_vm7, %v2351_v44 }
 0x6f9   : > { %v2353_v56 = vpop.permute.xlu0 %2352 }
 0x6fa   : > { %2371 = vst.msk [vmem:[%s6674_s29 + $0x18] sm:$0xff] %vm2367_vm7, %v2353_v56 }
 0x6fd   : > { %v2355_v63 = vpop.permute.xlu1 %2354 }
 0x6fe   : > { %2372 = vst.msk [vmem:[%s6674_s29 + $0x20] sm:$0xff] %vm2367_vm7, %v2355_v63 }
 0x701   : > { %v2357_v16 = vpop.permute.xlu0 %2356 }
 0x702   : > { %2373 = vst.msk [vmem:[%s6674_s29 + $0x28] sm:$0xff] %vm2367_vm7, %v2357_v16 }
 0x705   : > { %v2359_v17 = vpop.permute.xlu1 %2358 }
 0x706   : > { %2374 = vst.msk [vmem:[%s6674_s29 + $0x30] sm:$0xff] %vm2367_vm7, %v2359_v17 }
 0x709   : > { %v2766_v27 = vpop.permute.xlu0 %2765 }
 0x70a   : > { %2787 = vst.msk [vmem:[%s6674_s29] sm:$0xff] %vm2786_vm8, %v2766_v27 }
 0x70d   : > { %v2768_v45 = vpop.permute.xlu1 %2767 }
 0x70e   : > { %2788 = vst.msk [vmem:[%s6674_s29 + $0x8] sm:$0xff] %vm2786_vm8, %v2768_v45 }
 0x711   : > { %v2770_v25 = vpop.permute.xlu0 %2769 }
 0x712   : > { %2789 = vst.msk [vmem:[%s6674_s29 + $0x10] sm:$0xff] %vm2786_vm8, %v2770_v25 }
 0x715   : > { %v2772_v31 = vpop.permute.xlu1 %2771 }
 0x716   : > { %2790 = vst.msk [vmem:[%s6674_s29 + $0x18] sm:$0xff] %vm2786_vm8, %v2772_v31 }
 0x719   : > { %v2774_v22 = vpop.permute.xlu0 %2773 }
 0x71a   : > { %2791 = vst.msk [vmem:[%s6674_s29 + $0x20] sm:$0xff] %vm2786_vm8, %v2774_v22 }
 0x71d   : > { %v2776_v61 = vpop.permute.xlu1 %2775 }
 0x71e   : > { %2792 = vst.msk [vmem:[%s6674_s29 + $0x28] sm:$0xff] %vm2786_vm8, %v2776_v61 }
 0x721   : > { %v2778_v33 = vpop.permute.xlu0 %2777 }
 0x722   : > { %2793 = vst.msk [vmem:[%s6674_s29 + $0x30] sm:$0xff] %vm2786_vm8, %v2778_v33 }
 0x725   : > { %v3185_v34 = vpop.permute.xlu1 %3184 }
 0x726   : > { %3206 = vst.msk [vmem:[%s6674_s29] sm:$0xff] %vm3205_vm9, %v3185_v34 }
 0x729   : > { %v3187_v29 = vpop.permute.xlu0 %3186 }
 0x72a   : > { %3207 = vst.msk [vmem:[%s6674_s29 + $0x8] sm:$0xff] %vm3205_vm9, %v3187_v29 }
 0x72d   : > { %v3189_v6 = vpop.permute.xlu1 %3188 }
 0x72e   : > { %3208 = vst.msk [vmem:[%s6674_s29 + $0x10] sm:$0xff] %vm3205_vm9, %v3189_v6 }
 0x731   : > { %v3191_v55 = vpop.permute.xlu0 %3190 }
 0x732   : > { %3209 = vst.msk [vmem:[%s6674_s29 + $0x18] sm:$0xff] %vm3205_vm9, %v3191_v55 }
 0x736   : > { %v3193_v14 = vpop.permute.xlu1 %3192 }
 0x737   : > { %3210 = vst.msk [vmem:[%s6674_s29 + $0x20] sm:$0xff] %vm3205_vm9, %v3193_v14 }
 0x73a   : > { %v3195_v7 = vpop.permute.xlu0 %3194 }
 0x73b   : > { %3211 = vst.msk [vmem:[%s6674_s29 + $0x28] sm:$0xff] %vm3205_vm9, %v3195_v7 }
 0x73e   : > { %v3197_v42 = vpop.permute.xlu1 %3196 }
 0x73f   : > { %3212 = vst.msk [vmem:[%s6674_s29 + $0x30] sm:$0xff] %vm3205_vm9, %v3197_v42 }
 0x742   : > { %v3604_v50 = vpop.permute.xlu0 %3603 }
 0x743   : > { %3625 = vst.msk [vmem:[%s6674_s29] sm:$0xff] %vm3624_vm10, %v3604_v50 }
 0x746   : > { %v3606_v1 = vpop.permute.xlu1 %3605 }
 0x747   : > { %3626 = vst.msk [vmem:[%s6674_s29 + $0x8] sm:$0xff] %vm3624_vm10, %v3606_v1 }
 0x74a   : > { %v3608_v19 = vpop.permute.xlu0 %3607 }
 0x74b   : > { %3627 = vst.msk [vmem:[%s6674_s29 + $0x10] sm:$0xff] %vm3624_vm10, %v3608_v19 }
 0x74e   : > { %v3610_v35 = vpop.permute.xlu1 %3609 }
 0x74f   : > { %3628 = vst.msk [vmem:[%s6674_s29 + $0x18] sm:$0xff] %vm3624_vm10, %v3610_v35 }
 0x752   : > { %v3612_v62 = vpop.permute.xlu0 %3611 }
 0x753   : > { %3629 = vst.msk [vmem:[%s6674_s29 + $0x20] sm:$0xff] %vm3624_vm10, %v3612_v62 }
 0x756   : > { %v3616_v57 = vpop.permute.xlu0 %3615  ;;  %v3614_v30 = vpop.permute.xlu1 %3613 }
 0x757   : > { %3631 = vst.msk [vmem:[%s6674_s29 + $0x30] sm:$0xff] %vm3624_vm10, %v3616_v57  ;;  %3630 = vst.msk [vmem:[%s6674_s29 + $0x28] sm:$0xff] %vm3624_vm10, %v3614_v30 }
 0x758   : > { %5579 = shalt.err (!%p5576_p4)
}
 0x759   : > { %s5580_s5 = scalar_lea.hbm %s7634_s0, 896  ;;  %s5584_s19 = scalar_lea.hbm %s7689_s4, 1792 }
 0x75a   : > { %p5581_p7 = scmp.ne.s32.totalorder %s7634_s0, %s5580_s5  ;;  %p5585_p11 = scmp.lt.u32.totalorder %s7634_s0, %s7689_s4 }
 0x75b   : > { %p5586_p0 = scmp.lt.u32.totalorder %s5584_s19, %s5580_s5  ;;  %p5588_p2 = scmp.lt.u32.totalorder %s5580_s5, %s7634_s0 }
 0x75c   : > { %p5582_p5 = pnand %p5581_p7, %p7799_p12 }
 0x75d   : > { %p5587_p1 = por %p5586_p0, %p5585_p11 }
 0x75e   : > { %p5583_p8 = pneg %p5582_p5 }
 0x75f   : > { %p5589_p10 = por %p5588_p2, %p5587_p1 }
 0x761   : > { %p5590_p13 = pnand %p5589_p10, %p5583_p8 }
 0x763   : > { %5593 = shalt.err (!%p5590_p13)
}
 0x764   : > { %s5666_s29 = smov 128  }
 0x765   : > { %4930 = dma.vmem_to_hbm [thread:$0]  (%p7799_p12), %s7636_s22, 896, %s7634_s0, %s3633_s8, %s5666_s29, %s5666_s29, %s5658_s10  }
 0x766 PF: > { %s7800_s13 = sld [smem:[#allocation19_spill]]  ;;  %s7801_s28 = sld [smem:[#allocation16_spill]] }
 0x767   : > { %s3661_s20 = sand.u32 1, %s5628_s15  }
 0x768   : > { %s3662_s24 = scalar_lea.sflag [#allocation4], %s3661_s20 }
 0x76c   : > { %p7802_p3 = scmp.ne.s32.totalorder %s7800_s13, 0  ;;  %p7803_p9 = scmp.ge.s32.totalorder %s7801_s28, 2 }
 0x76e   : > { %p4947_p6 = pnand %p7803_p9, %p7802_p3 }
 0x770   : > { %5623 = dma.done.wait (!%p4947_p6), %s3662_s24, 896  }
 0x771   : > { %5625 = vsyncadd (!%p4947_p6), %s3662_s24, 4294966400  ;;  %s7804_s18 = sld [smem:[#allocation17_spill]]  ;;  %s7805_s30 = sld [smem:[#allocation15_spill]] }
 0x772   : > { %s7806_s17 = sld [smem:[#allocation18_spill]]  ;;  %s7807_s15 = smov %s5632_s16 }
 0x777   : > { %p21_p4 = scmp.ge.s32.totalorder %s7804_s18, 4   ;;  %s7808_s16 = smov %s7805_s30 }
 0x779   :  { %23 = sbr.rel (!%p21_p4) target bundleno = 11 (0xb), region = 116 }
 0x780   :  { %3667 = vsyncpa [#allocation3], 1 }
 0x781   :  { %3669 = vsyncpa [#allocation3 + $0x1], 1 }
 0x782   :  { %3670 = vsyncpa [#allocation6], 1 }
 0x783   :  { %3672 = vsyncpa [#allocation6 + $0x1], 1 }
 0x784   :  { %3673 = vsyncpa [#allocation9], 1 }
 0x785   :  { %3674 = vsyncpa [#allocation4], 1 }
 0x786   :  { %3676 = vsyncpa [#allocation4 + $0x1], 1 }

</bundles_post_ra>
